<compile_context>
chip_gen: v7x
topology: tpu7x:2x2x1
jax: 0.10.0
libtpu: 0.0.40
codegen_flags: <defaults>
</compile_context>

<pallas_src>
import functools

import jax
import jax.numpy as jnp
from jax.experimental import pallas as pl
from jax.experimental.pallas import tpu as pltpu

_INV_SQRT2 = 0.7071067811865476


def _round_up(n, m):
    return ((n + m - 1) // m) * m


def _mlp_fused_kernel(x_ref, w1_ref, b1_ref, w2_ref, b2_ref, o_ref, *, approximate_gelu):
    x = x_ref[...]            # already in compute dtype (cast done wrapper-side)
    w1 = w1_ref[...]
    w2 = w2_ref[...]

    # fc1 (+ bias) with f32 accumulation on the MXU.
    h = jnp.dot(x, w1, preferred_element_type=jnp.float32) + b1_ref[...]

    # GELU in f32.  Exact erf matches torch.nn.GELU's default; tanh variant optional.
    if approximate_gelu:
        h = jax.nn.gelu(h, approximate=True)
    else:
        h = 0.5 * h * (1.0 + jax.lax.erf(h * _INV_SQRT2))

    # fc2 (+ bias), again f32 accumulation; operand cast back to compute dtype for MXU.
    y = jnp.dot(h.astype(w2.dtype), w2, preferred_element_type=jnp.float32) + b2_ref[...]

    o_ref[...] = y.astype(o_ref.dtype)


def mlp_pallas(x, w1, b1, w2, b2, *, block_rows=None, max_block_rows=512,
               compute_dtype=None, out_dtype=None, approximate_gelu=False):
    """Fused MLP: GELU(x @ w1 + b1) @ w2 + b2.

    x: (..., in_features); w1: (in_features, hidden); w2: (hidden, out_features).
    (Weights are stored transposed relative to PyTorch's nn.Linear (out, in) layout.)

    block_rows=None picks the tile automatically (single block for small row counts,
    balanced blocks capped at max_block_rows otherwise).  compute_dtype=jnp.bfloat16
    halves weight/activation DMA and runs native-rate MXU passes; accumulation and the
    GELU stay in f32.
    """
    lead_shape = x.shape[:-1]
    k_in = x.shape[-1]
    k1, h_dim = w1.shape
    h2, n_out = w2.shape
    assert k1 == k_in and h2 == h_dim, (x.shape, w1.shape, w2.shape)

    compute_dtype = jnp.dtype(compute_dtype) if compute_dtype is not None else x.dtype
    out_dtype = jnp.dtype(out_dtype) if out_dtype is not None else x.dtype

    # Wrapper-side casts: these happen BEFORE the HBM->VMEM DMA, so narrow dtypes
    # actually cut the dominant byte traffic (the kernel is HBM-bound at these shapes).
    x2 = x.reshape(-1, k_in).astype(compute_dtype)
    w1c = w1.astype(compute_dtype)
    w2c = w2.astype(compute_dtype)
    b1r = b1.reshape(1, h_dim).astype(jnp.float32)   # added to the f32 accumulator
    b2r = b2.reshape(1, n_out).astype(jnp.float32)

    m_rows = x2.shape[0]

    # Row alignment: 8 sublanes for 32-bit, 16 for 16-bit, 32 for 8-bit operands.
    row_align = 8 * max(1, 4 // compute_dtype.itemsize)

    if block_rows is None:
        if m_rows <= max_block_rows:
            tm = _round_up(m_rows, row_align)          # single block, no overhang step
        else:
            n_splits = pl.cdiv(m_rows, max_block_rows)
            tm = _round_up(pl.cdiv(m_rows, n_splits), row_align)  # balanced blocks
    else:
        tm = _round_up(block_rows, row_align)
    grid = (pl.cdiv(m_rows, tm),)

    # Advisory cost for XLA's scheduler around this micro-kernel.
    flops = 2 * m_rows * (k_in * h_dim + h_dim * n_out)
    transcendentals = m_rows * h_dim                   # one erf (or tanh) per hidden act
    bytes_accessed = (
        x2.size * x2.dtype.itemsize
        + w1c.size * w1c.dtype.itemsize
        + b1r.size * b1r.dtype.itemsize
        + w2c.size * w2c.dtype.itemsize
        + b2r.size * b2r.dtype.itemsize
        + m_rows * n_out * out_dtype.itemsize
    )
    cost = pl.CostEstimate(flops=flops, transcendentals=transcendentals,
                           bytes_accessed=bytes_accessed)

    out = pl.pallas_call(
        functools.partial(_mlp_fused_kernel, approximate_gelu=approximate_gelu),
        out_shape=jax.ShapeDtypeStruct((m_rows, n_out), out_dtype),
        grid=grid,
        in_specs=[
            pl.BlockSpec((tm, k_in), lambda i: (i, 0)),      # row tile of x
            pl.BlockSpec((k_in, h_dim), lambda i: (0, 0)),   # fc1 weight (VMEM resident)
            pl.BlockSpec((1, h_dim), lambda i: (0, 0)),      # fc1 bias   (VMEM resident)
            pl.BlockSpec((h_dim, n_out), lambda i: (0, 0)),  # fc2 weight (VMEM resident)
            pl.BlockSpec((1, n_out), lambda i: (0, 0)),      # fc2 bias   (VMEM resident)
        ],
        out_specs=pl.BlockSpec((tm, n_out), lambda i: (i, 0)),
        compiler_params=pltpu.CompilerParams(
            dimension_semantics=("parallel",),
        ),
        cost_estimate=cost,
    )(x2, w1c, b1r, w2c, b2r)

    return out.reshape(*lead_shape, n_out)


if __name__ == "__main__":
    # Shapes as the TimeSformer block uses this Mlp: embed_dim=192, mlp_ratio=4.0,
    # token slab (B, Np*T + 1, D) = (2, 16*9 + 1, 192) -> 290 rows.
    D_IN, D_HID, D_OUT = 192, 768, 192
    BATCH, SEQ = 2, 145

    key = jax.random.PRNGKey(0)
    k1, k2, k3, k4, kx = jax.random.split(key, 5)
    w1 = jax.random.normal(k1, (D_IN, D_HID), jnp.float32) * 0.02
    b1 = jax.random.normal(k2, (D_HID,), jnp.float32) * 0.02
    w2 = jax.random.normal(k3, (D_HID, D_OUT), jnp.float32) * 0.02
    b2 = jax.random.normal(k4, (D_OUT,), jnp.float32) * 0.02
    x = jax.random.normal(kx, (BATCH, SEQ, D_IN), jnp.float32)

    # Pure-JAX reference (exact erf GELU, f32 matmuls).
    def ref_mlp(x, w1, b1, w2, b2):
        h = jnp.dot(x, w1, precision=jax.lax.Precision.HIGHEST) + b1
        h = 0.5 * h * (1.0 + jax.lax.erf(h * _INV_SQRT2))
        return jnp.dot(h, w2, precision=jax.lax.Precision.HIGHEST) + b2

    y_ref = ref_mlp(x, w1, b1, w2, b2)

    # --- float32 path (default): tight numeric check against the reference. ---
    fwd_f32 = jax.jit(mlp_pallas)
    y = fwd_f32(x, w1, b1, w2, b2)
    jax.block_until_ready(y)

    assert y.shape == (BATCH, SEQ, D_OUT), y.shape
    assert bool(jnp.all(jnp.isfinite(y)))
    max_err = float(jnp.max(jnp.abs(y - y_ref)))
    assert bool(jnp.allclose(y, y_ref, rtol=1e-3, atol=1e-3)), f"f32 max abs err = {max_err}"

    # --- bfloat16 path (wrapper-side cast halves weight DMA): looser tolerance. ---
    fwd_bf16 = jax.jit(functools.partial(mlp_pallas, compute_dtype=jnp.bfloat16,
                                         out_dtype=jnp.float32))
    y_bf16 = fwd_bf16(x, w1, b1, w2, b2)
    jax.block_until_ready(y_bf16)

    assert y_bf16.shape == (BATCH, SEQ, D_OUT), y_bf16.shape
    assert bool(jnp.all(jnp.isfinite(y_bf16)))
    max_err_bf16 = float(jnp.max(jnp.abs(y_bf16 - y_ref)))
    assert bool(jnp.allclose(y_bf16, y_ref, rtol=2e-2, atol=2e-2)), \
        f"bf16 max abs err = {max_err_bf16}"

    print("KERNEL_OK")
</pallas_src>

<mosaic_0001>
module attributes {stable_mosaic.version = 11 : i64} {
  func.func @_mlp_fused_kernel(%arg0: i32, %arg1: memref<296x192xf32, #tpu.memory_space<vmem>>, %arg2: memref<192x768xf32, #tpu.memory_space<vmem>>, %arg3: memref<1x768xf32, #tpu.memory_space<vmem>>, %arg4: memref<768x192xf32, #tpu.memory_space<vmem>>, %arg5: memref<1x192xf32, #tpu.memory_space<vmem>>, %arg6: memref<296x192xf32, #tpu.memory_space<vmem>>) attributes {dimension_semantics = [#tpu.dimension_semantics<parallel>], iteration_bounds = array<i64: 1>, scalar_prefetch = 0 : i64, scratch_operands = 0 : i64, tpu.core_type = #tpu.core_type<tc>, window_params = [{transform_indices = @transform_0, window_bounds = array<i64: 296, 192>}, {pipeline_mode = #tpu.pipeline_mode<synchronous>, transform_indices = @transform_1, window_bounds = array<i64: 192, 768>}, {pipeline_mode = #tpu.pipeline_mode<synchronous>, transform_indices = @transform_2, window_bounds = array<i64: 1, 768>}, {pipeline_mode = #tpu.pipeline_mode<synchronous>, transform_indices = @transform_3, window_bounds = array<i64: 768, 192>}, {pipeline_mode = #tpu.pipeline_mode<synchronous>, transform_indices = @transform_4, window_bounds = array<i64: 1, 192>}, {transform_indices = @transform_5, window_bounds = array<i64: 296, 192>}]} {
    %c0 = arith.constant 0 : index
    %c0_0 = arith.constant 0 : index
    %0 = vector.load %arg1[%c0, %c0_0] : memref<296x192xf32, #tpu.memory_space<vmem>>, vector<296x192xf32>
    %c0_1 = arith.constant 0 : index
    %c0_2 = arith.constant 0 : index
    %1 = vector.load %arg2[%c0_1, %c0_2] : memref<192x768xf32, #tpu.memory_space<vmem>>, vector<192x768xf32>
    %c0_3 = arith.constant 0 : index
    %c0_4 = arith.constant 0 : index
    %2 = vector.load %arg4[%c0_3, %c0_4] : memref<768x192xf32, #tpu.memory_space<vmem>>, vector<768x192xf32>
    %cst = arith.constant dense<0.000000e+00> : vector<296x768xf32>
    %3 = tpu.matmul %0, %1, %cst {dimension_numbers = #tpu.dot_dimension_numbers<[1], [0], [0], [1], [0, 0, 1, 1], [], []>} : vector<296x192xf32>, vector<192x768xf32>, vector<296x768xf32> -> vector<296x768xf32>
    %c0_5 = arith.constant 0 : index
    %c0_6 = arith.constant 0 : index
    %4 = vector.load %arg3[%c0_5, %c0_6] : memref<1x768xf32, #tpu.memory_space<vmem>>, vector<1x768xf32>
    %5 = vector.broadcast %4 : vector<1x768xf32> to vector<296x768xf32>
    %6 = arith.addf %3, %5 : vector<296x768xf32>
    %cst_7 = arith.constant 5.000000e-01 : f32
    %7 = vector.broadcast %cst_7 : f32 to vector<296x768xf32>
    %8 = arith.mulf %7, %6 : vector<296x768xf32>
    %cst_8 = arith.constant 0.707106769 : f32
    %9 = vector.broadcast %cst_8 : f32 to vector<296x768xf32>
    %10 = arith.mulf %6, %9 : vector<296x768xf32>
    %11 = math.erf %10 : vector<296x768xf32>
    %cst_9 = arith.constant 1.000000e+00 : f32
    %12 = vector.broadcast %cst_9 : f32 to vector<296x768xf32>
    %13 = arith.addf %12, %11 : vector<296x768xf32>
    %14 = arith.mulf %8, %13 : vector<296x768xf32>
    %cst_10 = arith.constant dense<0.000000e+00> : vector<296x192xf32>
    %15 = tpu.matmul %14, %2, %cst_10 {dimension_numbers = #tpu.dot_dimension_numbers<[1], [0], [0], [1], [0, 0, 1, 1], [], []>} : vector<296x768xf32>, vector<768x192xf32>, vector<296x192xf32> -> vector<296x192xf32>
    %c0_11 = arith.constant 0 : index
    %c0_12 = arith.constant 0 : index
    %16 = vector.load %arg5[%c0_11, %c0_12] : memref<1x192xf32, #tpu.memory_space<vmem>>, vector<1x192xf32>
    %17 = vector.broadcast %16 : vector<1x192xf32> to vector<296x192xf32>
    %18 = arith.addf %15, %17 : vector<296x192xf32>
    %c0_13 = arith.constant 0 : index
    %c0_14 = arith.constant 0 : index
    %19 = vector.load %arg6[%c0_13, %c0_14] : memref<296x192xf32, #tpu.memory_space<vmem>>, vector<296x192xf32>
    tpu.vector_store %arg6[%c0_13, %c0_14], %18 {strides = array<i32>} : memref<296x192xf32, #tpu.memory_space<vmem>>, vector<296x192xf32>,
    return
  }
  func.func @transform_0(%arg0: i32) -> (i32, i32) {
    %c0_i32 = arith.constant 0 : i32
    %c0_i32_0 = arith.constant 0 : i32
    return %arg0, %c0_i32 : i32, i32
  }
  func.func @transform_1(%arg0: i32) -> (i32, i32) {
    %c0_i32 = arith.constant 0 : i32
    %c0_i32_0 = arith.constant 0 : i32
    %c0_i32_1 = arith.constant 0 : i32
    return %c0_i32, %c0_i32_0 : i32, i32
  }
  func.func @transform_2(%arg0: i32) -> (i32, i32) {
    %c0_i32 = arith.constant 0 : i32
    %c0_i32_0 = arith.constant 0 : i32
    %c0_i32_1 = arith.constant 0 : i32
    return %c0_i32, %c0_i32_0 : i32, i32
  }
  func.func @transform_3(%arg0: i32) -> (i32, i32) {
    %c0_i32 = arith.constant 0 : i32
    %c0_i32_0 = arith.constant 0 : i32
    %c0_i32_1 = arith.constant 0 : i32
    return %c0_i32, %c0_i32_0 : i32, i32
  }
  func.func @transform_4(%arg0: i32) -> (i32, i32) {
    %c0_i32 = arith.constant 0 : i32
    %c0_i32_0 = arith.constant 0 : i32
    %c0_i32_1 = arith.constant 0 : i32
    return %c0_i32, %c0_i32_0 : i32, i32
  }
  func.func @transform_5(%arg0: i32) -> (i32, i32) {
    %c0_i32 = arith.constant 0 : i32
    %c0_i32_0 = arith.constant 0 : i32
    return %arg0, %c0_i32 : i32, i32
  }
}

</mosaic_0001>

<bundles_post_ra>
// kernel: mlp_pallas.1
= control target key start
LH: loop header
LB: loop body
LE: loop exit
PB: predicated region body
PF: predicated region fallthrough
CT: control target
= control target key end

     0   :  { %vm462_vm0 = vcmask 523264   ;;  %s9131_s1 = inlined_call_operand.vmem [shape: f32[192,768], index: 1, kind: input, shape index: {}]   ;;  %s9132_s0 = inlined_call_operand.vmem [shape: f32[290,192], index: 0, kind: input, shape index: {}]   ;;  %s9133_s3 = inlined_call_operand.vmem [shape: f32[768,192], index: 3, kind: input, shape index: {}]   ;;  %s9134_s2 = inlined_call_operand.vmem [shape: f32[1,768], index: 2, kind: input, shape index: {}]   ;;  %s9135_s4 = inlined_call_operand.vmem [shape: f32[1,192], index: 4, kind: input, shape index: {}]   ;;  %s9136_s5 = inlined_call_operand.vmem [shape: f32[290,192], index: 5, kind: output, shape index: {}]  }
   0x1   :  { %v95_v0 = vld [vmem:[%s9131_s1 + $0x8] sm:$0xff]  ;;  %v101_v1 = vld [vmem:[%s9131_s1 + $0x38] sm:$0xff]  ;;  %v94_v5 = vld [vmem:[%s9131_s1] sm:$0xff] }
   0x2   :  { %v97_v2 = vld [vmem:[%s9131_s1 + $0x18] sm:$0xff]  ;;  %v3607_v3 = vpack.c.bf16 %v101_v1, %v95_v0  ;;  %v103_v4 = vld [vmem:[%s9131_s1 + $0x48] sm:$0xff]  ;;  %v100_v6 = vld [vmem:[%s9131_s1 + $0x30] sm:$0xff] }
   0x3   :  { %v3655_v7 = vpack.c.bf16 %v103_v4, %v97_v2  ;;  %v3609_v8 = vpack.c.bf16 %v100_v6, %v94_v5  ;;  %v96_v9 = vld [vmem:[%s9131_s1 + $0x10] sm:$0xff]  ;;  %v102_v10 = vld [vmem:[%s9131_s1 + $0x40] sm:$0xff]  ;;  %v107_v11 = vld [vmem:[%s9131_s1 + $0x68] sm:$0xff] }
   0x4   :  { %3608 = vmatprep.subr.bf16.mxu0 %v3607_v3  ;;  %v3657_v12 = vpack.c.bf16 %v102_v10, %v96_v9  ;;  %v113_v13 = vld [vmem:[%s9131_s1 + $0x98] sm:$0xff]  ;;  %v115_v15 = vld [vmem:[%s9131_s1 + $0xa8] sm:$0xff]  ;;  %v106_v18 = vld [vmem:[%s9131_s1 + $0x60] sm:$0xff] }
   0x5   :  { %v109_v14 = vld [vmem:[%s9131_s1 + $0x78] sm:$0xff]  ;;  %3656 = vmatprep.subr.bf16.mxu1 %v3655_v7  ;;  %3610 = vmatpush1.bf16.msra.mxu0 %v3609_v8  ;;  %v3611_v16 = vpack.c.bf16 %v113_v13, %v107_v11  ;;  %v112_v19 = vld [vmem:[%s9131_s1 + $0x90] sm:$0xff]  ;;  %v114_v22 = vld [vmem:[%s9131_s1 + $0xa0] sm:$0xff] }
   0x6   :  { %v3659_v17 = vpack.c.bf16 %v115_v15, %v109_v14  ;;  %v108_v20 = vld [vmem:[%s9131_s1 + $0x70] sm:$0xff]  ;;  %3658 = vmatpush1.bf16.msra.mxu1 %v3657_v12  ;;  %v3613_v21 = vpack.c.bf16 %v112_v19, %v106_v18  ;;  %v119_v23 = vld [vmem:[%s9131_s1 + $0xc8] sm:$0xff]  ;;  %v125_v24 = vld [vmem:[%s9131_s1 + $0xf8] sm:$0xff] }
   0x7   :  { %3612 = vmatprep.subr.bf16.mxu0 %v3611_v16  ;;  %v3661_v25 = vpack.c.bf16 %v114_v22, %v108_v20  ;;  %v3615_v26 = vpack.c.bf16 %v125_v24, %v119_v23  ;;  %v121_v27 = vld [vmem:[%s9131_s1 + $0xd8] sm:$0xff]  ;;  %v127_v28 = vld [vmem:[%s9131_s1 + $0x108] sm:$0xff]  ;;  %v118_v29 = vld [vmem:[%s9131_s1 + $0xc0] sm:$0xff] }
   0x8   :  { %3660 = vmatprep.subr.bf16.mxu1 %v3659_v17  ;;  %v3663_v30 = vpack.c.bf16 %v127_v28, %v121_v27  ;;  %v124_v31 = vld [vmem:[%s9131_s1 + $0xf0] sm:$0xff]  ;;  %v126_v33 = vld [vmem:[%s9131_s1 + $0x100] sm:$0xff]  ;;  %v131_v35 = vld [vmem:[%s9131_s1 + $0x128] sm:$0xff] }
   0x9   :  { %v120_v32 = vld [vmem:[%s9131_s1 + $0xd0] sm:$0xff]  ;;  %3614 = vmatpush1.bf16.msra.mxu0 %v3613_v21  ;;  %v3617_v34 = vpack.c.bf16 %v124_v31, %v118_v29  ;;  %v137_v36 = vld [vmem:[%s9131_s1 + $0x158] sm:$0xff]  ;;  %v139_v40 = vld [vmem:[%s9131_s1 + $0x168] sm:$0xff] }
   0xa   :  { %v133_v37 = vld [vmem:[%s9131_s1 + $0x138] sm:$0xff]  ;;  %3662 = vmatpush1.bf16.msra.mxu1 %v3661_v25  ;;  %3616 = vmatprep.subr.bf16.mxu0 %v3615_v26  ;;  %v3665_v38 = vpack.c.bf16 %v126_v33, %v120_v32  ;;  %v3619_v39 = vpack.c.bf16 %v137_v36, %v131_v35  ;;  %v130_v41 = vld [vmem:[%s9131_s1 + $0x120] sm:$0xff]  ;;  %v136_v42 = vld [vmem:[%s9131_s1 + $0x150] sm:$0xff] }
   0xb   :  { %3664 = vmatprep.subr.bf16.mxu1 %v3663_v30  ;;  %v3667_v43 = vpack.c.bf16 %v139_v40, %v133_v37  ;;  %v132_v44 = vld [vmem:[%s9131_s1 + $0x130] sm:$0xff]  ;;  %v138_v45 = vld [vmem:[%s9131_s1 + $0x160] sm:$0xff]  ;;  %v143_v46 = vld [vmem:[%s9131_s1 + $0x188] sm:$0xff]  ;;  %v3621_v50 = vpack.c.bf16 %v136_v42, %v130_v41 }
   0xc   :  { %v149_v47 = vld [vmem:[%s9131_s1 + $0x1b8] sm:$0xff]  ;;  %v151_v49 = vld [vmem:[%s9131_s1 + $0x1c8] sm:$0xff]  ;;  %v3669_v51 = vpack.c.bf16 %v138_v45, %v132_v44  ;;  %v142_v53 = vld [vmem:[%s9131_s1 + $0x180] sm:$0xff] }
   0xd   :  { %v145_v48 = vld [vmem:[%s9131_s1 + $0x198] sm:$0xff]  ;;  %3618 = vmatpush1.bf16.msra.mxu0 %v3617_v34  ;;  %v3623_v52 = vpack.c.bf16 %v149_v47, %v143_v46  ;;  %v148_v54 = vld [vmem:[%s9131_s1 + $0x1b0] sm:$0xff]  ;;  %v150_v57 = vld [vmem:[%s9131_s1 + $0x1c0] sm:$0xff] }
   0xe   :  { %3666 = vmatpush1.bf16.msra.mxu1 %v3665_v38  ;;  %3620 = vmatprep.subr.bf16.mxu0 %v3619_v39  ;;  %v144_v55 = vld [vmem:[%s9131_s1 + $0x190] sm:$0xff]  ;;  %v3671_v56 = vpack.c.bf16 %v151_v49, %v145_v48  ;;  %v155_v58 = vld [vmem:[%s9131_s1 + $0x1e8] sm:$0xff]  ;;  %v161_v59 = vld [vmem:[%s9131_s1 + $0x218] sm:$0xff]  ;;  %v3625_v62 = vpack.c.bf16 %v148_v54, %v142_v53 }
   0xf   :  { %3668 = vmatprep.subr.bf16.mxu1 %v3667_v43  ;;  %v157_v60 = vld [vmem:[%s9131_s1 + $0x1f8] sm:$0xff]  ;;  %v163_v61 = vld [vmem:[%s9131_s1 + $0x228] sm:$0xff]  ;;  %v3673_v63 = vpack.c.bf16 %v150_v57, %v144_v55  ;;  %v3627_v0 = vpack.c.bf16 %v161_v59, %v155_v58  ;;  %v154_v1 = vld [vmem:[%s9131_s1 + $0x1e0] sm:$0xff] }
  0x10   :  { %v160_v2 = vld [vmem:[%s9131_s1 + $0x210] sm:$0xff]  ;;  %v3675_v4 = vpack.c.bf16 %v163_v61, %v157_v60  ;;  %v162_v5 = vld [vmem:[%s9131_s1 + $0x220] sm:$0xff]  ;;  %v167_v6 = vld [vmem:[%s9131_s1 + $0x248] sm:$0xff] }
  0x11   :  { %3622 = vmatpush1.bf16.msra.mxu0 %v3621_v50  ;;  %v156_v3 = vld [vmem:[%s9131_s1 + $0x1f0] sm:$0xff]  ;;  %v173_v7 = vld [vmem:[%s9131_s1 + $0x278] sm:$0xff]  ;;  %v175_v9 = vld [vmem:[%s9131_s1 + $0x288] sm:$0xff]  ;;  %v3629_v10 = vpack.c.bf16 %v160_v2, %v154_v1 }
  0x12   :  { %3670 = vmatpush1.bf16.msra.mxu1 %v3669_v51  ;;  %3624 = vmatprep.subr.bf16.mxu0 %v3623_v52  ;;  %v169_v8 = vld [vmem:[%s9131_s1 + $0x258] sm:$0xff]  ;;  %v3677_v11 = vpack.c.bf16 %v162_v5, %v156_v3  ;;  %v3631_v12 = vpack.c.bf16 %v173_v7, %v167_v6  ;;  %v166_v13 = vld [vmem:[%s9131_s1 + $0x240] sm:$0xff]  ;;  %v172_v14 = vld [vmem:[%s9131_s1 + $0x270] sm:$0xff] }
  0x13   :  { %3672 = vmatprep.subr.bf16.mxu1 %v3671_v56  ;;  %v168_v15 = vld [vmem:[%s9131_s1 + $0x250] sm:$0xff]  ;;  %v3679_v16 = vpack.c.bf16 %v175_v9, %v169_v8  ;;  %v174_v17 = vld [vmem:[%s9131_s1 + $0x280] sm:$0xff]  ;;  %v179_v18 = vld [vmem:[%s9131_s1 + $0x2a8] sm:$0xff]  ;;  %v3633_v22 = vpack.c.bf16 %v172_v14, %v166_v13 }
  0x14   :  { %v185_v19 = vld [vmem:[%s9131_s1 + $0x2d8] sm:$0xff]  ;;  %v187_v21 = vld [vmem:[%s9131_s1 + $0x2e8] sm:$0xff]  ;;  %v3681_v23 = vpack.c.bf16 %v174_v17, %v168_v15  ;;  %v178_v25 = vld [vmem:[%s9131_s1 + $0x2a0] sm:$0xff] }
  0x15   :  { %3626 = vmatpush1.bf16.msra.mxu0 %v3625_v62  ;;  %v181_v20 = vld [vmem:[%s9131_s1 + $0x2b8] sm:$0xff]  ;;  %v3635_v24 = vpack.c.bf16 %v185_v19, %v179_v18  ;;  %v184_v26 = vld [vmem:[%s9131_s1 + $0x2d0] sm:$0xff]  ;;  %v186_v29 = vld [vmem:[%s9131_s1 + $0x2e0] sm:$0xff] }
  0x16   :  { %3674 = vmatpush1.bf16.msra.mxu1 %v3673_v63  ;;  %3628 = vmatprep.subr.bf16.mxu0 %v3627_v0  ;;  %v180_v27 = vld [vmem:[%s9131_s1 + $0x2b0] sm:$0xff]  ;;  %v3683_v28 = vpack.c.bf16 %v187_v21, %v181_v20  ;;  %v191_v30 = vld [vmem:[%s9131_s1 + $0x308] sm:$0xff]  ;;  %v197_v31 = vld [vmem:[%s9131_s1 + $0x338] sm:$0xff]  ;;  %v3637_v34 = vpack.c.bf16 %v184_v26, %v178_v25 }
  0x17   :  { %3676 = vmatprep.subr.bf16.mxu1 %v3675_v4  ;;  %v193_v32 = vld [vmem:[%s9131_s1 + $0x318] sm:$0xff]  ;;  %v199_v33 = vld [vmem:[%s9131_s1 + $0x348] sm:$0xff]  ;;  %v3685_v35 = vpack.c.bf16 %v186_v29, %v180_v27  ;;  %v3639_v36 = vpack.c.bf16 %v197_v31, %v191_v30  ;;  %v190_v37 = vld [vmem:[%s9131_s1 + $0x300] sm:$0xff] }
  0x18   :  { %v196_v38 = vld [vmem:[%s9131_s1 + $0x330] sm:$0xff]  ;;  %v3687_v40 = vpack.c.bf16 %v199_v33, %v193_v32  ;;  %v198_v41 = vld [vmem:[%s9131_s1 + $0x340] sm:$0xff]  ;;  %v203_v42 = vld [vmem:[%s9131_s1 + $0x368] sm:$0xff] }
  0x19   :  { %3630 = vmatpush1.bf16.msra.mxu0 %v3629_v10  ;;  %v192_v39 = vld [vmem:[%s9131_s1 + $0x310] sm:$0xff]  ;;  %v209_v43 = vld [vmem:[%s9131_s1 + $0x398] sm:$0xff]  ;;  %v211_v45 = vld [vmem:[%s9131_s1 + $0x3a8] sm:$0xff]  ;;  %v3641_v46 = vpack.c.bf16 %v196_v38, %v190_v37 }
  0x1a   :  { %3678 = vmatpush1.bf16.msra.mxu1 %v3677_v11  ;;  %3632 = vmatprep.subr.bf16.mxu0 %v3631_v12  ;;  %v205_v44 = vld [vmem:[%s9131_s1 + $0x378] sm:$0xff]  ;;  %v4888_v47 = vld [vmem:[%s9132_s0 + $0x8] sm:$0xff]  ;;  %v3689_v48 = vpack.c.bf16 %v198_v41, %v192_v39  ;;  %v3643_v49 = vpack.c.bf16 %v209_v43, %v203_v42  ;;  %v202_v50 = vld [vmem:[%s9131_s1 + $0x360] sm:$0xff] }
  0x1b   :  { %3680 = vmatprep.subr.bf16.mxu1 %v3679_v16  ;;  %v208_v51 = vld [vmem:[%s9131_s1 + $0x390] sm:$0xff]  ;;  %v3691_v53 = vpack.c.bf16 %v211_v45, %v205_v44  ;;  %v210_v54 = vld [vmem:[%s9131_s1 + $0x3a0] sm:$0xff]  ;;  %v215_v55 = vld [vmem:[%s9131_s1 + $0x3c8] sm:$0xff]  ;;  %3496 = vmatprep.mubr.msk.f32.mxu0 %vm462_vm0, %v4888_v47 }
  0x1c   :  { %v204_v52 = vld [vmem:[%s9131_s1 + $0x370] sm:$0xff]  ;;  %v221_v56 = vld [vmem:[%s9131_s1 + $0x3f8] sm:$0xff]  ;;  %v223_v58 = vld [vmem:[%s9131_s1 + $0x408] sm:$0xff]  ;;  %3533 = vmatprep.mubr.msk.f32.mxu1 %vm462_vm0, %v4888_v47  ;;  %v3645_v59 = vpack.c.bf16 %v208_v51, %v202_v50 }
  0x1d   :  { %3634 = vmatpush1.bf16.msra.mxu0 %v3633_v22  ;;  %v217_v57 = vld [vmem:[%s9131_s1 + $0x3d8] sm:$0xff]  ;;  %v3693_v60 = vpack.c.bf16 %v210_v54, %v204_v52  ;;  %v3647_v61 = vpack.c.bf16 %v221_v56, %v215_v55  ;;  %v214_v62 = vld [vmem:[%s9131_s1 + $0x3c0] sm:$0xff]  ;;  %v220_v63 = vld [vmem:[%s9131_s1 + $0x3f0] sm:$0xff] }
  0x1e   :  { %3682 = vmatpush1.bf16.msra.mxu1 %v3681_v23  ;;  %3636 = vmatprep.subr.bf16.mxu0 %v3635_v24  ;;  %v216_v0 = vld [vmem:[%s9131_s1 + $0x3d0] sm:$0xff]  ;;  %v3695_v1 = vpack.c.bf16 %v223_v58, %v217_v57  ;;  %v222_v2 = vld [vmem:[%s9131_s1 + $0x400] sm:$0xff]  ;;  %v227_v3 = vld [vmem:[%s9131_s1 + $0x428] sm:$0xff]  ;;  %v3649_v7 = vpack.c.bf16 %v220_v63, %v214_v62 }
  0x1f   :  { %3684 = vmatprep.subr.bf16.mxu1 %v3683_v28  ;;  %v233_v4 = vld [vmem:[%s9131_s1 + $0x458] sm:$0xff]  ;;  %v235_v6 = vld [vmem:[%s9131_s1 + $0x468] sm:$0xff]  ;;  %v3697_v8 = vpack.c.bf16 %v222_v2, %v216_v0  ;;  %v226_v10 = vld [vmem:[%s9131_s1 + $0x420] sm:$0xff] }
  0x20   :  { %v229_v5 = vld [vmem:[%s9131_s1 + $0x438] sm:$0xff]  ;;  %v3651_v9 = vpack.c.bf16 %v233_v4, %v227_v3  ;;  %v232_v11 = vld [vmem:[%s9131_s1 + $0x450] sm:$0xff]  ;;  %v234_v14 = vld [vmem:[%s9131_s1 + $0x460] sm:$0xff] }
  0x21   :  { %3638 = vmatpush1.bf16.msra.mxu0 %v3637_v34  ;;  %v228_v12 = vld [vmem:[%s9131_s1 + $0x430] sm:$0xff]  ;;  %v3699_v13 = vpack.c.bf16 %v235_v6, %v229_v5  ;;  %v99_v15 = vld [vmem:[%s9131_s1 + $0x28] sm:$0xff]  ;;  %v105_v16 = vld [vmem:[%s9131_s1 + $0x58] sm:$0xff]  ;;  %v3653_v17 = vpack.c.bf16 %v232_v11, %v226_v10 }
  0x22   :  { %3686 = vmatpush1.bf16.msra.mxu1 %v3685_v35  ;;  %3640 = vmatprep.subr.bf16.mxu0 %v3639_v36  ;;  %v3701_v18 = vpack.c.bf16 %v234_v14, %v228_v12  ;;  %v3703_v19 = vpack.c.bf16 %v105_v16, %v99_v15  ;;  %v98_v20 = vld [vmem:[%s9131_s1 + $0x20] sm:$0xff]  ;;  %v104_v21 = vld [vmem:[%s9131_s1 + $0x50] sm:$0xff]  ;;  %v111_v22 = vld [vmem:[%s9131_s1 + $0x88] sm:$0xff] }
  0x23   :  { %3688 = vmatprep.subr.bf16.mxu1 %v3687_v40  ;;  %v117_v23 = vld [vmem:[%s9131_s1 + $0xb8] sm:$0xff]  ;;  %v4975_v24 = vld [vmem:[%s9132_s0] sm:$0xff]  ;;  %v3705_v25 = vpack.c.bf16 %v104_v21, %v98_v20  ;;  %v116_v29 = vld [vmem:[%s9131_s1 + $0xb0] sm:$0xff] }
  0x24   :  { %v4980_v26 = vld [vmem:[%s9132_s0 + $0x18] sm:$0xff]  ;;  %v3707_v27 = vpack.c.bf16 %v117_v23, %v111_v22  ;;  %v110_v28 = vld [vmem:[%s9131_s1 + $0x80] sm:$0xff]  ;;  %v123_v30 = vld [vmem:[%s9131_s1 + $0xe8] sm:$0xff] }
  0x25   :  { %3642 = vmatpush1.bf16.msra.mxu0 %v3641_v46  ;;  %v129_v31 = vld [vmem:[%s9131_s1 + $0x118] sm:$0xff]  ;;  %v4999_v32 = vld [vmem:[%s9132_s0 + $0x10] sm:$0xff]  ;;  %v5008_v33 = vld [vmem:[%s9132_s0 + $0x28] sm:$0xff]  ;;  %v3709_v34 = vpack.c.bf16 %v116_v29, %v110_v28 }
  0x26   :  { %3690 = vmatpush1.bf16.msra.mxu1 %v3689_v48  ;;  %3644 = vmatprep.subr.bf16.mxu0 %v3643_v49  ;;  %v3711_v35 = vpack.c.bf16 %v129_v31, %v123_v30  ;;  %v122_v36 = vld [vmem:[%s9131_s1 + $0xe0] sm:$0xff]  ;;  %v128_v37 = vld [vmem:[%s9131_s1 + $0x110] sm:$0xff]  ;;  %v135_v39 = vld [vmem:[%s9131_s1 + $0x148] sm:$0xff] }
  0x27   :  { %3692 = vmatprep.subr.bf16.mxu1 %v3691_v53  ;;  %v5020_v38 = vld [vmem:[%s9132_s0 + $0x20] sm:$0xff]  ;;  %v141_v40 = vld [vmem:[%s9131_s1 + $0x178] sm:$0xff]  ;;  %v303_v41 = vld [vmem:[%s9133_s3 + $0x208] sm:$0xff]  ;;  %v3713_v45 = vpack.c.bf16 %v128_v37, %v122_v36 }
  0x28   :  { %v305_v42 = vld [vmem:[%s9133_s3 + $0x218] sm:$0xff]  ;;  %v302_v43 = vld [vmem:[%s9133_s3 + $0x200] sm:$0xff]  ;;  %v304_v48 = vld [vmem:[%s9133_s3 + $0x210] sm:$0xff]  ;;  %v3715_v49 = vpack.c.bf16 %v141_v40, %v135_v39 }
  0x29   :  { %3646 = vmatpush1.bf16.msra.mxu0 %v3645_v59  ;;  %v5045_v44 = vld [vmem:[%s9132_s0 + $0x38] sm:$0xff]  ;;  %v3815_v46 = vpack.c.bf16 %v305_v42, %v303_v41  ;;  %v134_v50 = vld [vmem:[%s9131_s1 + $0x140] sm:$0xff]  ;;  %v140_v51 = vld [vmem:[%s9131_s1 + $0x170] sm:$0xff]  ;;  %v3817_v52 = vpack.c.bf16 %v304_v48, %v302_v43 }
  0x2a   :  { %3694 = vmatpush1.bf16.msra.mxu1 %v3693_v60  ;;  %3648 = vmatprep.subr.bf16.mxu0 %v3647_v61  ;;  %v147_v53 = vld [vmem:[%s9131_s1 + $0x1a8] sm:$0xff]  ;;  %v153_v54 = vld [vmem:[%s9131_s1 + $0x1d8] sm:$0xff]  ;;  %v5069_v55 = vld [vmem:[%s9132_s0 + $0x30] sm:$0xff]  ;;  %v3717_v59 = vpack.c.bf16 %v140_v51, %v134_v50 }
  0x2b   :  { %3696 = vmatprep.subr.bf16.mxu1 %v3695_v1  ;;  %v307_v56 = vld [vmem:[%s9133_s3 + $0x228] sm:$0xff]  ;;  %v309_v57 = vld [vmem:[%s9133_s3 + $0x238] sm:$0xff]  ;;  %v306_v61 = vld [vmem:[%s9133_s3 + $0x220] sm:$0xff]  ;;  %v3719_v63 = vpack.c.bf16 %v153_v54, %v147_v53 }
  0x2c   :  { %v5082_v58 = vld [vmem:[%s9132_s0 + $0x48] sm:$0xff]  ;;  %v3819_v60 = vpack.c.bf16 %v309_v57, %v307_v56  ;;  %v308_v62 = vld [vmem:[%s9133_s3 + $0x230] sm:$0xff]  ;;  %v146_v0 = vld [vmem:[%s9131_s1 + $0x1a0] sm:$0xff] }
  0x2d   :  { %3650 = vmatpush1.bf16.msra.mxu0 %v3649_v7  ;;  %v152_v1 = vld [vmem:[%s9131_s1 + $0x1d0] sm:$0xff]  ;;  %v3821_v2 = vpack.c.bf16 %v308_v62, %v306_v61  ;;  %v159_v3 = vld [vmem:[%s9131_s1 + $0x208] sm:$0xff]  ;;  %v165_v4 = vld [vmem:[%s9131_s1 + $0x238] sm:$0xff] }
  0x2e   :  { %3698 = vmatpush1.bf16.msra.mxu1 %v3697_v8  ;;  %3652 = vmatprep.subr.bf16.mxu0 %v3651_v9  ;;  %v5109_v5 = vld [vmem:[%s9132_s0 + $0x40] sm:$0xff]  ;;  %v5114_v6 = vld [vmem:[%s9132_s0 + $0x58] sm:$0xff]  ;;  %v311_v7 = vld [vmem:[%s9133_s3 + $0x248] sm:$0xff]  ;;  %v3721_v8 = vpack.c.bf16 %v152_v1, %v146_v0  ;;  %v3723_v12 = vpack.c.bf16 %v165_v4, %v159_v3 }
  0x2f   :  { %3700 = vmatprep.subr.bf16.mxu1 %v3699_v13  ;;  %v313_v9 = vld [vmem:[%s9133_s3 + $0x258] sm:$0xff]  ;;  %v310_v10 = vld [vmem:[%s9133_s3 + $0x240] sm:$0xff]  ;;  %v312_v11 = vld [vmem:[%s9133_s3 + $0x250] sm:$0xff] }
  0x30   :  { %v158_v13 = vld [vmem:[%s9131_s1 + $0x200] sm:$0xff]  ;;  %v164_v14 = vld [vmem:[%s9131_s1 + $0x230] sm:$0xff]  ;;  %v3823_v15 = vpack.c.bf16 %v313_v9, %v311_v7  ;;  %v171_v16 = vld [vmem:[%s9131_s1 + $0x268] sm:$0xff] }
  0x31   :  { %3654 = vmatpush1.bf16.msra.mxu0 %v3653_v17  ;;  %v177_v17 = vld [vmem:[%s9131_s1 + $0x298] sm:$0xff]  ;;  %v5154_v20 = vld [vmem:[%s9132_s0 + $0x68] sm:$0xff]  ;;  %v3725_v22 = vpack.c.bf16 %v164_v14, %v158_v13  ;;  %v170_v29 = vld [vmem:[%s9131_s1 + $0x260] sm:$0xff] }
  0x32   :  { %3702 = vmatpush1.bf16.msra.mxu1 %v3701_v18  ;;  %3704 = vmatprep.subr.bf16.mxu0 %v3703_v19  ;;  %v3825_v18 = vpack.c.bf16 %v312_v11, %v310_v10  ;;  %v5149_v19 = vld [vmem:[%s9132_s0 + $0x50] sm:$0xff]  ;;  %v315_v21 = vld [vmem:[%s9133_s3 + $0x268] sm:$0xff]  ;;  %v317_v23 = vld [vmem:[%s9133_s3 + $0x278] sm:$0xff]  ;;  %v3727_v28 = vpack.c.bf16 %v177_v17, %v171_v16 }
  0x33   :  { %3816 = vmatprep.subr.bf16.mxu1 %v3815_v46  ;;  %v176_v30 = vld [vmem:[%s9131_s1 + $0x290] sm:$0xff]  ;;  %v183_v31 = vld [vmem:[%s9131_s1 + $0x2c8] sm:$0xff]  ;;  %v321_v39 = vld [vmem:[%s9133_s3 + $0x298] sm:$0xff] }
  0x34   :  { %639 = vmatmul.mubr.f32.vlgmr.msra.gmra.mrb[0].mxu0 %v4975_v24  ;;  %v319_v37 = vld [vmem:[%s9133_s3 + $0x288] sm:$0xff]  ;;  %v5195_v40 = vld [vmem:[%s9132_s0 + $0x60] sm:$0xff]  ;;  %v320_v42 = vld [vmem:[%s9133_s3 + $0x290] sm:$0xff] }
  0x35   :  { %926 = vmatmul.mubr.f32.vlgmr.msra.gmra.mrb[0].mxu1 %v4975_v24  ;;  %3706 = vmatpush1.bf16.msra.mxu0 %v3705_v25  ;;  %v314_v25 = vld [vmem:[%s9133_s3 + $0x260] sm:$0xff]  ;;  %v5208_v43 = vld [vmem:[%s9132_s0 + $0x78] sm:$0xff]  ;;  %v3831_v50 = vpack.c.bf16 %v321_v39, %v319_v37  ;;  %v5220_v51 = vld [vmem:[%s9132_s0 + $0x70] sm:$0xff] }
  0x36   :  { %3497 = vmatprep.mubr.msk.f32.mxu0 %vm462_vm0, %v4980_v26  ;;  %3534 = vmatprep.mubr.msk.f32.mxu1 %vm462_vm0, %v4980_v26  ;;  %v318_v41 = vld [vmem:[%s9133_s3 + $0x280] sm:$0xff]  ;;  %v201_v53 = vld [vmem:[%s9131_s1 + $0x358] sm:$0xff]  ;;  %v323_v56 = vld [vmem:[%s9133_s3 + $0x2a8] sm:$0xff] }
  0x37   :  { %3708 = vmatprep.subr.bf16.mxu0 %v3707_v27  ;;  %3818 = vmatpush1.bf16.msra.mxu1 %v3817_v52  ;;  %v316_v27 = vld [vmem:[%s9133_s3 + $0x270] sm:$0xff]  ;;  %v182_v48 = vld [vmem:[%s9131_s1 + $0x2c0] sm:$0xff]  ;;  %v195_v52 = vld [vmem:[%s9131_s1 + $0x328] sm:$0xff]  ;;  %v3833_v54 = vpack.c.bf16 %v320_v42, %v318_v41 }
  0x38   :  { %645 = vmatmul.mubr.f32.gmra.mrb[2].mxu0 %v4999_v32  ;;  %3820 = vmatprep.subr.bf16.mxu1 %v3819_v60  ;;  %v3829_v36 = vpack.c.bf16 %v316_v27, %v314_v25  ;;  %v325_v57 = vld [vmem:[%s9133_s3 + $0x2b8] sm:$0xff]  ;;  %v5245_v60 = vld [vmem:[%s9132_s0 + $0x88] sm:$0xff]  ;;  %v324_v62 = vld [vmem:[%s9133_s3 + $0x2b0] sm:$0xff] }
  0x39   :  { %932 = vmatmul.mubr.f32.gmra.mrb[2].mxu1 %v4999_v32  ;;  %3498 = vmatprep.mubr.msk.f32.mxu0 %vm462_vm0, %v5008_v33  ;;  %v194_v0 = vld [vmem:[%s9131_s1 + $0x320] sm:$0xff]  ;;  %v200_v1 = vld [vmem:[%s9131_s1 + $0x350] sm:$0xff]  ;;  %v207_v4 = vld [vmem:[%s9131_s1 + $0x388] sm:$0xff] }
  0x3a   :  { %3535 = vmatprep.mubr.msk.f32.mxu1 %vm462_vm0, %v5008_v33  ;;  %3710 = vmatpush1.bf16.msra.mxu0 %v3709_v34  ;;  %v3827_v34 = vpack.c.bf16 %v317_v23, %v315_v21  ;;  %v5260_v3 = vld [vmem:[%s9132_s0 + $0x80] sm:$0xff]  ;;  %v213_v7 = vld [vmem:[%s9131_s1 + $0x3b8] sm:$0xff]  ;;  %v327_v9 = vld [vmem:[%s9133_s3 + $0x2c8] sm:$0xff]  ;;  %v3737_v13 = vpack.c.bf16 %v200_v1, %v194_v0 }
  0x3b   :  { %3712 = vmatprep.subr.bf16.mxu0 %v3711_v35  ;;  %3822 = vmatpush1.bf16.msra.mxu1 %v3821_v2  ;;  %v189_v35 = vld [vmem:[%s9131_s1 + $0x2f8] sm:$0xff]  ;;  %v3835_v2 = vpack.c.bf16 %v325_v57, %v323_v56  ;;  %v326_v11 = vld [vmem:[%s9133_s3 + $0x2c0] sm:$0xff]  ;;  %v328_v14 = vld [vmem:[%s9133_s3 + $0x2d0] sm:$0xff] }
  0x3c   :  { %651 = vmatmul.mubr.f32.gmra.mrb[4].mxu0 %v5020_v38  ;;  %3824 = vmatprep.subr.bf16.mxu1 %v3823_v15  ;;  %v3731_v46 = vpack.c.bf16 %v189_v35, %v183_v31  ;;  %v329_v10 = vld [vmem:[%s9133_s3 + $0x2d8] sm:$0xff]  ;;  %v3739_v15 = vpack.c.bf16 %v213_v7, %v207_v4  ;;  %v206_v16 = vld [vmem:[%s9131_s1 + $0x380] sm:$0xff]  ;;  %v212_v17 = vld [vmem:[%s9131_s1 + $0x3b0] sm:$0xff]  ;;  %v3841_v23 = vpack.c.bf16 %v328_v14, %v326_v11 }
  0x3d   :  { %938 = vmatmul.mubr.f32.gmra.mrb[4].mxu1 %v5020_v38  ;;  %3499 = vmatprep.mubr.msk.f32.mxu0 %vm462_vm0, %v5045_v44  ;;  %v3839_v21 = vpack.c.bf16 %v329_v10, %v327_v9  ;;  %v331_v25 = vld [vmem:[%s9133_s3 + $0x2e8] sm:$0xff]  ;;  %v333_v27 = vld [vmem:[%s9133_s3 + $0x2f8] sm:$0xff]  ;;  %v224_v37 = vld [vmem:[%s9131_s1 + $0x410] sm:$0xff] }
  0x3e   :  { %3536 = vmatprep.mubr.msk.f32.mxu1 %vm462_vm0, %v5045_v44  ;;  %3714 = vmatpush1.bf16.msra.mxu0 %v3713_v45  ;;  %v3729_v45 = vpack.c.bf16 %v176_v30, %v170_v29  ;;  %v330_v29 = vld [vmem:[%s9133_s3 + $0x2e0] sm:$0xff]  ;;  %v332_v30 = vld [vmem:[%s9133_s3 + $0x2f0] sm:$0xff]  ;;  %v5328_v31 = vld [vmem:[%s9132_s0 + $0xa8] sm:$0xff]  ;;  %v3843_v41 = vpack.c.bf16 %v333_v27, %v331_v25 }
  0x3f   :  { %3716 = vmatprep.subr.bf16.mxu0 %v3715_v49  ;;  %3826 = vmatpush1.bf16.msra.mxu1 %v3825_v18  ;;  %v188_v49 = vld [vmem:[%s9131_s1 + $0x2f0] sm:$0xff]  ;;  %v219_v18 = vld [vmem:[%s9131_s1 + $0x3e8] sm:$0xff]  ;;  %v237_v42 = vld [vmem:[%s9131_s1 + $0x478] sm:$0xff] }
  0x40   :  { %657 = vmatmul.mubr.f32.gmra.mrb[6].mxu0 %v5069_v55  ;;  %3828 = vmatprep.subr.bf16.mxu1 %v3827_v34  ;;  %v3733_v61 = vpack.c.bf16 %v188_v49, %v182_v48  ;;  %v3741_v34 = vpack.c.bf16 %v212_v17, %v206_v16  ;;  %v231_v39 = vld [vmem:[%s9131_s1 + $0x448] sm:$0xff]  ;;  %v337_v48 = vld [vmem:[%s9133_s3 + $0x318] sm:$0xff]  ;;  %v5355_v49 = vld [vmem:[%s9132_s0 + $0xa0] sm:$0xff] }
  0x41   :  { %944 = vmatmul.mubr.f32.gmra.mrb[6].mxu1 %v5069_v55  ;;  %3500 = vmatprep.mubr.msk.f32.mxu0 %vm462_vm0, %v5082_v58  ;;  %v3747_v56 = vpack.c.bf16 %v237_v42, %v231_v39  ;;  %v230_v57 = vld [vmem:[%s9131_s1 + $0x440] sm:$0xff]  ;;  %v341_v0 = vld [vmem:[%s9133_s3 + $0x338] sm:$0xff]  ;;  %v5389_v1 = vld [vmem:[%s9132_s0 + $0xb0] sm:$0xff] }
  0x42   :  { %3537 = vmatprep.mubr.msk.f32.mxu1 %vm462_vm0, %v5082_v58  ;;  %3718 = vmatpush1.bf16.msra.mxu0 %v3717_v59  ;;  %v322_v59 = vld [vmem:[%s9133_s3 + $0x2a0] sm:$0xff]  ;;  %v340_v4 = vld [vmem:[%s9133_s3 + $0x330] sm:$0xff]  ;;  %v5402_v7 = vld [vmem:[%s9132_s0 + $0xc8] sm:$0xff] }
  0x43   :  { %3720 = vmatprep.subr.bf16.mxu0 %v3719_v63  ;;  %3830 = vmatpush1.bf16.msra.mxu1 %v3829_v36  ;;  %v3735_v63 = vpack.c.bf16 %v201_v53, %v195_v52  ;;  %v218_v36 = vld [vmem:[%s9131_s1 + $0x3e0] sm:$0xff]  ;;  %v336_v52 = vld [vmem:[%s9133_s3 + $0x310] sm:$0xff]  ;;  %v5368_v53 = vld [vmem:[%s9132_s0 + $0xb8] sm:$0xff] }
  0x44   :  { %663 = vmatmul.mubr.f32.gmra.mrb[8].mxu0 %v5109_v5  ;;  %3832 = vmatprep.subr.bf16.mxu1 %v3831_v50  ;;  %v334_v50 = vld [vmem:[%s9133_s3 + $0x300] sm:$0xff]  ;;  %v343_v14 = vld [vmem:[%s9133_s3 + $0x348] sm:$0xff]  ;;  %v5433_v16 = vld [vmem:[%s9132_s0 + $0xd0] sm:$0xff] }
  0x45   :  { %950 = vmatmul.mubr.f32.gmra.mrb[8].mxu1 %v5109_v5  ;;  %3501 = vmatprep.mubr.msk.f32.mxu0 %vm462_vm0, %v5114_v6  ;;  %v5411_v11 = vld [vmem:[%s9132_s0 + $0xc0] sm:$0xff]  ;;  %v5462_v27 = vld [vmem:[%s9132_s0 + $0xf8] sm:$0xff]  ;;  %v348_v39 = vld [vmem:[%s9133_s3 + $0x370] sm:$0xff] }
  0x46   :  { %3538 = vmatprep.mubr.msk.f32.mxu1 %vm462_vm0, %v5114_v6  ;;  %3722 = vmatpush1.bf16.msra.mxu0 %v3721_v8  ;;  %v3837_v8 = vpack.c.bf16 %v324_v62, %v322_v59  ;;  %v236_v59 = vld [vmem:[%s9131_s1 + $0x470] sm:$0xff]  ;;  %v3849_v62 = vpack.c.bf16 %v336_v52, %v334_v50  ;;  %v5455_v25 = vld [vmem:[%s9132_s0 + $0xe0] sm:$0xff]  ;;  %v351_v50 = vld [vmem:[%s9133_s3 + $0x388] sm:$0xff] }
  0x47   :  { %3724 = vmatprep.subr.bf16.mxu0 %v3723_v12  ;;  %3834 = vmatpush1.bf16.msra.mxu1 %v3833_v54  ;;  %v5285_v12 = vld [vmem:[%s9132_s0 + $0x98] sm:$0xff]  ;;  %v3745_v54 = vpack.c.bf16 %v224_v37, %v218_v36  ;;  %v346_v37 = vld [vmem:[%s9133_s3 + $0x360] sm:$0xff] }
  0x48   :  { %669 = vmatmul.mubr.f32.gmra.mrb[10].mxu0 %v5149_v19  ;;  %3836 = vmatprep.subr.bf16.mxu1 %v3835_v2  ;;  %v338_v2 = vld [vmem:[%s9133_s3 + $0x320] sm:$0xff]  ;;  %v3861_v42 = vpack.c.bf16 %v348_v39, %v346_v37  ;;  %v353_v52 = vld [vmem:[%s9133_s3 + $0x398] sm:$0xff] }
  0x49   :  { %956 = vmatmul.mubr.f32.gmra.mrb[10].mxu1 %v5149_v19  ;;  %3502 = vmatprep.mubr.msk.f32.mxu0 %vm462_vm0, %v5154_v20  ;;  %v3853_v10 = vpack.c.bf16 %v340_v4, %v338_v2  ;;  %v355_v2 = vld [vmem:[%s9133_s3 + $0x3a8] sm:$0xff]  ;;  %v357_v4 = vld [vmem:[%s9133_s3 + $0x3b8] sm:$0xff]  ;;  %v5651_v37 = vld [vmem:[%s9132_s0 + $0x180] sm:$0xff] }
  0x4a   :  { %3539 = vmatprep.mubr.msk.f32.mxu1 %vm462_vm0, %v5154_v20  ;;  %3726 = vmatpush1.bf16.msra.mxu0 %v3725_v22  ;;  %v225_v22 = vld [vmem:[%s9131_s1 + $0x418] sm:$0xff] }
  0x4b   :  { %3728 = vmatprep.subr.bf16.mxu0 %v3727_v28  ;;  %3838 = vmatpush1.bf16.msra.mxu1 %v3837_v8  ;;  %v5315_v28 = vld [vmem:[%s9132_s0 + $0x90] sm:$0xff]  ;;  %v3743_v35 = vpack.c.bf16 %v225_v22, %v219_v18  ;;  %v3749_v8 = vpack.c.bf16 %v236_v59, %v230_v57  ;;  %v342_v18 = vld [vmem:[%s9133_s3 + $0x340] sm:$0xff]  ;;  %v5446_v22 = vld [vmem:[%s9132_s0 + $0xe8] sm:$0xff]  ;;  %v3863_v57 = vpack.c.bf16 %v353_v52, %v351_v50 }
  0x4c   :  { %675 = vmatmul.mubr.f32.gmra.mrb[12].mxu0 %v5195_v40  ;;  %3840 = vmatprep.subr.bf16.mxu1 %v3839_v21  ;;  %v344_v21 = vld [vmem:[%s9133_s3 + $0x350] sm:$0xff]  ;;  %v5658_v39 = vld [vmem:[%s9132_s0 + $0x198] sm:$0xff] }
  0x4d   :  { %962 = vmatmul.mubr.f32.gmra.mrb[12].mxu1 %v5195_v40  ;;  %3503 = vmatprep.mubr.msk.f32.mxu0 %vm462_vm0, %v5208_v43  ;;  %v352_v59 = vld [vmem:[%s9133_s3 + $0x390] sm:$0xff]  ;;  %v361_v50 = vld [vmem:[%s9133_s3 + $0x3d8] sm:$0xff] }
  0x4e   :  { %3540 = vmatprep.mubr.msk.f32.mxu1 %vm462_vm0, %v5208_v43  ;;  %3730 = vmatpush1.bf16.msra.mxu0 %v3729_v45  ;;  %v3845_v45 = vpack.c.bf16 %v332_v30, %v330_v29  ;;  %v5471_v29 = vld [vmem:[%s9132_s0 + $0xf0] sm:$0xff]  ;;  %v347_v30 = vld [vmem:[%s9133_s3 + $0x368] sm:$0xff] }
  0x4f   :  { %3732 = vmatprep.subr.bf16.mxu0 %v3731_v46  ;;  %3842 = vmatpush1.bf16.msra.mxu1 %v3841_v23  ;;  %v335_v46 = vld [vmem:[%s9133_s3 + $0x308] sm:$0xff]  ;;  %v3857_v23 = vpack.c.bf16 %v344_v21, %v342_v18  ;;  %v5603_v18 = vld [vmem:[%s9132_s0 + $0x150] sm:$0xff] }
  0x50   :  { %681 = vmatmul.mubr.f32.gmra.mrb[14].mxu0 %v5220_v51  ;;  %3844 = vmatprep.subr.bf16.mxu1 %v3843_v41  ;;  %v5499_v41 = vld [vmem:[%s9132_s0 + $0x100] sm:$0xff]  ;;  %v5610_v21 = vld [vmem:[%s9132_s0 + $0x168] sm:$0xff]  ;;  %v5673_v52 = vld [vmem:[%s9132_s0 + $0x190] sm:$0xff] }
  0x51   :  { %968 = vmatmul.mubr.f32.gmra.mrb[14].mxu1 %v5220_v51  ;;  %3504 = vmatprep.mubr.msk.f32.mxu0 %vm462_vm0, %v5245_v60 }
  0x52   :  { %3541 = vmatprep.mubr.msk.f32.mxu1 %vm462_vm0, %v5245_v60  ;;  %3734 = vmatpush1.bf16.msra.mxu0 %v3733_v61  ;;  %v3847_v61 = vpack.c.bf16 %v337_v48, %v335_v46  ;;  %v5515_v46 = vld [vmem:[%s9132_s0 + $0x110] sm:$0xff]  ;;  %v5522_v48 = vld [vmem:[%s9132_s0 + $0x128] sm:$0xff] }
  0x53   :  { %3736 = vmatprep.subr.bf16.mxu0 %v3735_v63  ;;  %3846 = vmatpush1.bf16.msra.mxu1 %v3845_v45  ;;  %v339_v63 = vld [vmem:[%s9133_s3 + $0x328] sm:$0xff]  ;;  %v5506_v45 = vld [vmem:[%s9132_s0 + $0x118] sm:$0xff] }
  0x54   :  { %687 = vmatmul.mubr.f32.gmra.mrb[16].mxu0 %v5260_v3  ;;  %3848 = vmatprep.subr.bf16.mxu1 %v3847_v61  ;;  %v3851_v9 = vpack.c.bf16 %v341_v0, %v339_v63  ;;  %v5550_v61 = vld [vmem:[%s9132_s0 + $0x138] sm:$0xff]  ;;  %v5559_v63 = vld [vmem:[%s9132_s0 + $0x130] sm:$0xff]  ;;  %v5566_v0 = vld [vmem:[%s9132_s0 + $0x148] sm:$0xff] }
  0x55   :  { %974 = vmatmul.mubr.f32.gmra.mrb[16].mxu1 %v5260_v3  ;;  %3505 = vmatprep.mubr.msk.f32.mxu0 %vm462_vm0, %v5285_v12 }
  0x56   :  { %3542 = vmatprep.mubr.msk.f32.mxu1 %vm462_vm0, %v5285_v12  ;;  %3738 = vmatpush1.bf16.msra.mxu0 %v3737_v13  ;;  %v5418_v13 = vld [vmem:[%s9132_s0 + $0xd8] sm:$0xff] }
  0x57   :  { %3740 = vmatprep.subr.bf16.mxu0 %v3739_v15  ;;  %3850 = vmatpush1.bf16.msra.mxu1 %v3849_v62  ;;  %v345_v15 = vld [vmem:[%s9133_s3 + $0x358] sm:$0xff] }
  0x58   :  { %693 = vmatmul.mubr.f32.gmra.mrb[18].mxu0 %v5315_v28  ;;  %3852 = vmatprep.subr.bf16.mxu1 %v3851_v9  ;;  %v3855_v17 = vpack.c.bf16 %v345_v15, %v343_v14  ;;  %v3867_v9 = vpack.c.bf16 %v357_v4, %v355_v2  ;;  %v356_v14 = vld [vmem:[%s9133_s3 + $0x3b0] sm:$0xff]  ;;  %v5594_v15 = vld [vmem:[%s9132_s0 + $0x158] sm:$0xff]  ;;  %v5695_v4 = vld [vmem:[%s9132_s0 + $0x1a0] sm:$0xff] }
  0x59   :  { %980 = vmatmul.mubr.f32.gmra.mrb[18].mxu1 %v5315_v28  ;;  %3506 = vmatprep.mubr.msk.f32.mxu0 %vm462_vm0, %v5328_v31  ;;  %9164 = vst [vmem:[#allocation2_spill] sm:$0xff] %v5695_v4 }
  0x5a   :  { %3543 = vmatprep.mubr.msk.f32.mxu1 %vm462_vm0, %v5328_v31  ;;  %3742 = vmatpush1.bf16.msra.mxu0 %v3741_v34  ;;  %v349_v34 = vld [vmem:[%s9133_s3 + $0x378] sm:$0xff] }
  0x5b   :  { %3744 = vmatprep.subr.bf16.mxu0 %v3743_v35  ;;  %3854 = vmatpush1.bf16.msra.mxu1 %v3853_v10  ;;  %v5484_v35 = vld [vmem:[%s9132_s0 + $0x108] sm:$0xff]  ;;  %v3859_v36 = vpack.c.bf16 %v349_v34, %v347_v30  ;;  %v354_v10 = vld [vmem:[%s9133_s3 + $0x3a0] sm:$0xff]  ;;  %v5626_v30 = vld [vmem:[%s9132_s0 + $0x178] sm:$0xff] }
  0x5c   :  { %699 = vmatmul.mubr.f32.gmra.mrb[20].mxu0 %v5355_v49  ;;  %3856 = vmatprep.subr.bf16.mxu1 %v3855_v17  ;;  %v3869_v17 = vpack.c.bf16 %v356_v14, %v354_v10  ;;  %v5635_v34 = vld [vmem:[%s9132_s0 + $0x170] sm:$0xff]  ;;  %v363_v10 = vld [vmem:[%s9133_s3 + $0x3e8] sm:$0xff]  ;;  %v365_v14 = vld [vmem:[%s9133_s3 + $0x3f8] sm:$0xff] }
  0x5d   :  { %986 = vmatmul.mubr.f32.gmra.mrb[20].mxu1 %v5355_v49  ;;  %3507 = vmatprep.mubr.msk.f32.mxu0 %vm462_vm0, %v5368_v53 }
  0x5e   :  { %3544 = vmatprep.mubr.msk.f32.mxu1 %vm462_vm0, %v5368_v53  ;;  %3746 = vmatpush1.bf16.msra.mxu0 %v3745_v54  ;;  %v350_v54 = vld [vmem:[%s9133_s3 + $0x380] sm:$0xff] }
  0x5f   :  { %3748 = vmatprep.subr.bf16.mxu0 %v3747_v56  ;;  %3858 = vmatpush1.bf16.msra.mxu1 %v3857_v23  ;;  %v5540_v56 = vld [vmem:[%s9132_s0 + $0x120] sm:$0xff]  ;;  %v3865_v62 = vpack.c.bf16 %v352_v59, %v350_v54 }
  0x60   :  { %705 = vmatmul.mubr.f32.gmra.mrb[22].mxu0 %v5389_v1  ;;  %3860 = vmatprep.subr.bf16.mxu1 %v3859_v36  ;;  %v5619_v23 = vld [vmem:[%s9132_s0 + $0x160] sm:$0xff]  ;;  %v5642_v36 = vld [vmem:[%s9132_s0 + $0x188] sm:$0xff] }
  0x61   :  { %992 = vmatmul.mubr.f32.gmra.mrb[22].mxu1 %v5389_v1  ;;  %3508 = vmatprep.mubr.msk.f32.mxu0 %vm462_vm0, %v5402_v7  ;;  %v358_v59 = vld [vmem:[%s9133_s3 + $0x3c0] sm:$0xff] }
  0x62   :  { %3545 = vmatprep.mubr.msk.f32.mxu1 %vm462_vm0, %v5402_v7  ;;  %3750 = vmatpush1.bf16.msra.mxu0 %v3749_v8  ;;  %v5581_v8 = vld [vmem:[%s9132_s0 + $0x140] sm:$0xff] }
  0x63   :  { %3862 = vmatpush1.bf16.msra.mxu1 %v3861_v42  ;;  %v359_v42 = vld [vmem:[%s9133_s3 + $0x3c8] sm:$0xff] }
  0x64   :  { %711 = vmatmul.mubr.f32.gmra.mrb[24].mxu0 %v5411_v11  ;;  %3864 = vmatprep.subr.bf16.mxu1 %v3863_v57  ;;  %v3871_v54 = vpack.c.bf16 %v361_v50, %v359_v42  ;;  %v5680_v57 = vld [vmem:[%s9132_s0 + $0x1a8] sm:$0xff]  ;;  %v362_v42 = vld [vmem:[%s9133_s3 + $0x3e0] sm:$0xff]  ;;  %v364_v50 = vld [vmem:[%s9133_s3 + $0x3f0] sm:$0xff] }
  0x65   :  { %998 = vmatmul.mubr.f32.gmra.mrb[24].mxu1 %v5411_v11  ;;  %3509 = vmatprep.mubr.msk.f32.mxu0 %vm462_vm0, %v5418_v13 }
  0x66   :  { %3546 = vmatprep.mubr.msk.f32.mxu1 %vm462_vm0, %v5418_v13 }
  0x67   :  { %3866 = vmatpush1.bf16.msra.mxu1 %v3865_v62  ;;  %v360_v62 = vld [vmem:[%s9133_s3 + $0x3d0] sm:$0xff] }
  0x68   :  { %717 = vmatmul.mubr.f32.gmra.mrb[26].mxu0 %v5433_v16  ;;  %3868 = vmatprep.subr.bf16.mxu1 %v3867_v9  ;;  %v3873_v2 = vpack.c.bf16 %v360_v62, %v358_v59  ;;  %v5702_v9 = vld [vmem:[%s9132_s0 + $0x1b8] sm:$0xff]  ;;  %v3877_v59 = vpack.c.bf16 %v364_v50, %v362_v42  ;;  %v5730_v62 = vld [vmem:[%s9132_s0 + $0x1c8] sm:$0xff]  ;;  %v78_v50 = vld [vmem:[%s9132_s0 + $0x1d0] sm:$0xff] }
  0x69   :  { %1004 = vmatmul.mubr.f32.gmra.mrb[26].mxu1 %v5433_v16  ;;  %3510 = vmatprep.mubr.msk.f32.mxu0 %vm462_vm0, %v5446_v22  ;;  %9165 = vst [vmem:[#allocation3_spill] sm:$0xff] %v5702_v9  ;;  %9167 = vst [vmem:[#allocation5_spill] sm:$0xff] %v5730_v62  ;;  %v79_v42 = vld [vmem:[%s9132_s0 + $0x1d8] sm:$0xff] }
  0x6a   :  { %3547 = vmatprep.mubr.msk.f32.mxu1 %vm462_vm0, %v5446_v22 }
  0x6b   :  { %3870 = vmatpush1.bf16.msra.mxu1 %v3869_v17  ;;  %v3875_v17 = vpack.c.bf16 %v365_v14, %v363_v10  ;;  %v241_v10 = vld [vmem:[%s9133_s3 + $0x18] sm:$0xff] }
  0x6c   :  { %723 = vmatmul.mubr.f32.gmra.mrb[28].mxu0 %v5455_v25  ;;  %3872 = vmatprep.subr.bf16.mxu1 %v3871_v54  ;;  %v5723_v54 = vld [vmem:[%s9132_s0 + $0x1b0] sm:$0xff] }
  0x6d   :  { %1010 = vmatmul.mubr.f32.gmra.mrb[28].mxu1 %v5455_v25  ;;  %3511 = vmatprep.mubr.msk.f32.mxu0 %vm462_vm0, %v5462_v27  ;;  %9166 = vst [vmem:[#allocation4_spill] sm:$0xff] %v5723_v54 }
  0x6e   :  { %3548 = vmatprep.mubr.msk.f32.mxu1 %vm462_vm0, %v5462_v27 }
  0x6f   :  { %3874 = vmatpush1.bf16.msra.mxu1 %v3873_v2  ;;  %v239_v2 = vld [vmem:[%s9133_s3 + $0x8] sm:$0xff] }
  0x70   :  { %729 = vmatmul.mubr.f32.gmra.mrb[30].mxu0 %v5471_v29  ;;  %3876 = vmatprep.subr.bf16.mxu1 %v3875_v17  ;;  %v3751_v14 = vpack.c.bf16 %v241_v10, %v239_v2  ;;  %v76_v17 = vld [vmem:[%s9132_s0 + $0x1c0] sm:$0xff]  ;;  %v83_v10 = vld [vmem:[%s9132_s0 + $0x1f8] sm:$0xff] }
  0x71   :  { %1016 = vmatmul.mubr.f32.gmra.mrb[30].mxu1 %v5471_v29  ;;  %3512 = vmatprep.mubr.msk.f32.mxu0 %vm462_vm0, %v5484_v35  ;;  %v80_v2 = vld [vmem:[%s9132_s0 + $0x1e0] sm:$0xff] }
  0x72   :  { %3549 = vmatprep.mubr.msk.f32.mxu1 %vm462_vm0, %v5484_v35  ;;  %3752 = vmatprep.subr.bf16.mxu0 %v3751_v14  ;;  %v82_v14 = vld [vmem:[%s9132_s0 + $0x1f0] sm:$0xff] }
  0x73   :  { %3878 = vmatpush1.bf16.msra.mxu1 %v3877_v59  ;;  %v81_v59 = vld [vmem:[%s9132_s0 + $0x1e8] sm:$0xff] }
  0x74   :  { %735 = vmatmul.mubr.f32.gmra.mrb[32].mxu0 %v5499_v41 }
  0x75   :  { %1022 = vmatmul.mubr.f32.gmra.mrb[32].mxu1 %v5499_v41  ;;  %3513 = vmatprep.mubr.msk.f32.mxu0 %vm462_vm0, %v5506_v45 }
  0x76   :  { %3550 = vmatprep.mubr.msk.f32.mxu1 %vm462_vm0, %v5506_v45 }
  0x78   :  { %741 = vmatmul.mubr.f32.gmra.mrb[34].mxu0 %v5515_v46 }
  0x79   :  { %1028 = vmatmul.mubr.f32.gmra.mrb[34].mxu1 %v5515_v46  ;;  %3514 = vmatprep.mubr.msk.f32.mxu0 %vm462_vm0, %v5522_v48 }
  0x7a   :  { %3551 = vmatprep.mubr.msk.f32.mxu1 %vm462_vm0, %v5522_v48 }
  0x7c   :  { %747 = vmatmul.mubr.f32.gmra.mrb[36].mxu0 %v5540_v56 }
  0x7d   :  { %1034 = vmatmul.mubr.f32.gmra.mrb[36].mxu1 %v5540_v56  ;;  %3515 = vmatprep.mubr.msk.f32.mxu0 %vm462_vm0, %v5550_v61 }
  0x7e   :  { %3552 = vmatprep.mubr.msk.f32.mxu1 %vm462_vm0, %v5550_v61 }
  0x80   :  { %753 = vmatmul.mubr.f32.gmra.mrb[38].mxu0 %v5559_v63 }
  0x81   :  { %1040 = vmatmul.mubr.f32.gmra.mrb[38].mxu1 %v5559_v63  ;;  %3516 = vmatprep.mubr.msk.f32.mxu0 %vm462_vm0, %v5566_v0 }
  0x82   :  { %3553 = vmatprep.mubr.msk.f32.mxu1 %vm462_vm0, %v5566_v0 }
  0x84   :  { %759 = vmatmul.mubr.f32.gmra.mrb[40].mxu0 %v5581_v8 }
  0x85   :  { %1046 = vmatmul.mubr.f32.gmra.mrb[40].mxu1 %v5581_v8  ;;  %3517 = vmatprep.mubr.msk.f32.mxu0 %vm462_vm0, %v5594_v15 }
  0x86   :  { %3554 = vmatprep.mubr.msk.f32.mxu1 %vm462_vm0, %v5594_v15 }
  0x88   :  { %765 = vmatmul.mubr.f32.gmra.mrb[42].mxu0 %v5603_v18 }
  0x89   :  { %1052 = vmatmul.mubr.f32.gmra.mrb[42].mxu1 %v5603_v18  ;;  %3518 = vmatprep.mubr.msk.f32.mxu0 %vm462_vm0, %v5610_v21 }
  0x8a   :  { %3555 = vmatprep.mubr.msk.f32.mxu1 %vm462_vm0, %v5610_v21 }
  0x8c   :  { %771 = vmatmul.mubr.f32.gmra.mrb[44].mxu0 %v5619_v23 }
  0x8d   :  { %1058 = vmatmul.mubr.f32.gmra.mrb[44].mxu1 %v5619_v23  ;;  %3519 = vmatprep.mubr.msk.f32.mxu0 %vm462_vm0, %v5626_v30 }
  0x8e   :  { %3556 = vmatprep.mubr.msk.f32.mxu1 %vm462_vm0, %v5626_v30 }
  0x90   :  { %777 = vmatmul.mubr.f32.gmra.mrb[46].mxu0 %v5635_v34 }
  0x91   :  { %1064 = vmatmul.mubr.f32.gmra.mrb[46].mxu1 %v5635_v34  ;;  %3520 = vmatprep.mubr.msk.f32.mxu0 %vm462_vm0, %v5642_v36 }
  0x92   :  { %3557 = vmatprep.mubr.msk.f32.mxu1 %vm462_vm0, %v5642_v36 }
  0x94   :  { %783 = vmatmul.mubr.f32.gmra.mrb[48].mxu0 %v5651_v37 }
  0x95   :  { %1070 = vmatmul.mubr.f32.gmra.mrb[48].mxu1 %v5651_v37  ;;  %3521 = vmatprep.mubr.msk.f32.mxu0 %vm462_vm0, %v5658_v39 }
  0x96   :  { %3558 = vmatprep.mubr.msk.f32.mxu1 %vm462_vm0, %v5658_v39 }
  0x98   :  { %789 = vmatmul.mubr.f32.gmra.mrb[50].mxu0 %v5673_v52 }
  0x99   :  { %1076 = vmatmul.mubr.f32.gmra.mrb[50].mxu1 %v5673_v52  ;;  %3522 = vmatprep.mubr.msk.f32.mxu0 %vm462_vm0, %v5680_v57 }
  0x9a   :  { %3559 = vmatprep.mubr.msk.f32.mxu1 %vm462_vm0, %v5680_v57 }
  0x9c   :  { %795 = vmatmul.mubr.f32.gmra.mrb[52].mxu0 %v5695_v4 }
  0x9d   :  { %1082 = vmatmul.mubr.f32.gmra.mrb[52].mxu1 %v5695_v4  ;;  %3523 = vmatprep.mubr.msk.f32.mxu0 %vm462_vm0, %v5702_v9 }
  0x9e   :  { %3560 = vmatprep.mubr.msk.f32.mxu1 %vm462_vm0, %v5702_v9  ;;  %v247_v9 = vld [vmem:[%s9133_s3 + $0x48] sm:$0xff] }
  0xa0   :  { %801 = vmatmul.mubr.f32.gmra.mrb[54].mxu0 %v5723_v54 }
  0xa1   :  { %1088 = vmatmul.mubr.f32.gmra.mrb[54].mxu1 %v5723_v54  ;;  %3524 = vmatprep.mubr.msk.f32.mxu0 %vm462_vm0, %v5730_v62  ;;  %v244_v54 = vld [vmem:[%s9133_s3 + $0x30] sm:$0xff] }
  0xa2   :  { %3561 = vmatprep.mubr.msk.f32.mxu1 %vm462_vm0, %v5730_v62  ;;  %v242_v62 = vld [vmem:[%s9133_s3 + $0x20] sm:$0xff] }
  0xa4   :  { %807 = vmatmul.mubr.f32.gmra.mrb[56].mxu0 %v76_v17 }
  0xa5   :  { %1094 = vmatmul.mubr.f32.gmra.mrb[56].mxu1 %v76_v17  ;;  %3525 = vmatprep.mubr.msk.f32.mxu0 %vm462_vm0, %v79_v42  ;;  %v85_v17 = vld [vmem:[%s9132_s0 + $0x208] sm:$0xff] }
  0xa6   :  { %3562 = vmatprep.mubr.msk.f32.mxu1 %vm462_vm0, %v79_v42  ;;  %v84_v42 = vld [vmem:[%s9132_s0 + $0x200] sm:$0xff] }
  0xa8   :  { %813 = vmatmul.mubr.f32.gmra.mrb[58].mxu0 %v78_v50 }
  0xa9   :  { %1100 = vmatmul.mubr.f32.gmra.mrb[58].mxu1 %v78_v50  ;;  %3526 = vmatprep.mubr.msk.f32.mxu0 %vm462_vm0, %v81_v59  ;;  %v87_v50 = vld [vmem:[%s9132_s0 + $0x218] sm:$0xff] }
  0xaa   :  { %3563 = vmatprep.mubr.msk.f32.mxu1 %vm462_vm0, %v81_v59  ;;  %v367_v59 = vld [vmem:[%s9133_s3 + $0x408] sm:$0xff] }
  0xac   :  { %819 = vmatmul.mubr.f32.gmra.mrb[60].mxu0 %v80_v2 }
  0xad   :  { %1106 = vmatmul.mubr.f32.gmra.mrb[60].mxu1 %v80_v2  ;;  %3527 = vmatprep.mubr.msk.f32.mxu0 %vm462_vm0, %v83_v10  ;;  %v369_v2 = vld [vmem:[%s9133_s3 + $0x418] sm:$0xff] }
  0xae   :  { %3564 = vmatprep.mubr.msk.f32.mxu1 %vm462_vm0, %v83_v10  ;;  %v3879_v10 = vpack.c.bf16 %v369_v2, %v367_v59  ;;  %v91_v59 = vld [vmem:[%s9132_s0 + $0x238] sm:$0xff]  ;;  %v93_v2 = vld [vmem:[%s9132_s0 + $0x248] sm:$0xff] }
  0xb0   :  { %825 = vmatmul.mubr.f32.gmra.mrb[62].mxu0 %v82_v14  ;;  %3880 = vmatprep.subr.bf16.mxu1 %v3879_v10  ;;  %v92_v10 = vld [vmem:[%s9132_s0 + $0x240] sm:$0xff] }
  0xb1   :  { %1112 = vmatmul.mubr.f32.gmra.mrb[62].mxu1 %v82_v14  ;;  %3528 = vmatprep.mubr.msk.f32.mxu0 %vm462_vm0, %v85_v17  ;;  %v86_v14 = vld [vmem:[%s9132_s0 + $0x210] sm:$0xff] }
  0xb2   :  { %3565 = vmatprep.mubr.msk.f32.mxu1 %vm462_vm0, %v85_v17  ;;  %v89_v17 = vld [vmem:[%s9132_s0 + $0x228] sm:$0xff] }
  0xb4   :  { %831 = vmatmul.mubr.f32.gmra.mrb[64].mxu0 %v84_v42 }
  0xb5   :  { %1118 = vmatmul.mubr.f32.gmra.mrb[64].mxu1 %v84_v42  ;;  %3529 = vmatprep.mubr.msk.f32.mxu0 %vm462_vm0, %v87_v50  ;;  %v88_v42 = vld [vmem:[%s9132_s0 + $0x220] sm:$0xff] }
  0xb6   :  { %3566 = vmatprep.mubr.msk.f32.mxu1 %vm462_vm0, %v87_v50  ;;  %v90_v50 = vld [vmem:[%s9132_s0 + $0x230] sm:$0xff] }
  0xb8   :  { %837 = vmatmul.mubr.f32.gmra.mrb[66].mxu0 %v86_v14 }
  0xb9   :  { %1124 = vmatmul.mubr.f32.gmra.mrb[66].mxu1 %v86_v14  ;;  %3530 = vmatprep.mubr.msk.f32.mxu0 %vm462_vm0, %v89_v17  ;;  %v238_v14 = vld [vmem:[%s9133_s3] sm:$0xff] }
  0xba   :  { %3567 = vmatprep.mubr.msk.f32.mxu1 %vm462_vm0, %v89_v17  ;;  %v240_v17 = vld [vmem:[%s9133_s3 + $0x10] sm:$0xff] }
  0xbc   :  { %843 = vmatmul.mubr.f32.gmra.mrb[68].mxu0 %v88_v42 }
  0xbd   :  { %1130 = vmatmul.mubr.f32.gmra.mrb[68].mxu1 %v88_v42  ;;  %3531 = vmatprep.mubr.msk.f32.mxu0 %vm462_vm0, %v91_v59  ;;  %v243_v42 = vld [vmem:[%s9133_s3 + $0x28] sm:$0xff] }
  0xbe   :  { %3568 = vmatprep.mubr.msk.f32.mxu1 %vm462_vm0, %v91_v59  ;;  %v245_v59 = vld [vmem:[%s9133_s3 + $0x38] sm:$0xff] }
  0xc0   :  { %849 = vmatmul.mubr.f32.gmra.mrb[70].mxu0 %v90_v50 }
  0xc1   :  { %1136 = vmatmul.mubr.f32.gmra.mrb[70].mxu1 %v90_v50  ;;  %3532 = vmatprep.mubr.msk.f32.mxu0 %vm462_vm0, %v93_v2  ;;  %v3753_v50 = vpack.c.bf16 %v240_v17, %v238_v14  ;;  %v246_v17 = vld [vmem:[%s9133_s3 + $0x40] sm:$0xff] }
  0xc2   :  { %3569 = vmatprep.mubr.msk.f32.mxu1 %vm462_vm0, %v93_v2  ;;  %v3755_v2 = vpack.c.bf16 %v245_v59, %v243_v42  ;;  %v248_v42 = vld [vmem:[%s9133_s3 + $0x50] sm:$0xff]  ;;  %v251_v59 = vld [vmem:[%s9133_s3 + $0x68] sm:$0xff] }
  0xc4   :  { %855 = vmatmul.mubr.f32.gmra.mrb[72].mxu0 %v92_v10 }
  0xc5   :  { %1142 = vmatmul.mubr.f32.gmra.mrb[72].mxu1 %v92_v10  ;;  %3570 = vmatprep.mubr.msk.f32.mxu0 %vm462_vm0, %v4888_v47  ;;  %v249_v10 = vld [vmem:[%s9133_s3 + $0x58] sm:$0xff]  ;;  %v3757_v47 = vpack.c.bf16 %v244_v54, %v242_v62  ;;  %v250_v54 = vld [vmem:[%s9133_s3 + $0x60] sm:$0xff]  ;;  %v252_v62 = vld [vmem:[%s9133_s3 + $0x70] sm:$0xff] }
  0xc6   :  { %v3759_v14 = vpack.c.bf16 %v249_v10, %v247_v9  ;;  %v254_v10 = vld [vmem:[%s9133_s3 + $0x80] sm:$0xff] }
  0xc8   :  { %1213 = vmatmul.mubr.f32.vlgmr.msra.gmra.mrb[74].mxu0 %v4975_v24  ;;  %v253_v24 = vld [vmem:[%s9133_s3 + $0x78] sm:$0xff] }
  0xc9   :  { %3571 = vmatprep.mubr.msk.f32.mxu0 %vm462_vm0, %v4980_v26  ;;  %3754 = vmatpush1.bf16.msra.mxu0 %v3753_v50  ;;  %v3761_v26 = vpack.c.bf16 %v248_v42, %v246_v17  ;;  %v3763_v9 = vpack.c.bf16 %v253_v24, %v251_v59  ;;  %v255_v50 = vld [vmem:[%s9133_s3 + $0x88] sm:$0xff]  ;;  %v258_v42 = vld [vmem:[%s9133_s3 + $0xa0] sm:$0xff]  ;;  %v260_v59 = vld [vmem:[%s9133_s3 + $0xb0] sm:$0xff] }
  0xca   :  { %3756 = vmatprep.subr.bf16.mxu0 %v3755_v2  ;;  %v263_v24 = vld [vmem:[%s9133_s3 + $0xc8] sm:$0xff] }
  0xcc   :  { %1219 = vmatmul.mubr.f32.gmra.mrb[76].mxu0 %v4999_v32  ;;  %v257_v32 = vld [vmem:[%s9133_s3 + $0x98] sm:$0xff] }
  0xcd   :  { %3572 = vmatprep.mubr.msk.f32.mxu0 %vm462_vm0, %v5008_v33  ;;  %3758 = vmatpush1.bf16.msra.mxu0 %v3757_v47  ;;  %v3765_v33 = vpack.c.bf16 %v252_v62, %v250_v54  ;;  %v3767_v2 = vpack.c.bf16 %v257_v32, %v255_v50  ;;  %v256_v47 = vld [vmem:[%s9133_s3 + $0x90] sm:$0xff]  ;;  %v267_v62 = vld [vmem:[%s9133_s3 + $0xe8] sm:$0xff]  ;;  %v266_v32 = vld [vmem:[%s9133_s3 + $0xe0] sm:$0xff] }
  0xce   :  { %3760 = vmatprep.subr.bf16.mxu0 %v3759_v14  ;;  %v259_v14 = vld [vmem:[%s9133_s3 + $0xa8] sm:$0xff]  ;;  %v264_v54 = vld [vmem:[%s9133_s3 + $0xd0] sm:$0xff] }
  0xd0   :  { %1225 = vmatmul.mubr.f32.gmra.mrb[78].mxu0 %v5020_v38  ;;  %v261_v38 = vld [vmem:[%s9133_s3 + $0xb8] sm:$0xff] }
  0xd1   :  { %3573 = vmatprep.mubr.msk.f32.mxu0 %vm462_vm0, %v5045_v44  ;;  %3762 = vmatpush1.bf16.msra.mxu0 %v3761_v26  ;;  %v3769_v44 = vpack.c.bf16 %v256_v47, %v254_v10  ;;  %v3771_v17 = vpack.c.bf16 %v261_v38, %v259_v14  ;;  %v270_v47 = vld [vmem:[%s9133_s3 + $0x100] sm:$0xff]  ;;  %v272_v14 = vld [vmem:[%s9133_s3 + $0x110] sm:$0xff]  ;;  %v275_v38 = vld [vmem:[%s9133_s3 + $0x128] sm:$0xff] }
  0xd2   :  { %3764 = vmatprep.subr.bf16.mxu0 %v3763_v9  ;;  %v262_v9 = vld [vmem:[%s9133_s3 + $0xc0] sm:$0xff] }
  0xd4   :  { %1231 = vmatmul.mubr.f32.gmra.mrb[80].mxu0 %v5069_v55  ;;  %v265_v55 = vld [vmem:[%s9133_s3 + $0xd8] sm:$0xff] }
  0xd5   :  { %3574 = vmatprep.mubr.msk.f32.mxu0 %vm462_vm0, %v5082_v58  ;;  %3766 = vmatpush1.bf16.msra.mxu0 %v3765_v33  ;;  %v3773_v58 = vpack.c.bf16 %v260_v59, %v258_v42  ;;  %v3775_v26 = vpack.c.bf16 %v265_v55, %v263_v24  ;;  %v268_v33 = vld [vmem:[%s9133_s3 + $0xf0] sm:$0xff]  ;;  %v279_v59 = vld [vmem:[%s9133_s3 + $0x148] sm:$0xff]  ;;  %v278_v55 = vld [vmem:[%s9133_s3 + $0x140] sm:$0xff] }
  0xd6   :  { %3768 = vmatprep.subr.bf16.mxu0 %v3767_v2  ;;  %v271_v2 = vld [vmem:[%s9133_s3 + $0x108] sm:$0xff]  ;;  %v276_v42 = vld [vmem:[%s9133_s3 + $0x130] sm:$0xff] }
  0xd8   :  { %1237 = vmatmul.mubr.f32.gmra.mrb[82].mxu0 %v5109_v5  ;;  %v269_v5 = vld [vmem:[%s9133_s3 + $0xf8] sm:$0xff] }
  0xd9   :  { %3575 = vmatprep.mubr.msk.f32.mxu0 %vm462_vm0, %v5114_v6  ;;  %3770 = vmatpush1.bf16.msra.mxu0 %v3769_v44  ;;  %v3777_v6 = vpack.c.bf16 %v264_v54, %v262_v9  ;;  %v3779_v50 = vpack.c.bf16 %v269_v5, %v267_v62  ;;  %v282_v54 = vld [vmem:[%s9133_s3 + $0x160] sm:$0xff]  ;;  %v284_v62 = vld [vmem:[%s9133_s3 + $0x170] sm:$0xff]  ;;  %v287_v5 = vld [vmem:[%s9133_s3 + $0x188] sm:$0xff] }
  0xda   :  { %3772 = vmatprep.subr.bf16.mxu0 %v3771_v17  ;;  %v274_v17 = vld [vmem:[%s9133_s3 + $0x120] sm:$0xff] }
  0xdc   :  { %1243 = vmatmul.mubr.f32.gmra.mrb[84].mxu0 %v5149_v19  ;;  %v273_v19 = vld [vmem:[%s9133_s3 + $0x118] sm:$0xff] }
  0xdd   :  { %3576 = vmatprep.mubr.msk.f32.mxu0 %vm462_vm0, %v5154_v20  ;;  %3774 = vmatpush1.bf16.msra.mxu0 %v3773_v58  ;;  %v3781_v20 = vpack.c.bf16 %v268_v33, %v266_v32  ;;  %v3783_v10 = vpack.c.bf16 %v273_v19, %v271_v2  ;;  %v280_v58 = vld [vmem:[%s9133_s3 + $0x150] sm:$0xff]  ;;  %v291_v33 = vld [vmem:[%s9133_s3 + $0x1a8] sm:$0xff]  ;;  %v290_v19 = vld [vmem:[%s9133_s3 + $0x1a0] sm:$0xff] }
  0xde   :  { %3776 = vmatprep.subr.bf16.mxu0 %v3775_v26  ;;  %v283_v26 = vld [vmem:[%s9133_s3 + $0x168] sm:$0xff]  ;;  %v288_v32 = vld [vmem:[%s9133_s3 + $0x190] sm:$0xff] }
  0xe0   :  { %1249 = vmatmul.mubr.f32.gmra.mrb[86].mxu0 %v5195_v40  ;;  %v277_v40 = vld [vmem:[%s9133_s3 + $0x138] sm:$0xff] }
  0xe1   :  { %3577 = vmatprep.mubr.msk.f32.mxu0 %vm462_vm0, %v5208_v43  ;;  %3778 = vmatpush1.bf16.msra.mxu0 %v3777_v6  ;;  %v3785_v43 = vpack.c.bf16 %v272_v14, %v270_v47  ;;  %v3787_v44 = vpack.c.bf16 %v277_v40, %v275_v38  ;;  %v294_v14 = vld [vmem:[%s9133_s3 + $0x1c0] sm:$0xff]  ;;  %v296_v38 = vld [vmem:[%s9133_s3 + $0x1d0] sm:$0xff]  ;;  %v432_v40 = vlaneseq }
  0xe2   :  { %3780 = vmatprep.subr.bf16.mxu0 %v3779_v50  ;;  %v286_v50 = vld [vmem:[%s9133_s3 + $0x180] sm:$0xff] }
  0xe4   :  { %1255 = vmatmul.mubr.f32.gmra.mrb[88].mxu0 %v5220_v51  ;;  %v281_v51 = vld [vmem:[%s9133_s3 + $0x158] sm:$0xff] }
  0xe5   :  { %3578 = vmatprep.mubr.msk.f32.mxu0 %vm462_vm0, %v5245_v60  ;;  %3782 = vmatpush1.bf16.msra.mxu0 %v3781_v20  ;;  %v3789_v60 = vpack.c.bf16 %v276_v42, %v274_v17  ;;  %v3791_v24 = vpack.c.bf16 %v281_v51, %v279_v59  ;;  %v292_v20 = vld [vmem:[%s9133_s3 + $0x1b0] sm:$0xff]  ;;  %v298_v17 = vld [vmem:[%s9133_s3 + $0x1e0] sm:$0xff]  ;;  %v6047_v59 = vshrl.u32 %v432_v40, 7  ;;  %v6163_v40 = vld [vmem:[%s9133_s3 + $0x478] sm:$0xff] }
  0xe6   :  { %3784 = vmatprep.subr.bf16.mxu0 %v3783_v10  ;;  %v295_v10 = vld [vmem:[%s9133_s3 + $0x1c8] sm:$0xff]  ;;  %v300_v42 = vld [vmem:[%s9133_s3 + $0x1f0] sm:$0xff]  ;;  %v430_v51 = vld [vmem:[%s9134_s2] sm:$0x3f]  ;;  %9173 = vst [vmem:[#allocation11_spill] sm:$0xff] %v6163_v40 }
  0xe7   :  { %9168 = vst [vmem:[#allocation6_spill] sm:$0xff] %v6047_v59 }
  0xe8   :  { %1261 = vmatmul.mubr.f32.gmra.mrb[90].mxu0 %v5260_v3  ;;  %v285_v3 = vld [vmem:[%s9133_s3 + $0x178] sm:$0xff] }
  0xe9   :  { %3579 = vmatprep.mubr.msk.f32.mxu0 %vm462_vm0, %v5285_v12  ;;  %3786 = vmatpush1.bf16.msra.mxu0 %v3785_v43  ;;  %v3793_v12 = vpack.c.bf16 %v280_v58, %v278_v55  ;;  %v3795_v9 = vpack.c.bf16 %v285_v3, %v283_v26  ;;  %v3809_v43 = vpack.c.bf16 %v296_v38, %v294_v14  ;;  %v9140_v3 = vsub.s32 1, %v6047_v59  ;;  %v6158_v38 = vld [vmem:[%s9133_s3 + $0x468] sm:$0xff] }
  0xea   :  { %3788 = vmatprep.subr.bf16.mxu0 %v3787_v44  ;;  %9172 = vst [vmem:[#allocation10_spill] sm:$0xff] %v6158_v38 }
  0xec   :  { %1267 = vmatmul.mubr.f32.gmra.mrb[92].mxu0 %v5315_v28  ;;  %v289_v28 = vld [vmem:[%s9133_s3 + $0x198] sm:$0xff] }
  0xed   :  { %3580 = vmatprep.mubr.msk.f32.mxu0 %vm462_vm0, %v5328_v31  ;;  %3790 = vmatpush1.bf16.msra.mxu0 %v3789_v60  ;;  %v3797_v31 = vpack.c.bf16 %v284_v62, %v282_v54  ;;  %v3799_v6 = vpack.c.bf16 %v289_v28, %v287_v5  ;;  %v442_v60 = vsub.s32 2, %v6047_v59  ;;  %v6085_v5 = vrot.slane %v430_v51, %v9140_v3 }
  0xee   :  { %3792 = vmatprep.subr.bf16.mxu0 %v3791_v24  ;;  %v9141_v24 = vsub.s32 0, %v6047_v59 }
  0xef   :  { %v6063_v55 = vrot.slane %v430_v51, %v442_v60  ;;  %v6197_v60 = vld [vmem:[%s9133_s3 + $0x498] sm:$0xff] }
  0xf0   :  { %1273 = vmatmul.mubr.f32.gmra.mrb[94].mxu0 %v5355_v49  ;;  %v293_v49 = vld [vmem:[%s9133_s3 + $0x1b8] sm:$0xff] }
  0xf1   :  { %3581 = vmatprep.mubr.msk.f32.mxu0 %vm462_vm0, %v5368_v53  ;;  %3794 = vmatpush1.bf16.msra.mxu0 %v3793_v12  ;;  %v3801_v53 = vpack.c.bf16 %v288_v32, %v286_v50  ;;  %v3803_v2 = vpack.c.bf16 %v293_v49, %v291_v33  ;;  %v6100_v50 = vld [vmem:[%s9133_s3 + $0x410] sm:$0xff]  ;;  %v6105_v32 = vld [vmem:[%s9133_s3 + $0x428] sm:$0xff]  ;;  %v6112_v33 = vld [vmem:[%s9133_s3 + $0x438] sm:$0xff] }
  0xf2   :  { %3796 = vmatprep.subr.bf16.mxu0 %v3795_v9  ;;  %v6117_v49 = vld [vmem:[%s9133_s3 + $0x420] sm:$0xff] }
  0xf4   :  { %1279 = vmatmul.mubr.f32.gmra.mrb[96].mxu0 %v5389_v1  ;;  %v297_v1 = vld [vmem:[%s9133_s3 + $0x1d8] sm:$0xff] }
  0xf5   :  { %3582 = vmatprep.mubr.msk.f32.mxu0 %vm462_vm0, %v5402_v7  ;;  %3798 = vmatpush1.bf16.msra.mxu0 %v3797_v31  ;;  %v3805_v7 = vpack.c.bf16 %v292_v20, %v290_v19  ;;  %v3807_v47 = vpack.c.bf16 %v297_v1, %v295_v10  ;;  %v6135_v10 = vld [vmem:[%s9133_s3 + $0x448] sm:$0xff]  ;;  %v6140_v1 = vld [vmem:[%s9133_s3 + $0x458] sm:$0xff] }
  0xf6   :  { %3800 = vmatprep.subr.bf16.mxu0 %v3799_v6  ;;  %9169 = vst [vmem:[#allocation7_spill] sm:$0xff] %v6135_v10 }
  0xf8   :  { %1285 = vmatmul.mubr.f32.gmra.mrb[98].mxu0 %v5411_v11  ;;  %v299_v11 = vld [vmem:[%s9133_s3 + $0x1e8] sm:$0xff] }
  0xf9   :  { %3583 = vmatprep.mubr.msk.f32.mxu0 %vm462_vm0, %v5418_v13  ;;  %3802 = vmatpush1.bf16.msra.mxu0 %v3801_v53  ;;  %v301_v13 = vld [vmem:[%s9133_s3 + $0x1f8] sm:$0xff]  ;;  %v6122_v53 = vld [vmem:[%s9133_s3 + $0x430] sm:$0xff] }
  0xfa   :  { %3804 = vmatprep.subr.bf16.mxu0 %v3803_v2  ;;  %v3811_v44 = vpack.c.bf16 %v301_v13, %v299_v11 }
  0xfc   :  { %1291 = vmatmul.mubr.f32.gmra.mrb[100].mxu0 %v5433_v16  ;;  %v3813_v16 = vpack.c.bf16 %v300_v42, %v298_v17  ;;  %v6183_v17 = vld [vmem:[%s9133_s3 + $0x488] sm:$0xff] }
  0xfd   :  { %3584 = vmatprep.mubr.msk.f32.mxu0 %vm462_vm0, %v5446_v22  ;;  %3806 = vmatpush1.bf16.msra.mxu0 %v3805_v7  ;;  %v446_v22 = vsub.s32 3, %v6047_v59  ;;  %v6145_v7 = vld [vmem:[%s9133_s3 + $0x440] sm:$0xff] }
  0xfe   :  { %3808 = vmatprep.subr.bf16.mxu0 %v3807_v47  ;;  %9170 = vst [vmem:[#allocation8_spill] sm:$0xff] %v6145_v7  ;;  %v6264_v7 = vld [vmem:[%s9133_s3 + $0x4c0] sm:$0xff] }
  0xff   :  { %9183 = vst [vmem:[#allocation21_spill] sm:$0xff] %v6264_v7 }
 0x100   :  { %1297 = vmatmul.mubr.f32.gmra.mrb[102].mxu0 %v5455_v25 }
 0x101   :  { %3585 = vmatprep.mubr.msk.f32.mxu0 %vm462_vm0, %v5462_v27  ;;  %3810 = vmatpush1.bf16.msra.mxu0 %v3809_v43  ;;  %v6061_v27 = vrot.slane %v430_v51, %v446_v22  ;;  %v6173_v43 = vld [vmem:[%s9133_s3 + $0x460] sm:$0xff] }
 0x102   :  { %3812 = vmatprep.subr.bf16.mxu0 %v3811_v44  ;;  %9174 = vst [vmem:[#allocation12_spill] sm:$0xff] %v6173_v43  ;;  %v6178_v44 = vld [vmem:[%s9133_s3 + $0x470] sm:$0xff] }
 0x103   :  { %9175 = vst [vmem:[#allocation13_spill] sm:$0xff] %v6178_v44 }
 0x104   :  { %1303 = vmatmul.mubr.f32.gmra.mrb[104].mxu0 %v5471_v29  ;;  %v6068_v29 = vrot.slane %v430_v51, %v9141_v24  ;;  %v6239_v24 = vld [vmem:[%s9133_s3 + $0x4b0] sm:$0xff] }
 0x105   :  { %3586 = vmatprep.mubr.msk.f32.mxu0 %vm462_vm0, %v5484_v35  ;;  %3814 = vmatpush1.bf16.msra.mxu0 %v3813_v16  ;;  %9180 = vst [vmem:[#allocation18_spill] sm:$0xff] %v6239_v24 }
 0x107   :  { %v640_v25 = vpop.f32.mrb[0].mxu0 }
 0x108   :  { %v927_v58 = vpop.f32.mrb[0].mxu1  ;;  %v642_v26 = vpop.f32.mrb[1].mxu0  ;;  %1309 = vmatmul.mubr.f32.gmra.mrb[106].mxu0 %v5499_v41  ;;  %v6081_v41 = vadd.f32 %v640_v25, %v6068_v29  ;;  %v6202_v25 = vld [vmem:[%s9133_s3 + $0x480] sm:$0xff] }
 0x109   :  { %v929_v12 = vpop.f32.mrb[1].mxu1  ;;  %3587 = vmatprep.mubr.msk.f32.mxu0 %vm462_vm0, %v5506_v45  ;;  %v6077_v9 = vadd.f32 %v927_v58, %v6063_v55  ;;  %v6126_v19 = vadd.f32 %v642_v26, %v6085_v5  ;;  %9176 = vst [vmem:[#allocation14_spill] sm:$0xff] %v6202_v25 }
 0x10a   :  { %v6074_v35 = vadd.f32 %v929_v12, %v6061_v27  ;;  %v1657_v2 = vmul.f32 0.70710677, %v6081_v41 }
 0x10b   :  { %v646_v54 = vpop.f32.mrb[2].mxu0  ;;  %v1658_v58 = vmul.f32 0.70710677, %v6126_v19  ;;  %v6313_v59 = vmul.f32 0.5, %v6126_v19 }
 0x10c   :  { %v933_v62 = vpop.f32.mrb[2].mxu1  ;;  %1315 = vmatmul.mubr.f32.gmra.mrb[108].mxu0 %v5515_v46  ;;  %v648_v28 = vpop.f32.mrb[3].mxu0  ;;  %v1660_v45 = vmul.f32 0.70710677, %v6074_v35  ;;  %v6095_v46 = vld [vmem:[%s9133_s3 + $0x400] sm:$0xff]  ;;  %v647_v26 = vadd.f32 %v646_v54, %v6068_v29 }
 0x10d   :  { %v935_v31 = vpop.f32.mrb[3].mxu1  ;;  %3588 = vmatprep.mubr.msk.f32.mxu0 %vm462_vm0, %v5522_v48  ;;  %v1659_v48 = vmul.f32 0.70710677, %v6077_v9  ;;  %v6166_v11 = vadd.f32 %v933_v62, %v6063_v55  ;;  %v6228_v54 = vld [vmem:[%s9133_s3 + $0x4a0] sm:$0xff]  ;;  %v6244_v62 = vld [vmem:[%s9133_s3 + $0x4c8] sm:$0xff]  ;;  %9187 = vst [vmem:[#allocation25_spill] sm:$0xff] %v6313_v59 }
 0x10e   :  { %v6148_v47 = vadd.f32 %v935_v31, %v6061_v27  ;;  %4165 = verf.f32 %v1660_v45  ;;  %v6218_v31 = vld [vmem:[%s9133_s3 + $0x4a8] sm:$0xff]  ;;  %v6223_v45 = vld [vmem:[%s9133_s3 + $0x4b8] sm:$0xff]  ;;  %9179 = vst [vmem:[#allocation17_spill] sm:$0xff] %v6228_v54  ;;  %9181 = vst [vmem:[#allocation19_spill] sm:$0xff] %v6244_v62  ;;  %v1663_v44 = vmul.f32 0.70710677, %v647_v26 }
 0x10f   :  { %v6090_v6 = vpop.f32.mrb[4].mxu0  ;;  %4167 = verf.f32 %v1659_v48  ;;  %9177 = vst [vmem:[#allocation15_spill] sm:$0xff] %v6218_v31  ;;  %9178 = vst [vmem:[#allocation16_spill] sm:$0xff] %v6223_v45  ;;  %v1438_v62 = vmul.f32 0.5, %v6074_v35 }
 0x110   :  { %1321 = vmatmul.mubr.f32.gmra.mrb[110].mxu0 %v5540_v56  ;;  %v939_v56 = vpop.f32.mrb[4].mxu1  ;;  %v6128_v20 = vpop.f32.mrb[5].mxu0  ;;  %4169 = verf.f32 %v1657_v2  ;;  %v1666_v48 = vmul.f32 0.70710677, %v6148_v47  ;;  %v1665_v2 = vmul.f32 0.70710677, %v6166_v11  ;;  %v653_v22 = vadd.f32 %v6090_v6, %v6068_v29 }
 0x111   :  { %3589 = vmatprep.mubr.msk.f32.mxu0 %vm462_vm0, %v5550_v61  ;;  %v941_v14 = vpop.f32.mrb[5].mxu1  ;;  %v6153_v61 = vld [vmem:[%s9133_s3 + $0x450] sm:$0xff]  ;;  %4171 = verf.f32 %v1658_v58  ;;  %v6296_v58 = vld [vmem:[%s9133_s3 + $0x4e8] sm:$0xff]  ;;  %v655_v6 = vadd.f32 %v6128_v20, %v6085_v5 }
 0x112   :  { %9171 = vst [vmem:[#allocation9_spill] sm:$0xff] %v6153_v61  ;;  %v6253_v51 = vadd.f32 %v941_v14, %v6061_v27  ;;  %v6269_v61 = vld [vmem:[%s9133_s3 + $0x4d0] sm:$0xff]  ;;  %v6272_v14 = vadd.f32 %v939_v56, %v6063_v55  ;;  %4173 = verf.f32 %v1666_v48  ;;  %9185 = vst [vmem:[#allocation23_spill] sm:$0xff] %v6296_v58  ;;  %v1437_v56 = vmul.f32 0.5, %v6077_v9 }
 0x113   :  { %v6168_v13 = vpop.f32.mrb[6].mxu0  ;;  %9184 = vst [vmem:[#allocation22_spill] sm:$0xff] %v6269_v61  ;;  %4175 = verf.f32 %v1665_v2  ;;  %v1669_v35 = vmul.f32 0.70710677, %v653_v22 }
 0x114   :  { %v6185_v42 = vpop.f32.mrb[6].mxu1  ;;  %v6187_v16 = vpop.f32.mrb[7].mxu0  ;;  %1327 = vmatmul.mubr.f32.gmra.mrb[112].mxu0 %v5559_v63  ;;  %v6207_v63 = vld [vmem:[%s9133_s3 + $0x490] sm:$0xff]  ;;  %v1672_v48 = vmul.f32 0.70710677, %v6253_v51  ;;  %4177 = verf.f32 %v1663_v44  ;;  %v659_v24 = vadd.f32 %v6168_v13, %v6068_v29  ;;  %v6383_v31 = vmul.f32 0.5, %v6272_v14 }
 0x115   :  { %v947_v12 = vpop.f32.mrb[7].mxu1  ;;  %3590 = vmatprep.mubr.msk.f32.mxu0 %vm462_vm0, %v5566_v0  ;;  %v649_v0 = vadd.f32 %v648_v28, %v6085_v5  ;;  %v6249_v28 = vld [vmem:[%s9133_s3 + $0x4d8] sm:$0xff]  ;;  %v1671_v7 = vmul.f32 0.70710677, %v6272_v14  ;;  %v6327_v9 = vadd.f32 %v6185_v42, %v6063_v55  ;;  %v1670_v42 = vmul.f32 0.70710677, %v655_v6 }
 0x116   :  { %9182 = vst [vmem:[#allocation20_spill] sm:$0xff] %v6249_v28  ;;  %v6317_v61 = vadd.f32 %v947_v12, %v6061_v27  ;;  %v6335_v28 = vmul.f32 0.5, %v647_v26  ;;  %v6349_v26 = vld [vmem:[%s9133_s3 + $0x4e0] sm:$0xff] }
 0x117   :  { %v6255_v3 = vpop.f32.mrb[8].mxu0  ;;  %v1664_v40 = vmul.f32 0.70710677, %v649_v0  ;;  %v6340_v54 = vmul.f32 0.5, %v649_v0  ;;  %v1677_v58 = vmul.f32 0.70710677, %v6327_v9 }
 0x118   :  { %v951_v4 = vpop.f32.mrb[8].mxu1  ;;  %v6274_v10 = vpop.f32.mrb[9].mxu0  ;;  %1333 = vmatmul.mubr.f32.gmra.mrb[114].mxu0 %v5581_v8  ;;  %v6304_v8 = vmul.f32 0.5, %v6081_v41  ;;  %9188 = vst [vmem:[#allocation26_spill] sm:$0xff] %v6335_v28  ;;  %v1678_v0 = vmul.f32 0.70710677, %v6317_v61 }
 0x119   :  { %v953_v38 = vpop.f32.mrb[9].mxu1  ;;  %3591 = vmatprep.mubr.msk.f32.mxu0 %vm462_vm0, %v5594_v15  ;;  %v6301_v15 = vld [vmem:[%s9133_s3 + $0x4f8] sm:$0xff]  ;;  %v4166_v20 = vpop.eup %4165  ;;  %4179 = verf.f32 %v1664_v40  ;;  %9189 = vst [vmem:[#allocation27_spill] sm:$0xff] %v6340_v54  ;;  %v6354_v40 = vld [vmem:[%s9133_s3 + $0x4f0] sm:$0xff]  ;;  %v6366_v54 = vmul.f32 0.5, %v6148_v47  ;;  %v6380_v47 = vmul.f32 0.5, %v653_v22 }
 0x11a   :  { %9186 = vst [vmem:[#allocation24_spill] sm:$0xff] %v6301_v15  ;;  %v4168_v59 = vpop.eup %4167  ;;  %4181 = verf.f32 %v1672_v48  ;;  %v6358_v48 = vadd.f32 %v953_v38, %v6061_v27  ;;  %v661_v15 = vadd.f32 %v6187_v16, %v6085_v5 }
 0x11b   :  { %v6309_v43 = vpop.f32.mrb[10].mxu0  ;;  %v4170_v44 = vpop.eup %4169  ;;  %4183 = verf.f32 %v1671_v7  ;;  %v2103_v28 = vadd.f32 1.0, %v4168_v59  ;;  %9190 = vst [vmem:[#allocation28_spill] sm:$0xff] %v6380_v47 }
 0x11c   :  { %v6319_v41 = vpop.f32.mrb[10].mxu1  ;;  %v6321_v2 = vpop.f32.mrb[11].mxu0  ;;  %1339 = vmatmul.mubr.f32.gmra.mrb[116].mxu0 %v5603_v18  ;;  %v6338_v18 = vmul.f32 0.5, %v6166_v11  ;;  %v2104_v11 = vadd.f32 1.0, %v4166_v20  ;;  %v6370_v20 = vadd.f32 %v951_v4, %v6063_v55  ;;  %v2101_v38 = vadd.f32 1.0, %v4170_v44 }
 0x11d   :  { %v6329_v19 = vpop.f32.mrb[11].mxu1  ;;  %3592 = vmatprep.mubr.msk.f32.mxu0 %vm462_vm0, %v5610_v21  ;;  %4185 = verf.f32 %v1669_v35  ;;  %v4172_v59 = vpop.eup %4171  ;;  %v1675_v4 = vmul.f32 0.70710677, %v659_v24  ;;  %v1684_v35 = vmul.f32 0.70710677, %v6358_v48  ;;  %v2325_v14 = vmul.f32 %v2103_v28, %v1437_v56 }
 0x11e   :  { %4187 = verf.f32 %v1670_v42  ;;  %v4174_v25 = vpop.eup %4173  ;;  %v2326_v16 = vmul.f32 %v2104_v11, %v1438_v62  ;;  %v6396_v42 = vmul.f32 0.5, %v6253_v51  ;;  %v1683_v47 = vmul.f32 0.70710677, %v6370_v20 }
 0x11f   :  { %v6344_v21 = vpop.f32.mrb[12].mxu0  ;;  %4189 = verf.f32 %v1678_v0  ;;  %v4176_v22 = vpop.eup %4175  ;;  %v6404_v62 = vmul.f32 %v2101_v38, %v6304_v8  ;;  %v6406_v11 = vmul.f32 0.5, %v659_v24  ;;  %v1676_v0 = vmul.f32 0.70710677, %v661_v15 }
 0x120   :  { %v6360_v13 = vpop.f32.mrb[12].mxu1  ;;  %v6362_v12 = vpop.f32.mrb[13].mxu0  ;;  %1345 = vmatmul.mubr.f32.gmra.mrb[118].mxu0 %v5619_v23  ;;  %4191 = verf.f32 %v1677_v58  ;;  %2908 = vmatprep.mubr.f32.mxu1 %v2326_v16  ;;  %v6410_v28 = vadd.f32 1.0, %v4172_v59  ;;  %v2110_v56 = vadd.f32 1.0, %v4174_v25  ;;  %v6414_v58 = vadd.f32 %v6329_v19, %v6061_v27 }
 0x121   :  { %v6372_v7 = vpop.f32.mrb[13].mxu1  ;;  %3593 = vmatprep.mubr.msk.f32.mxu0 %vm462_vm0, %v5626_v30  ;;  %v6387_v30 = vmul.f32 0.5, %v655_v6  ;;  %9192 = vst [vmem:[#allocation30_spill] sm:$0xff] %v6406_v11  ;;  %v4178_v51 = vpop.eup %4177  ;;  %4193 = verf.f32 %v1675_v4  ;;  %2909 = vmatmul.mubr.f32.vlgmr.msra.gmra.mrb[74].mxu1 %v2325_v14  ;;  %v2109_v24 = vadd.f32 1.0, %v4176_v22  ;;  %v6419_v38 = vmul.f32 0.5, %v6327_v9  ;;  %v9208_v11 = vld [vmem:[#allocation11_spill] sm:$0xff] }
 0x122   :  { %4195 = verf.f32 %v1684_v35  ;;  %v9193_v25 = vpack.c.bf16 %v6100_v50, %v6095_v46  ;;  %v6433_v16 = vmul.f32 0.5, %v661_v15  ;;  %v6436_v9 = vmul.f32 0.5, %v6317_v61 }
 0x123   :  { %v6385_v45 = vpop.f32.mrb[14].mxu0  ;;  %9191 = vst [vmem:[#allocation29_spill] sm:$0xff] %v6387_v30  ;;  %v4180_v8 = vpop.eup %4179  ;;  %4197 = verf.f32 %v1683_v47  ;;  %v9195_v46 = vpack.c.bf16 %v6112_v33, %v6105_v32  ;;  %v6447_v35 = vadd.f32 1.0, %v4178_v51  ;;  %v671_v61 = vadd.f32 %v6309_v43, %v6068_v29 }
 0x124   :  { %v6390_v44 = vpop.f32.mrb[14].mxu1  ;;  %v6392_v23 = vpop.f32.mrb[15].mxu0  ;;  %1351 = vmatmul.mubr.f32.gmra.mrb[120].mxu0 %v5635_v34  ;;  %v665_v34 = vadd.f32 %v6255_v3, %v6068_v29  ;;  %v6423_v3 = vadd.f32 %v6319_v41, %v6063_v55  ;;  %3882 = vmatpush1.bf16.msra.mxu1 %v9193_v25  ;;  %9194 = vst [vmem:[#allocation31_spill] sm:$0xff] %v6433_v16  ;;  %4199 = verf.f32 %v1676_v0  ;;  %v1690_v32 = vmul.f32 0.70710677, %v6414_v58 }
 0x125   :  { %v6399_v6 = vpop.f32.mrb[15].mxu1  ;;  %3594 = vmatprep.mubr.msk.f32.mxu0 %vm462_vm0, %v5642_v36  ;;  %v4182_v4 = vpop.eup %4181  ;;  %v667_v41 = vadd.f32 %v6274_v10, %v6085_v5  ;;  %3884 = vmatprep.subr.bf16.mxu1 %v9195_v46  ;;  %9196 = vst [vmem:[#allocation32_spill] sm:$0xff] %v6447_v35  ;;  %v6453_v10 = vadd.f32 %v6321_v2, %v6085_v5  ;;  %v6463_v14 = vadd.f32 1.0, %v4180_v8 }
 0x126   :  { %v1681_v15 = vmul.f32 0.70710677, %v665_v34  ;;  %v6458_v33 = vadd.f32 %v6372_v7, %v6061_v27  ;;  %v2116_v0 = vadd.f32 1.0, %v4182_v4  ;;  %v1689_v43 = vmul.f32 0.70710677, %v6423_v3 }
 0x127   :  { %v6416_v36 = vpop.f32.mrb[16].mxu0  ;;  %v2331_v51 = vmul.f32 %v2109_v24, %v6338_v18  ;;  %v9197_v2 = vpack.c.bf16 %v6122_v53, %v6117_v49  ;;  %v6475_v46 = vmul.f32 0.5, %v665_v34  ;;  %v1682_v8 = vmul.f32 0.70710677, %v667_v41  ;;  %v9200_v24 = vld [vmem:[#allocation7_spill] sm:$0xff] }
 0x128   :  { %v6428_v59 = vpop.f32.mrb[16].mxu1  ;;  %v6430_v19 = vpop.f32.mrb[17].mxu0  ;;  %1357 = vmatmul.mubr.f32.gmra.mrb[122].mxu0 %v5651_v37  ;;  %v6479_v4 = vadd.f32 %v6360_v13, %v6063_v55  ;;  %4201 = verf.f32 %v1681_v15  ;;  %v6486_v53 = vmul.f32 0.5, %v6370_v20  ;;  %v1687_v34 = vmul.f32 0.70710677, %v671_v61 }
 0x129   :  { %v6443_v50 = vpop.f32.mrb[17].mxu1  ;;  %3595 = vmatprep.mubr.msk.f32.mxu0 %vm462_vm0, %v5658_v39  ;;  %v4184_v37 = vpop.eup %4183  ;;  %v2332_v39 = vmul.f32 %v2110_v56, %v6366_v54  ;;  %3886 = vmatpush1.bf16.msra.mxu1 %v9197_v2  ;;  %9198 = vst [vmem:[#allocation33_spill] sm:$0xff] %v6475_v46  ;;  %v1688_v2 = vmul.f32 0.70710677, %v6453_v10  ;;  %4203 = verf.f32 %v1690_v32  ;;  %v677_v20 = vadd.f32 %v6344_v21, %v6068_v29  ;;  %v9205_v32 = vld [vmem:[#allocation8_spill] sm:$0xff] }
 0x12a   :  { %v4186_v22 = vpop.eup %4185  ;;  %v2115_v56 = vadd.f32 1.0, %v4184_v37  ;;  %v9201_v37 = vpack.c.bf16 %v6140_v1, %v9200_v24  ;;  %4205 = verf.f32 %v1689_v43  ;;  %v2338_v15 = vmul.f32 %v2116_v0, %v6396_v42  ;;  %v9204_v24 = vld [vmem:[#allocation9_spill] sm:$0xff]  ;;  %v9207_v0 = vld [vmem:[#allocation3_spill] sm:$0xff] }
 0x12b   :  { %v6461_v47 = vpop.f32.mrb[18].mxu0  ;;  %v4188_v54 = vpop.eup %4187  ;;  %2914 = vmatprep.mubr.f32.mxu1 %v2332_v39  ;;  %v6493_v39 = vadd.f32 1.0, %v4186_v22  ;;  %v9203_v22 = vld [vmem:[#allocation2_spill] sm:$0xff]  ;;  %4207 = verf.f32 %v1682_v8  ;;  %v1695_v21 = vmul.f32 0.70710677, %v6479_v4  ;;  %v6526_v8 = vadd.f32 %v6399_v6, %v6061_v27 }
 0x12c   :  { %v6470_v25 = vpop.f32.mrb[18].mxu1  ;;  %v6472_v7 = vpop.f32.mrb[19].mxu0  ;;  %1363 = vmatmul.mubr.f32.gmra.mrb[124].mxu0 %v5673_v52  ;;  %v6488_v52 = vmul.f32 0.5, %v667_v41  ;;  %2915 = vmatmul.mubr.f32.gmra.mrb[76].mxu1 %v2331_v51  ;;  %v6501_v41 = vadd.f32 %v6362_v12, %v6085_v5  ;;  %v2337_v12 = vmul.f32 %v2115_v56, %v6383_v31  ;;  %4209 = verf.f32 %v1687_v34 }
 0x12d   :  { %v6481_v18 = vpop.f32.mrb[19].mxu1  ;;  %3596 = vmatprep.mubr.msk.f32.mxu0 %vm462_vm0, %v5680_v57  ;;  %v4190_v49 = vpop.eup %4189  ;;  %3888 = vmatprep.subr.bf16.mxu1 %v9201_v37  ;;  %9202 = vst [vmem:[#allocation7_spill] sm:$0xff] %v6493_v39  ;;  %v1696_v57 = vmul.f32 0.70710677, %v6458_v33  ;;  %v9206_v37 = vpack.c.bf16 %v9204_v24, %v9205_v32  ;;  %v6528_v56 = vadd.f32 1.0, %v4188_v54  ;;  %v6539_v34 = vmul.f32 0.5, %v6423_v3 }
 0x12e   :  { %9199 = vst [vmem:[#allocation34_spill] sm:$0xff] %v6488_v52  ;;  %v4192_v13 = vpop.eup %4191  ;;  %v2122_v46 = vadd.f32 1.0, %v4190_v49  ;;  %v1462_v49 = vmul.f32 0.5, %v6358_v48  ;;  %2920 = vmatprep.mubr.f32.mxu1 %v2338_v15  ;;  %v1693_v6 = vmul.f32 0.70710677, %v677_v20  ;;  %v9213_v54 = vld [vmem:[#allocation4_spill] sm:$0xff] }
 0x12f   :  { %v6504_v1 = vpop.f32.mrb[20].mxu0  ;;  %3890 = vmatpush1.bf16.msra.mxu1 %v9206_v37  ;;  %v4194_v43 = vpop.eup %4193  ;;  %v2121_v32 = vadd.f32 1.0, %v4192_v13  ;;  %9211 = vst [vmem:[#allocation2_spill] sm:$0xff] %v6528_v56  ;;  %v6530_v37 = vmul.f32 0.5, %v671_v61  ;;  %4211 = verf.f32 %v1696_v57  ;;  %v1694_v13 = vmul.f32 0.70710677, %v6501_v41 }
 0x130   :  { %v6506_v51 = vpop.f32.mrb[20].mxu1  ;;  %1369 = vmatmul.mubr.f32.gmra.mrb[126].mxu0 %v9203_v22  ;;  %v6514_v52 = vpop.f32.mrb[21].mxu0  ;;  %v9209_v22 = vld [vmem:[#allocation10_spill] sm:$0xff]  ;;  %2921 = vmatmul.mubr.f32.gmra.mrb[78].mxu1 %v2337_v12  ;;  %4213 = verf.f32 %v1688_v2  ;;  %v9214_v61 = vld [vmem:[#allocation13_spill] sm:$0xff]  ;;  %v9215_v15 = vld [vmem:[#allocation12_spill] sm:$0xff]  ;;  %v2344_v12 = vmul.f32 %v2122_v46, %v6436_v9 }
 0x131   :  { %v6516_v42 = vpop.f32.mrb[21].mxu1  ;;  %3597 = vmatprep.mubr.msk.f32.mxu0 %vm462_vm0, %v9207_v0  ;;  %v9210_v16 = vpack.c.bf16 %v9208_v11, %v9209_v22  ;;  %v4196_v24 = vpop.eup %4195  ;;  %9212 = vst [vmem:[#allocation9_spill] sm:$0xff] %v6530_v37  ;;  %v6534_v11 = vadd.f32 %v6390_v44, %v6063_v55  ;;  %v9216_v57 = vpack.c.bf16 %v9214_v61, %v9215_v15  ;;  %4215 = verf.f32 %v1695_v21  ;;  %v9217_v22 = vld [vmem:[#allocation5_spill] sm:$0xff] }
 0x132   :  { %v4198_v31 = vpop.eup %4197  ;;  %v2128_v0 = vadd.f32 1.0, %v4196_v24  ;;  %v6548_v44 = vadd.f32 %v6385_v45, %v6068_v29  ;;  %v1702_v21 = vmul.f32 0.70710677, %v6526_v8  ;;  %v6563_v45 = vadd.f32 %v6443_v50, %v6061_v27  ;;  %2926 = vmatprep.mubr.f32.mxu1 %v2344_v12  ;;  %v4610_v12 = vld [vmem:[%s9132_s0 + $0x1d8] sm:$0xff] }
 0x133   :  { %3892 = vmatprep.subr.bf16.mxu1 %v9210_v16  ;;  %v6536_v16 = vpop.f32.mrb[22].mxu0  ;;  %v4200_v48 = vpop.eup %4199  ;;  %v2127_v61 = vadd.f32 1.0, %v4198_v31  ;;  %v2343_v9 = vmul.f32 %v2121_v32, %v6419_v38  ;;  %v6568_v24 = vadd.f32 1.0, %v4194_v43  ;;  %v6571_v15 = vmul.f32 0.5, %v6453_v10  ;;  %v4609_v43 = vld [vmem:[%s9132_s0 + $0x1c0] sm:$0xff] }
 0x134   :  { %1375 = vmatmul.mubr.f32.gmra.mrb[128].mxu0 %v9213_v54  ;;  %3894 = vmatpush1.bf16.msra.mxu1 %v9216_v57  ;;  %v6551_v3 = vpop.f32.mrb[22].mxu1  ;;  %v6553_v2 = vpop.f32.mrb[23].mxu0  ;;  %v9218_v54 = vpack.c.bf16 %v6197_v60, %v6183_v17  ;;  %v6574_v57 = vmul.f32 0.5, %v6414_v58  ;;  %v1701_v17 = vmul.f32 0.70710677, %v6534_v11  ;;  %v6579_v50 = vadd.f32 1.0, %v4200_v48 }
 0x135   :  { %3598 = vmatprep.mubr.msk.f32.mxu0 %vm462_vm0, %v9217_v22  ;;  %v6566_v46 = vpop.f32.mrb[23].mxu1  ;;  %9219 = vst [vmem:[#allocation8_spill] sm:$0xff] %v6568_v24  ;;  %9220 = vst [vmem:[#allocation3_spill] sm:$0xff] %v6571_v15  ;;  %v4202_v31 = vpop.eup %4201  ;;  %v6581_v22 = vmul.f32 0.5, %v677_v20  ;;  %4217 = verf.f32 %v1693_v6  ;;  %v6585_v38 = vadd.f32 %v6392_v23, %v6085_v5  ;;  %2927 = vmatmul.mubr.f32.gmra.mrb[80].mxu1 %v2343_v9  ;;  %v1699_v20 = vmul.f32 0.70710677, %v6548_v44 }
 0x136   :  { %3896 = vmatprep.subr.bf16.mxu1 %v9218_v54  ;;  %9221 = vst [vmem:[#allocation11_spill] sm:$0xff] %v6579_v50  ;;  %v4204_v32 = vpop.eup %4203  ;;  %4219 = verf.f32 %v1694_v13  ;;  %v6597_v48 = vadd.f32 %v6428_v59, %v6063_v55  ;;  %v2350_v23 = vmul.f32 %v2128_v0, %v1462_v49  ;;  %v9223_v54 = vld [vmem:[#allocation14_spill] sm:$0xff]  ;;  %v1708_v59 = vmul.f32 0.70710677, %v6563_v45  ;;  %v9225_v0 = vld [vmem:[#allocation16_spill] sm:$0xff]  ;;  %v9236_v24 = vld [vmem:[#allocation19_spill] sm:$0xff] }
 0x137   :  { %v6577_v60 = vpop.f32.mrb[24].mxu0  ;;  %9222 = vst [vmem:[#allocation10_spill] sm:$0xff] %v6581_v22  ;;  %v9224_v9 = vpack.c.bf16 %v6207_v63, %v9223_v54  ;;  %v4206_v13 = vpop.eup %4205  ;;  %4221 = verf.f32 %v1702_v21  ;;  %v2349_v49 = vmul.f32 %v2127_v61, %v6486_v53  ;;  %v9226_v22 = vld [vmem:[#allocation15_spill] sm:$0xff]  ;;  %v6620_v63 = vmul.f32 0.5, %v6458_v33 }
 0x138   :  { %v6587_v10 = vpop.f32.mrb[24].mxu1  ;;  %v6589_v58 = vpop.f32.mrb[25].mxu0  ;;  %1381 = vmatmul.mubr.f32.gmra.mrb[130].mxu0 %v4609_v43  ;;  %v6609_v43 = vmul.f32 0.5, %v6479_v4  ;;  %v9227_v37 = vpack.c.bf16 %v9225_v0, %v9226_v22  ;;  %4223 = verf.f32 %v1701_v17  ;;  %v6624_v4 = vadd.f32 %v6416_v36, %v6068_v29  ;;  %2932 = vmatprep.mubr.f32.mxu1 %v2350_v23  ;;  %v4611_v36 = vld [vmem:[%s9132_s0 + $0x1d0] sm:$0xff]  ;;  %v9231_v0 = vld [vmem:[#allocation17_spill] sm:$0xff] }
 0x139   :  { %v6599_v6 = vpop.f32.mrb[25].mxu1  ;;  %3599 = vmatprep.mubr.msk.f32.mxu0 %vm462_vm0, %v4610_v12  ;;  %3898 = vmatpush1.bf16.msra.mxu1 %v9224_v9  ;;  %v4208_v15 = vpop.eup %4207  ;;  %v6617_v12 = vmul.f32 0.5, %v6501_v41  ;;  %v6628_v61 = vadd.f32 1.0, %v4202_v31  ;;  %v2134_v22 = vadd.f32 1.0, %v4204_v32  ;;  %v6633_v41 = vadd.f32 %v6430_v19, %v6085_v5  ;;  %v4612_v9 = vld [vmem:[%s9132_s0 + $0x1e8] sm:$0xff] }
 0x13a   :  { %3900 = vmatprep.subr.bf16.mxu1 %v9227_v37  ;;  %v4210_v53 = vpop.eup %4209  ;;  %v1700_v37 = vmul.f32 0.70710677, %v6585_v38  ;;  %2933 = vmatmul.mubr.f32.gmra.mrb[82].mxu1 %v2349_v49  ;;  %v2133_v31 = vadd.f32 1.0, %v4206_v13  ;;  %4225 = verf.f32 %v1699_v20  ;;  %v1707_v32 = vmul.f32 0.70710677, %v6597_v48  ;;  %v9230_v49 = vld [vmem:[#allocation18_spill] sm:$0xff] }
 0x13b   :  { %9228 = vst [vmem:[#allocation4_spill] sm:$0xff] %v6617_v12  ;;  %v6626_v21 = vpop.f32.mrb[26].mxu0  ;;  %9229 = vst [vmem:[#allocation13_spill] sm:$0xff] %v6628_v61  ;;  %v4212_v23 = vpop.eup %4211  ;;  %v6645_v54 = vadd.f32 %v6481_v18, %v6061_v27  ;;  %v6656_v20 = vadd.f32 1.0, %v4208_v15  ;;  %v6659_v12 = vmul.f32 0.5, %v6548_v44  ;;  %4227 = verf.f32 %v1708_v59  ;;  %v9235_v61 = vld [vmem:[#allocation20_spill] sm:$0xff] }
 0x13c   :  { %v6635_v33 = vpop.f32.mrb[26].mxu1  ;;  %v6637_v17 = vpop.f32.mrb[27].mxu0  ;;  %1387 = vmatmul.mubr.f32.gmra.mrb[132].mxu0 %v4611_v36  ;;  %v9232_v36 = vpack.c.bf16 %v9230_v49, %v9231_v0  ;;  %v6663_v18 = vadd.f32 %v6470_v25, %v6063_v55  ;;  %v9237_v50 = vpack.c.bf16 %v9235_v61, %v9236_v24  ;;  %v6668_v39 = vadd.f32 1.0, %v4210_v53 }
 0x13d   :  { %v6647_v19 = vpop.f32.mrb[27].mxu1  ;;  %3600 = vmatprep.mubr.msk.f32.mxu0 %vm462_vm0, %v4612_v9  ;;  %v4214_v13 = vpop.eup %4213  ;;  %9233 = vst [vmem:[#allocation12_spill] sm:$0xff] %v6656_v20  ;;  %9234 = vst [vmem:[#allocation5_spill] sm:$0xff] %v6659_v12  ;;  %v6671_v49 = vmul.f32 0.5, %v6534_v11  ;;  %v1705_v15 = vmul.f32 0.70710677, %v6624_v4  ;;  %v6676_v44 = vadd.f32 %v6461_v47, %v6068_v29  ;;  %4229 = verf.f32 %v1700_v37 }
 0x13e   :  { %3902 = vmatpush1.bf16.msra.mxu1 %v9232_v36  ;;  %v4216_v9 = vpop.eup %4215  ;;  %9238 = vst [vmem:[#allocation14_spill] sm:$0xff] %v6668_v39  ;;  %v2140_v59 = vadd.f32 1.0, %v4212_v23  ;;  %v1706_v25 = vmul.f32 0.70710677, %v6633_v41  ;;  %v2356_v0 = vmul.f32 %v2134_v22, %v6574_v57  ;;  %v4613_v11 = vld [vmem:[%s9132_s0 + $0x1e0] sm:$0xff]  ;;  %4231 = verf.f32 %v1707_v32  ;;  %v4614_v22 = vld [vmem:[%s9132_s0 + $0x1f8] sm:$0xff] }
 0x13f   :  { %3904 = vmatprep.subr.bf16.mxu1 %v9237_v50  ;;  %v6680_v24 = vpop.f32.mrb[28].mxu0  ;;  %v1714_v53 = vmul.f32 0.70710677, %v6645_v54  ;;  %v6690_v47 = vadd.f32 %v6516_v42, %v6061_v27  ;;  %v2355_v61 = vmul.f32 %v2133_v31, %v6539_v34  ;;  %v9239_v23 = vld [vmem:[#allocation22_spill] sm:$0xff]  ;;  %v9240_v32 = vld [vmem:[#allocation21_spill] sm:$0xff]  ;;  %v6705_v42 = vmul.f32 0.5, %v6585_v38 }
 0x140   :  { %v6682_v50 = vpop.f32.mrb[28].mxu1  ;;  %1393 = vmatmul.mubr.f32.gmra.mrb[134].mxu0 %v4613_v11  ;;  %v6693_v37 = vpop.f32.mrb[29].mxu0  ;;  %v9241_v36 = vpack.c.bf16 %v9239_v23, %v9240_v32  ;;  %v6708_v34 = vmul.f32 0.5, %v6526_v8  ;;  %v1713_v31 = vmul.f32 0.70710677, %v6663_v18  ;;  %v6713_v12 = vadd.f32 %v6472_v7, %v6085_v5  ;;  %2938 = vmatprep.mubr.f32.mxu1 %v2356_v0  ;;  %v9243_v39 = vld [vmem:[#allocation24_spill] sm:$0xff] }
 0x141   :  { %v6695_v57 = vpop.f32.mrb[29].mxu1  ;;  %3601 = vmatprep.mubr.msk.f32.mxu0 %vm462_vm0, %v4614_v22  ;;  %v4218_v11 = vpop.eup %4217  ;;  %9242 = vst [vmem:[#allocation16_spill] sm:$0xff] %v6705_v42  ;;  %v9244_v22 = vld [vmem:[#allocation23_spill] sm:$0xff]  ;;  %v6718_v32 = vadd.f32 1.0, %v4214_v13  ;;  %4233 = verf.f32 %v1705_v15  ;;  %v1711_v38 = vmul.f32 0.70710677, %v6676_v44  ;;  %2939 = vmatmul.mubr.f32.gmra.mrb[84].mxu1 %v2355_v61  ;;  %v6728_v7 = vadd.f32 %v6506_v51, %v6063_v55 }
 0x142   :  { %3906 = vmatpush1.bf16.msra.mxu1 %v9241_v36  ;;  %v9245_v20 = vpack.c.bf16 %v9243_v39, %v9244_v22  ;;  %v4220_v23 = vpop.eup %4219  ;;  %v2139_v36 = vadd.f32 1.0, %v4216_v9  ;;  %v6724_v56 = vmul.f32 0.5, %v6624_v4  ;;  %4235 = verf.f32 %v1706_v25  ;;  %v4615_v9 = vld [vmem:[%s9132_s0 + $0x1f0] sm:$0xff] }
 0x143   :  { %9246 = vst [vmem:[#allocation15_spill] sm:$0xff] %v6718_v32  ;;  %v6721_v8 = vpop.f32.mrb[30].mxu0  ;;  %v4222_v42 = vpop.eup %4221  ;;  %v2362_v39 = vmul.f32 %v2140_v59, %v6620_v63  ;;  %v6739_v4 = vmul.f32 0.5, %v6597_v48  ;;  %v6742_v25 = vmul.f32 0.5, %v6633_v41  ;;  %4237 = verf.f32 %v1714_v53  ;;  %v4616_v59 = vld [vmem:[%s9132_s0 + $0x208] sm:$0xff] }
 0x144   :  { %3908 = vmatprep.subr.bf16.mxu1 %v9245_v20  ;;  %9247 = vst [vmem:[#allocation18_spill] sm:$0xff] %v6724_v56  ;;  %v6731_v13 = vpop.f32.mrb[30].mxu1  ;;  %v6733_v20 = vpop.f32.mrb[31].mxu0  ;;  %1399 = vmatmul.mubr.f32.gmra.mrb[136].mxu0 %v4615_v9  ;;  %v1720_v51 = vmul.f32 0.70710677, %v6690_v47  ;;  %v9249_v0 = vpack.c.bf16 %v6354_v40, %v6349_v26  ;;  %v6754_v48 = vadd.f32 1.0, %v4218_v11  ;;  %4239 = verf.f32 %v1713_v31 }
 0x145   :  { %v4224_v15 = vpop.eup %4223  ;;  %9248 = vst [vmem:[#allocation17_spill] sm:$0xff] %v6742_v25  ;;  %v6745_v63 = vpop.f32.mrb[31].mxu1  ;;  %3602 = vmatprep.mubr.msk.f32.mxu0 %vm462_vm0, %v4616_v59  ;;  %v1712_v41 = vmul.f32 0.70710677, %v6713_v12  ;;  %v701_v53 = vadd.f32 %v6504_v1, %v6068_v29  ;;  %2944 = vmatprep.mubr.f32.mxu1 %v2362_v39  ;;  %v2146_v22 = vadd.f32 1.0, %v4222_v42  ;;  %4241 = verf.f32 %v1711_v38  ;;  %v4618_v38 = vld [vmem:[%s9132_s0 + $0x218] sm:$0xff] }
 0x146   :  { %3910 = vmatpush1.bf16.msra.mxu1 %v9249_v0  ;;  %9250 = vst [vmem:[#allocation20_spill] sm:$0xff] %v6754_v48  ;;  %v4226_v61 = vpop.eup %4225  ;;  %v703_v9 = vadd.f32 %v6514_v52, %v6085_v5  ;;  %v2361_v59 = vmul.f32 %v2139_v36, %v6609_v43  ;;  %v6764_v40 = vadd.f32 1.0, %v4220_v23  ;;  %v2145_v11 = vadd.f32 1.0, %v4224_v15  ;;  %v4617_v52 = vld [vmem:[%s9132_s0 + $0x200] sm:$0xff] }
 0x147   :  { %v6762_v56 = vpop.f32.mrb[32].mxu0  ;;  %v4228_v26 = vpop.eup %4227  ;;  %v1719_v31 = vmul.f32 0.70710677, %v6728_v7  ;;  %v6769_v1 = vadd.f32 %v6566_v46, %v6061_v27  ;;  %v1486_v43 = vmul.f32 0.5, %v6563_v45  ;;  %v6780_v23 = vmul.f32 0.5, %v6676_v44 }
 0x148   :  { %9251 = vst [vmem:[#allocation19_spill] sm:$0xff] %v6764_v40  ;;  %v6771_v39 = vpop.f32.mrb[32].mxu1  ;;  %v6773_v42 = vpop.f32.mrb[33].mxu0  ;;  %1405 = vmatmul.mubr.f32.gmra.mrb[138].mxu0 %v4617_v52  ;;  %4243 = verf.f32 %v1720_v51  ;;  %v6784_v36 = vadd.f32 %v6551_v3, %v6063_v55  ;;  %2945 = vmatmul.mubr.f32.gmra.mrb[86].mxu1 %v2361_v59  ;;  %v6792_v0 = vadd.f32 1.0, %v4226_v61  ;;  %v6795_v45 = vmul.f32 0.5, %v6663_v18 }
 0x149   :  { %9252 = vst [vmem:[#allocation22_spill] sm:$0xff] %v6780_v23  ;;  %v6786_v46 = vpop.f32.mrb[33].mxu1  ;;  %3603 = vmatprep.mubr.msk.f32.mxu0 %vm462_vm0, %v4618_v38  ;;  %v4230_v15 = vpop.eup %4229  ;;  %4245 = verf.f32 %v1712_v41  ;;  %v1717_v44 = vmul.f32 0.70710677, %v701_v53  ;;  %v2152_v3 = vadd.f32 1.0, %v4228_v26  ;;  %v707_v59 = vadd.f32 %v6536_v16, %v6068_v29  ;;  %v4619_v16 = vld [vmem:[%s9132_s0 + $0x210] sm:$0xff] }
 0x14a   :  { %9253 = vst [vmem:[#allocation21_spill] sm:$0xff] %v6792_v0  ;;  %v4232_v51 = vpop.eup %4231  ;;  %v1718_v52 = vmul.f32 0.70710677, %v703_v9  ;;  %v2368_v23 = vmul.f32 %v2146_v22, %v6708_v34  ;;  %4247 = verf.f32 %v1719_v31  ;;  %v1726_v38 = vmul.f32 0.70710677, %v6769_v1  ;;  %v4620_v0 = vld [vmem:[%s9132_s0 + $0x228] sm:$0xff] }
 0x14b   :  { %v6800_v25 = vpop.f32.mrb[34].mxu0  ;;  %v6805_v61 = vadd.f32 %v6599_v6, %v6061_v27  ;;  %v2367_v18 = vmul.f32 %v2145_v11, %v6671_v49  ;;  %v4234_v34 = vpop.eup %4233  ;;  %v6816_v22 = vmul.f32 0.5, %v6713_v12  ;;  %v6819_v31 = vmul.f32 0.5, %v6645_v54 }
 0x14c   :  { %v6808_v41 = vpop.f32.mrb[34].mxu1  ;;  %v6810_v26 = vpop.f32.mrb[35].mxu0  ;;  %1411 = vmatmul.mubr.f32.gmra.mrb[140].mxu0 %v4619_v16  ;;  %v1725_v6 = vmul.f32 0.70710677, %v6784_v36  ;;  %v709_v49 = vadd.f32 %v6553_v2, %v6085_v5  ;;  %2950 = vmatprep.mubr.f32.mxu1 %v2368_v23  ;;  %v6830_v12 = vadd.f32 1.0, %v4230_v15  ;;  %v6832_v54 = vmul.f32 0.5, %v701_v53 }
 0x14d   :  { %9254 = vst [vmem:[#allocation24_spill] sm:$0xff] %v6816_v22  ;;  %v6824_v11 = vpop.f32.mrb[35].mxu1  ;;  %3604 = vmatprep.mubr.msk.f32.mxu0 %vm462_vm0, %v4620_v0  ;;  %v4236_v16 = vpop.eup %4235  ;;  %v2151_v22 = vadd.f32 1.0, %v4232_v51  ;;  %4249 = verf.f32 %v1717_v44  ;;  %2951 = vmatmul.mubr.f32.gmra.mrb[88].mxu1 %v2367_v18  ;;  %v1723_v2 = vmul.f32 0.70710677, %v707_v59  ;;  %v6836_v23 = vadd.f32 %v6587_v10, %v6063_v55  ;;  %v4621_v10 = vld [vmem:[%s9132_s0 + $0x220] sm:$0xff] }
 0x14e   :  { %9255 = vst [vmem:[#allocation23_spill] sm:$0xff] %v6830_v12  ;;  %9256 = vst [vmem:[#allocation35_spill] sm:$0xff] %v6832_v54  ;;  %v4238_v48 = vpop.eup %4237  ;;  %4251 = verf.f32 %v1718_v52  ;;  %v2374_v40 = vmul.f32 %v2152_v3, %v1486_v43  ;;  %v6841_v0 = vmul.f32 0.5, %v6728_v7  ;;  %v6843_v15 = vmul.f32 0.5, %v703_v9  ;;  %v4622_v9 = vld [vmem:[%s9132_s0 + $0x238] sm:$0xff] }
 0x14f   :  { %v6838_v32 = vpop.f32.mrb[36].mxu0  ;;  %v4240_v30 = vpop.eup %4239  ;;  %4253 = verf.f32 %v1726_v38  ;;  %v1732_v53 = vmul.f32 0.70710677, %v6805_v61  ;;  %v6853_v3 = vadd.f32 1.0, %v4234_v34  ;;  %v6855_v52 = vadd.f32 1.0, %v4236_v16 }
 0x150   :  { %9257 = vst [vmem:[#allocation36_spill] sm:$0xff] %v6843_v15  ;;  %v6846_v44 = vpop.f32.mrb[36].mxu1  ;;  %v6848_v51 = vpop.f32.mrb[37].mxu0  ;;  %1417 = vmatmul.mubr.f32.gmra.mrb[142].mxu0 %v4621_v10  ;;  %4255 = verf.f32 %v1725_v6  ;;  %v1724_v7 = vmul.f32 0.70710677, %v709_v49  ;;  %2956 = vmatprep.mubr.f32.mxu1 %v2374_v40  ;;  %v2158_v38 = vadd.f32 1.0, %v4238_v48  ;;  %v713_v10 = vadd.f32 %v6577_v60, %v6068_v29 }
 0x151   :  { %v4242_v43 = vpop.eup %4241  ;;  %9258 = vst [vmem:[#allocation37_spill] sm:$0xff] %v6853_v3  ;;  %9259 = vst [vmem:[#allocation38_spill] sm:$0xff] %v6855_v52  ;;  %3605 = vmatprep.mubr.msk.f32.mxu0 %vm462_vm0, %v4622_v9  ;;  %v1498_v18 = vmul.f32 0.5, %v6690_v47  ;;  %v2373_v34 = vmul.f32 %v2151_v22, %v6739_v4  ;;  %v6865_v54 = vpop.f32.mrb[37].mxu1  ;;  %v2157_v6 = vadd.f32 1.0, %v4240_v30  ;;  %4257 = verf.f32 %v1723_v2  ;;  %v4624_v2 = vld [vmem:[%s9132_s0 + $0x248] sm:$0xff] }
 0x152   :  { %v4244_v16 = vpop.eup %4243  ;;  %v1731_v40 = vmul.f32 0.70710677, %v6836_v23  ;;  %v6870_v15 = vadd.f32 %v6647_v19, %v6061_v27  ;;  %v6874_v47 = vadd.f32 1.0, %v4242_v43  ;;  %v6876_v3 = vmul.f32 0.5, %v707_v59  ;;  %v4623_v19 = vld [vmem:[%s9132_s0 + $0x230] sm:$0xff] }
 0x153   :  { %v6872_v9 = vpop.f32.mrb[38].mxu0  ;;  %v4246_v48 = vpop.eup %4245  ;;  %4259 = verf.f32 %v1732_v53  ;;  %v6880_v60 = vadd.f32 %v6635_v33, %v6063_v55  ;;  %2957 = vmatmul.mubr.f32.gmra.mrb[90].mxu1 %v2373_v34  ;;  %v6890_v22 = vmul.f32 0.5, %v6784_v36  ;;  %v6892_v59 = vmul.f32 0.5, %v709_v49 }
 0x154   :  { %9260 = vst [vmem:[#allocation39_spill] sm:$0xff] %v6874_v47  ;;  %9261 = vst [vmem:[#allocation40_spill] sm:$0xff] %v6876_v3  ;;  %v6882_v30 = vpop.f32.mrb[38].mxu1  ;;  %v6884_v4 = vpop.f32.mrb[39].mxu0  ;;  %1423 = vmatmul.mubr.f32.gmra.mrb[144].mxu0 %v4623_v19  ;;  %4261 = verf.f32 %v1724_v7  ;;  %v715_v33 = vadd.f32 %v6589_v58, %v6085_v5  ;;  %v2164_v43 = vadd.f32 1.0, %v4244_v16  ;;  %v719_v19 = vadd.f32 %v6626_v21, %v6068_v29 }
 0x155   :  { %9262 = vst [vmem:[#allocation41_spill] sm:$0xff] %v6892_v59  ;;  %3606 = vmatprep.mubr.msk.f32.mxu0 %vm462_vm0, %v4624_v2  ;;  %v4248_v53 = vpop.eup %4247  ;;  %v1729_v34 = vmul.f32 0.70710677, %v713_v10  ;;  %v2380_v36 = vmul.f32 %v2158_v38, %v6819_v31  ;;  %v6903_v49 = vpop.f32.mrb[39].mxu1  ;;  %4263 = verf.f32 %v1731_v40  ;;  %v1738_v7 = vmul.f32 0.70710677, %v6870_v15 }
 0x156   :  { %v6908_v58 = vadd.f32 %v6695_v57, %v6061_v27  ;;  %v2379_v3 = vmul.f32 %v2157_v6, %v6795_v45  ;;  %v6913_v59 = vadd.f32 1.0, %v4246_v48  ;;  %v1504_v21 = vmul.f32 0.5, %v6769_v1  ;;  %v4625_v45 = vld [vmem:[%s9132_s0 + $0x240] sm:$0xff] }
 0x157   :  { %v6911_v2 = vpop.f32.mrb[40].mxu0  ;;  %v4250_v16 = vpop.eup %4249  ;;  %v1737_v31 = vmul.f32 0.70710677, %v6880_v60  ;;  %v6919_v38 = vadd.f32 %v6637_v17, %v6085_v5  ;;  %2962 = vmatprep.mubr.f32.mxu1 %v2380_v36  ;;  %v2163_v48 = vadd.f32 1.0, %v4248_v53  ;;  %v6928_v47 = vmul.f32 0.5, %v713_v10 }
 0x158   :  { %9263 = vst [vmem:[#allocation42_spill] sm:$0xff] %v6913_v59  ;;  %v6921_v40 = vpop.f32.mrb[40].mxu1  ;;  %v6923_v57 = vpop.f32.mrb[41].mxu0  ;;  %1429 = vmatmul.mubr.f32.gmra.mrb[146].mxu0 %v4625_v45  ;;  %v6931_v1 = vmul.f32 0.5, %v6836_v23  ;;  %v1730_v59 = vmul.f32 0.70710677, %v715_v33  ;;  %2963 = vmatmul.mubr.f32.gmra.mrb[92].mxu1 %v2379_v3  ;;  %4265 = verf.f32 %v1729_v34  ;;  %v6937_v12 = vadd.f32 %v6682_v50, %v6063_v55 }
 0x159   :  { %9264 = vst [vmem:[#allocation43_spill] sm:$0xff] %v6923_v57  ;;  %v4252_v6 = vpop.eup %4251  ;;  %9265 = vst [vmem:[#allocation44_spill] sm:$0xff] %v6928_v47  ;;  %v6933_v17 = vpop.f32.mrb[41].mxu1  ;;  %v1735_v52 = vmul.f32 0.70710677, %v719_v19  ;;  %v2386_v35 = vmul.f32 %v2164_v43, %v1498_v18  ;;  %v6939_v57 = vadd.f32 1.0, %v4250_v16  ;;  %4267 = verf.f32 %v1738_v7 }
 0x15a   :  { %v4254_v36 = vpop.eup %4253  ;;  %v6941_v10 = vmul.f32 0.5, %v715_v33  ;;  %v1744_v23 = vmul.f32 0.70710677, %v6908_v58  ;;  %v6946_v3 = vadd.f32 1.0, %v4252_v6  ;;  %4269 = verf.f32 %v1737_v31 }
 0x15b   :  { %v4256_v45 = vpop.eup %4255  ;;  %9266 = vst [vmem:[#allocation45_spill] sm:$0xff] %v6939_v57  ;;  %v6944_v53 = vpop.f32.mrb[42].mxu0  ;;  %v1736_v34 = vmul.f32 0.70710677, %v6919_v38  ;;  %v725_v50 = vadd.f32 %v6680_v24, %v6068_v29  ;;  %2968 = vmatprep.mubr.f32.mxu1 %v2386_v35  ;;  %v2170_v43 = vadd.f32 1.0, %v4254_v36  ;;  %4271 = verf.f32 %v1730_v59 }
 0x15c   :  { %9267 = vst [vmem:[#allocation46_spill] sm:$0xff] %v6941_v10  ;;  %9268 = vst [vmem:[#allocation47_spill] sm:$0xff] %v6946_v3  ;;  %v4258_v18 = vpop.eup %4257  ;;  %v727_v33 = vadd.f32 %v6693_v37, %v6085_v5  ;;  %v2385_v7 = vmul.f32 %v2163_v48, %v6841_v0  ;;  %v6954_v16 = vpop.f32.mrb[42].mxu1  ;;  %v2169_v31 = vadd.f32 1.0, %v4256_v45  ;;  %4273 = verf.f32 %v1735_v52 }
 0x15d   :  { %v6956_v47 = vpop.f32.mrb[43].mxu0  ;;  %v4260_v6 = vpop.eup %4259  ;;  %v1743_v10 = vmul.f32 0.70710677, %v6937_v12  ;;  %v6961_v35 = vadd.f32 %v6745_v63, %v6061_v27  ;;  %v1510_v37 = vmul.f32 0.5, %v6805_v61  ;;  %v6966_v36 = vmul.f32 0.5, %v719_v19 }
 0x15e   :  { %v6963_v24 = vpop.f32.mrb[43].mxu1  ;;  %v4262_v59 = vpop.eup %4261  ;;  %4275 = verf.f32 %v1744_v23  ;;  %v6970_v0 = vadd.f32 %v6731_v13, %v6063_v55  ;;  %2969 = vmatmul.mubr.f32.gmra.mrb[94].mxu1 %v2385_v7  ;;  %v6974_v48 = vadd.f32 1.0, %v4258_v18  ;;  %v1741_v63 = vmul.f32 0.70710677, %v725_v50 }
 0x15f   :  { %9269 = vst [vmem:[#allocation48_spill] sm:$0xff] %v6966_v36  ;;  %v6972_v52 = vpop.f32.mrb[44].mxu0  ;;  %4277 = verf.f32 %v1736_v34  ;;  %v6978_v45 = vadd.f32 %v6721_v8, %v6068_v29  ;;  %v4264_v57 = vpop.eup %4263  ;;  %v2176_v61 = vadd.f32 1.0, %v4260_v6  ;;  %v1742_v19 = vmul.f32 0.70710677, %v727_v33 }
 0x160   :  { %9270 = vst [vmem:[#allocation49_spill] sm:$0xff] %v6974_v48  ;;  %v6982_v23 = vadd.f32 %v6733_v20, %v6085_v5  ;;  %v2392_v13 = vmul.f32 %v2170_v43, %v1504_v21  ;;  %v6984_v36 = vpop.f32.mrb[44].mxu1  ;;  %v6986_v7 = vpop.f32.mrb[45].mxu0  ;;  %4279 = verf.f32 %v1743_v10  ;;  %v1750_v34 = vmul.f32 0.70710677, %v6961_v35 }
 0x161   :  { %9271 = vst [vmem:[#allocation50_spill] sm:$0xff] %v6986_v7  ;;  %v6991_v18 = vadd.f32 %v6786_v46, %v6061_v27  ;;  %v2391_v8 = vmul.f32 %v2169_v31, %v6890_v22  ;;  %v6994_v6 = vpop.f32.mrb[45].mxu1  ;;  %v6997_v48 = vmul.f32 0.5, %v6880_v60  ;;  %v7000_v20 = vmul.f32 0.5, %v6919_v38 }
 0x162   :  { %v1516_v21 = vmul.f32 0.5, %v6870_v15  ;;  %v1749_v10 = vmul.f32 0.70710677, %v6970_v0  ;;  %2974 = vmatprep.mubr.f32.mxu1 %v2392_v13  ;;  %v4266_v3 = vpop.eup %4265  ;;  %v7006_v46 = vadd.f32 1.0, %v4262_v59  ;;  %v2175_v7 = vadd.f32 1.0, %v4264_v57 }
 0x163   :  { %9272 = vst [vmem:[#allocation51_spill] sm:$0xff] %v7000_v20  ;;  %v7004_v43 = vpop.f32.mrb[46].mxu0  ;;  %4281 = verf.f32 %v1741_v63  ;;  %v1747_v22 = vmul.f32 0.70710677, %v6978_v45  ;;  %2975 = vmatmul.mubr.f32.gmra.mrb[96].mxu1 %v2391_v8  ;;  %v4268_v38 = vpop.eup %4267  ;;  %v1748_v15 = vmul.f32 0.70710677, %v6982_v23  ;;  %v737_v13 = vadd.f32 %v6762_v56, %v6068_v29 }
 0x164   :  { %9273 = vst [vmem:[#allocation52_spill] sm:$0xff] %v7004_v43  ;;  %9274 = vst [vmem:[#allocation53_spill] sm:$0xff] %v7006_v46  ;;  %v7009_v60 = vpop.f32.mrb[46].mxu1  ;;  %v7011_v31 = vpop.f32.mrb[47].mxu0  ;;  %4283 = verf.f32 %v1742_v19  ;;  %v2398_v20 = vmul.f32 %v2176_v61, %v1510_v37  ;;  %v7018_v57 = vmul.f32 0.5, %v725_v50  ;;  %v7022_v63 = vadd.f32 %v6771_v39, %v6063_v55 }
 0x165   :  { %9275 = vst [vmem:[#allocation54_spill] sm:$0xff] %v7011_v31  ;;  %v7016_v43 = vpop.f32.mrb[47].mxu1  ;;  %v4270_v59 = vpop.eup %4269  ;;  %4285 = verf.f32 %v1750_v34  ;;  %v1756_v8 = vmul.f32 0.70710677, %v6991_v18  ;;  %v7026_v19 = vmul.f32 0.5, %v6937_v12  ;;  %v7028_v31 = vmul.f32 0.5, %v727_v33 }
 0x166   :  { %9276 = vst [vmem:[#allocation55_spill] sm:$0xff] %v7018_v57  ;;  %v4272_v46 = vpop.eup %4271  ;;  %4287 = verf.f32 %v1749_v10  ;;  %v739_v56 = vadd.f32 %v6773_v42, %v6085_v5  ;;  %2980 = vmatprep.mubr.f32.mxu1 %v2398_v20  ;;  %v2182_v37 = vadd.f32 1.0, %v4268_v38  ;;  %v7034_v39 = vadd.f32 %v6800_v25, %v6068_v29 }
 0x167   :  { %9277 = vst [vmem:[#allocation56_spill] sm:$0xff] %v7028_v31  ;;  %v4274_v50 = vpop.eup %4273  ;;  %4289 = verf.f32 %v1747_v22  ;;  %v2397_v61 = vmul.f32 %v2175_v7, %v6931_v1  ;;  %v7037_v34 = vpop.f32.mrb[48].mxu0  ;;  %v7041_v57 = vadd.f32 1.0, %v4266_v3  ;;  %v2181_v10 = vadd.f32 1.0, %v4270_v59 }
 0x168   :  { %v7039_v12 = vpop.f32.mrb[48].mxu1  ;;  %v4276_v33 = vpop.eup %4275  ;;  %4291 = verf.f32 %v1748_v15  ;;  %v1753_v42 = vmul.f32 0.70710677, %v737_v13  ;;  %v7047_v31 = vadd.f32 1.0, %v4272_v46  ;;  %v1522_v25 = vmul.f32 0.5, %v6908_v58 }
 0x169   :  { %9278 = vst [vmem:[#allocation57_spill] sm:$0xff] %v7041_v57  ;;  %v7043_v20 = vpop.f32.mrb[49].mxu0  ;;  %v7045_v38 = vpop.f32.mrb[49].mxu1  ;;  %v1755_v1 = vmul.f32 0.70710677, %v7022_v63  ;;  %4293 = verf.f32 %v1756_v8  ;;  %2981 = vmatmul.mubr.f32.gmra.mrb[98].mxu1 %v2397_v61  ;;  %v7051_v7 = vadd.f32 1.0, %v4274_v50  ;;  %v1030_v59 = vadd.f32 %v6808_v41, %v6063_v55 }
 0x16a   :  { %9279 = vst [vmem:[#allocation58_spill] sm:$0xff] %v7043_v20  ;;  %9280 = vst [vmem:[#allocation59_spill] sm:$0xff] %v7045_v38  ;;  %v4278_v22 = vpop.eup %4277  ;;  %v7054_v3 = vmul.f32 0.5, %v6978_v45  ;;  %v1754_v15 = vmul.f32 0.70710677, %v739_v56  ;;  %v2188_v20 = vadd.f32 1.0, %v4276_v33  ;;  %v1032_v58 = vadd.f32 %v6824_v11, %v6061_v27 }
 0x16b   :  { %9281 = vst [vmem:[#allocation60_spill] sm:$0xff] %v7047_v31  ;;  %9282 = vst [vmem:[#allocation61_spill] sm:$0xff] %v7051_v7  ;;  %v4280_v57 = vpop.eup %4279  ;;  %v1759_v46 = vmul.f32 0.70710677, %v7034_v39  ;;  %v2404_v31 = vmul.f32 %v2182_v37, %v1516_v21  ;;  %v7061_v38 = vpop.f32.mrb[50].mxu0  ;;  %v7066_v50 = vmul.f32 0.5, %v6970_v0  ;;  %4295 = verf.f32 %v1753_v42 }
 0x16c   :  { %9283 = vst [vmem:[#allocation62_spill] sm:$0xff] %v7054_v3  ;;  %v7063_v8 = vpop.f32.mrb[50].mxu1  ;;  %v745_v45 = vadd.f32 %v6810_v26, %v6085_v5  ;;  %v2403_v41 = vmul.f32 %v2181_v10, %v6997_v48  ;;  %v7071_v61 = vpop.f32.mrb[51].mxu0  ;;  %v7075_v11 = vadd.f32 1.0, %v4278_v22  ;;  %v7078_v21 = vmul.f32 0.5, %v6982_v23 }
 0x16d   :  { %v7073_v33 = vpop.f32.mrb[51].mxu1  ;;  %v4282_v3 = vpop.eup %4281  ;;  %v1528_v37 = vmul.f32 0.5, %v6961_v35  ;;  %4297 = verf.f32 %v1755_v1  ;;  %2986 = vmatprep.mubr.f32.mxu1 %v2404_v31  ;;  %v2187_v42 = vadd.f32 1.0, %v4280_v57  ;;  %v7081_v7 = vmul.f32 0.5, %v737_v13 }
 0x16e   :  { %9284 = vst [vmem:[#allocation63_spill] sm:$0xff] %v7075_v11  ;;  %9285 = vst [vmem:[#allocation64_spill] sm:$0xff] %v7078_v21  ;;  %v4284_v0 = vpop.eup %4283  ;;  %4299 = verf.f32 %v1754_v15  ;;  %v1761_v26 = vmul.f32 0.70710677, %v1030_v59  ;;  %2987 = vmatmul.mubr.f32.gmra.mrb[100].mxu1 %v2403_v41  ;;  %v1762_v22 = vmul.f32 0.70710677, %v1032_v58  ;;  %v749_v23 = vadd.f32 %v6838_v32, %v6068_v29 }
 0x16f   :  { %9286 = vst [vmem:[#allocation65_spill] sm:$0xff] %v7081_v7  ;;  %v7083_v48 = vpop.f32.mrb[52].mxu0  ;;  %v4286_v10 = vpop.eup %4285  ;;  %4301 = verf.f32 %v1759_v46  ;;  %v2410_v21 = vmul.f32 %v2188_v20, %v1522_v25  ;;  %v7092_v13 = vmul.f32 0.5, %v7022_v63  ;;  %v7094_v57 = vmul.f32 0.5, %v739_v56 }
 0x170   :  { %v7087_v11 = vpop.f32.mrb[52].mxu1  ;;  %v7089_v35 = vpop.f32.mrb[53].mxu0  ;;  %v1760_v1 = vmul.f32 0.70710677, %v745_v45  ;;  %v7098_v15 = vadd.f32 %v6865_v54, %v6061_v27  ;;  %v7102_v32 = vadd.f32 1.0, %v4282_v3  ;;  %v7104_v20 = vadd.f32 1.0, %v4284_v0 }
 0x171   :  { %9287 = vst [vmem:[#allocation66_spill] sm:$0xff] %v7089_v35  ;;  %v4288_v31 = vpop.eup %4287  ;;  %9288 = vst [vmem:[#allocation67_spill] sm:$0xff] %v7094_v57  ;;  %v7100_v46 = vpop.f32.mrb[53].mxu1  ;;  %v1534_v25 = vmul.f32 0.5, %v6991_v18  ;;  %v1036_v63 = vadd.f32 %v6846_v44, %v6063_v55  ;;  %2992 = vmatprep.mubr.f32.mxu1 %v2410_v21  ;;  %v2194_v7 = vadd.f32 1.0, %v4286_v10  ;;  %4303 = verf.f32 %v1761_v26 }
 0x172   :  { %v4290_v41 = vpop.eup %4289  ;;  %9289 = vst [vmem:[#allocation68_spill] sm:$0xff] %v7102_v32  ;;  %9290 = vst [vmem:[#allocation69_spill] sm:$0xff] %v7104_v20  ;;  %v751_v54 = vadd.f32 %v6848_v51, %v6085_v5  ;;  %v2409_v57 = vmul.f32 %v2187_v42, %v7026_v19  ;;  %v2193_v32 = vadd.f32 1.0, %v4288_v31  ;;  %v7115_v0 = vmul.f32 0.5, %v7034_v39 }
 0x173   :  { %v4292_v56 = vpop.eup %4291  ;;  %v7112_v35 = vpop.f32.mrb[54].mxu0  ;;  %4305 = verf.f32 %v1762_v22  ;;  %v1765_v18 = vmul.f32 0.70710677, %v749_v23  ;;  %v7121_v21 = vadd.f32 1.0, %v4290_v41  ;;  %v7123_v26 = vmul.f32 0.5, %v1030_v59 }
 0x174   :  { %v4294_v3 = vpop.eup %4293  ;;  %9291 = vst [vmem:[#allocation70_spill] sm:$0xff] %v7115_v0  ;;  %v7117_v20 = vpop.f32.mrb[54].mxu1  ;;  %4307 = verf.f32 %v1760_v1  ;;  %v1768_v51 = vmul.f32 0.70710677, %v7098_v15  ;;  %2993 = vmatmul.mubr.f32.gmra.mrb[102].mxu1 %v2409_v57  ;;  %v7128_v42 = vmul.f32 0.5, %v745_v45  ;;  %v7130_v39 = vmul.f32 0.5, %v1032_v58 }
 0x175   :  { %9292 = vst [vmem:[#allocation71_spill] sm:$0xff] %v7117_v20  ;;  %v7119_v44 = vpop.f32.mrb[55].mxu0  ;;  %9294 = vst [vmem:[#allocation73_spill] sm:$0xff] %v7121_v21  ;;  %v7126_v19 = vpop.f32.mrb[55].mxu1  ;;  %v1767_v10 = vmul.f32 0.70710677, %v1036_v63  ;;  %v755_v22 = vadd.f32 %v6872_v9, %v6068_v29  ;;  %v2416_v21 = vmul.f32 %v2194_v7, %v1528_v37  ;;  %4309 = verf.f32 %v1765_v18 }
 0x176   :  { %9293 = vst [vmem:[#allocation72_spill] sm:$0xff] %v7119_v44  ;;  %9295 = vst [vmem:[#allocation74_spill] sm:$0xff] %v7128_v42  ;;  %v4296_v31 = vpop.eup %4295  ;;  %v7134_v0 = vadd.f32 1.0, %v4292_v56  ;;  %v2200_v41 = vadd.f32 1.0, %v4294_v3  ;;  %v1766_v59 = vmul.f32 0.70710677, %v751_v54  ;;  %v1044_v45 = vadd.f32 %v6903_v49, %v6061_v27 }
 0x177   :  { %v7136_v1 = vpop.f32.mrb[56].mxu0  ;;  %v4298_v44 = vpop.eup %4297  ;;  %v9297_v57 = vld [vmem:[#allocation25_spill] sm:$0xff]  ;;  %v2415_v42 = vmul.f32 %v2193_v32, %v7066_v50  ;;  %v7147_v3 = vmul.f32 0.5, %v749_v23  ;;  %v7149_v7 = vmul.f32 0.5, %v1036_v63  ;;  %4311 = verf.f32 %v1768_v51  ;;  %2998 = vmatprep.mubr.f32.mxu1 %v2416_v21 }
 0x178   :  { %9296 = vst [vmem:[#allocation75_spill] sm:$0xff] %v7134_v0  ;;  %v2324_v58 = vmul.f32 %v6410_v28, %v9297_v57  ;;  %v7143_v20 = vpop.f32.mrb[56].mxu1  ;;  %v7145_v9 = vpop.f32.mrb[57].mxu0  ;;  %v1042_v37 = vadd.f32 %v6882_v30, %v6063_v55  ;;  %4313 = verf.f32 %v1767_v10  ;;  %v7155_v28 = vmul.f32 0.5, %v751_v54 }
 0x179   :  { %v4300_v56 = vpop.eup %4299  ;;  %9298 = vst [vmem:[#allocation25_spill] sm:$0xff] %v7147_v3  ;;  %v7153_v49 = vpop.f32.mrb[57].mxu1  ;;  %v1771_v50 = vmul.f32 0.70710677, %v755_v22  ;;  %v757_v32 = vadd.f32 %v6884_v4, %v6085_v5  ;;  %2999 = vmatmul.mubr.f32.gmra.mrb[104].mxu1 %v2415_v42  ;;  %v7159_v23 = vadd.f32 1.0, %v4296_v31  ;;  %v2199_v63 = vadd.f32 1.0, %v4298_v44 }
 0x17a   :  { %v4302_v18 = vpop.eup %4301  ;;  %9299 = vst [vmem:[#allocation76_spill] sm:$0xff] %v7155_v28  ;;  %2621 = vmatprep.mubr.f32.mxu0 %v2324_v58  ;;  %v7163_v51 = vadd.f32 %v6933_v17, %v6061_v27  ;;  %v2422_v30 = vmul.f32 %v2200_v41, %v1534_v25  ;;  %v7168_v54 = vadd.f32 1.0, %v4300_v56  ;;  %4315 = verf.f32 %v1766_v59  ;;  %v9304_v58 = vld [vmem:[#allocation27_spill] sm:$0xff] }
 0x17b   :  { %9300 = vst [vmem:[#allocation77_spill] sm:$0xff] %v7159_v23  ;;  %2622 = vmatmul.mubr.f32.vlgmr.msra.gmra.mrb[148].mxu0 %v6404_v62  ;;  %v7166_v21 = vpop.f32.mrb[58].mxu0  ;;  %v1774_v10 = vmul.f32 0.70710677, %v1044_v45  ;;  %v761_v4 = vadd.f32 %v6911_v2, %v6068_v29  ;;  %v4304_v31 = vpop.eup %4303  ;;  %v7174_v44 = vadd.f32 1.0, %v4302_v18  ;;  %v7177_v17 = vmul.f32 0.5, %v7098_v15 }
 0x17c   :  { %9301 = vst [vmem:[#allocation78_spill] sm:$0xff] %v7168_v54  ;;  %v7172_v42 = vpop.f32.mrb[58].mxu1  ;;  %v7179_v57 = vmul.f32 0.5, %v755_v22  ;;  %v1773_v62 = vmul.f32 0.70710677, %v1042_v37  ;;  %3004 = vmatprep.mubr.f32.mxu1 %v2422_v30  ;;  %4317 = verf.f32 %v1771_v50  ;;  %v7181_v41 = vmul.f32 0.5, %v1042_v37 }
 0x17d   :  { %9302 = vst [vmem:[#allocation79_spill] sm:$0xff] %v7174_v44  ;;  %v4306_v25 = vpop.eup %4305  ;;  %v1772_v59 = vmul.f32 0.70710677, %v757_v32  ;;  %v2330_v2 = vmul.f32 %v6463_v14, %v9304_v58  ;;  %v7185_v56 = vpop.f32.mrb[59].mxu0  ;;  %v1048_v15 = vadd.f32 %v6921_v40, %v6063_v55  ;;  %v9305_v22 = vld [vmem:[#allocation43_spill] sm:$0xff]  ;;  %v2421_v37 = vmul.f32 %v2199_v63, %v7092_v13 }
 0x17e   :  { %9303 = vst [vmem:[#allocation80_spill] sm:$0xff] %v7179_v57  ;;  %v7187_v3 = vpop.f32.mrb[59].mxu1  ;;  %v4308_v18 = vpop.eup %4307  ;;  %v763_v57 = vadd.f32 %v9305_v22, %v6085_v5  ;;  %v1780_v30 = vmul.f32 0.70710677, %v7163_v51  ;;  %v7197_v28 = vmul.f32 0.5, %v757_v32  ;;  %v7199_v14 = vmul.f32 0.5, %v1044_v45 }
 0x17f   :  { %v7195_v50 = vpop.f32.mrb[60].mxu0  ;;  %4319 = verf.f32 %v1774_v10  ;;  %v1777_v58 = vmul.f32 0.70710677, %v761_v4  ;;  %2627 = vmatprep.mubr.f32.mxu0 %v2330_v2  ;;  %v2205_v40 = vadd.f32 1.0, %v4304_v31  ;;  %v2206_v54 = vadd.f32 1.0, %v4306_v25  ;;  %3005 = vmatmul.mubr.f32.gmra.mrb[106].mxu1 %v2421_v37  ;;  %v4310_v32 = vpop.eup %4309 }
 0x180   :  { %9306 = vst [vmem:[#allocation27_spill] sm:$0xff] %v7197_v28  ;;  %v7201_v44 = vpop.f32.mrb[60].mxu1  ;;  %v7203_v23 = vpop.f32.mrb[61].mxu0  ;;  %4321 = verf.f32 %v1773_v62  ;;  %v7207_v22 = vadd.f32 %v6963_v24, %v6061_v27  ;;  %v7211_v45 = vadd.f32 1.0, %v4308_v18  ;;  %v7213_v63 = vmul.f32 0.5, %v761_v4  ;;  %v9314_v4 = vld [vmem:[#allocation26_spill] sm:$0xff] }
 0x181   :  { %9307 = vst [vmem:[#allocation43_spill] sm:$0xff] %v7201_v44  ;;  %9308 = vst [vmem:[#allocation81_spill] sm:$0xff] %v7203_v23  ;;  %v7209_v13 = vpop.f32.mrb[61].mxu1  ;;  %4323 = verf.f32 %v1772_v59  ;;  %v767_v10 = vadd.f32 %v6944_v53, %v6068_v29  ;;  %v4312_v2 = vpop.eup %4311  ;;  %v7217_v31 = vmul.f32 0.5, %v1048_v15  ;;  %v1779_v62 = vmul.f32 0.70710677, %v1048_v15 }
 0x182   :  { %9309 = vst [vmem:[#allocation82_spill] sm:$0xff] %v7209_v13  ;;  %9310 = vst [vmem:[#allocation83_spill] sm:$0xff] %v7211_v45  ;;  %v7219_v25 = vmul.f32 0.5, %v763_v57  ;;  %4325 = verf.f32 %v1780_v30  ;;  %v4314_v37 = vpop.eup %4313  ;;  %v1778_v28 = vmul.f32 0.70710677, %v763_v57  ;;  %v7225_v59 = vadd.f32 %v6954_v16, %v6063_v55  ;;  %v9315_v18 = vld [vmem:[#allocation32_spill] sm:$0xff] }
 0x183   :  { %9311 = vst [vmem:[#allocation84_spill] sm:$0xff] %v7213_v63  ;;  %v7221_v24 = vpop.f32.mrb[62].mxu0  ;;  %4327 = verf.f32 %v1777_v58  ;;  %v2329_v63 = vmul.f32 %v9315_v18, %v9314_v4  ;;  %v769_v15 = vadd.f32 %v6956_v47, %v6085_v5  ;;  %v1786_v30 = vmul.f32 0.70710677, %v7207_v22  ;;  %v9318_v58 = vld [vmem:[#allocation29_spill] sm:$0xff]  ;;  %v9319_v57 = vld [vmem:[#allocation2_spill] sm:$0xff] }
 0x184   :  { %9312 = vst [vmem:[#allocation85_spill] sm:$0xff] %v7219_v25  ;;  %9313 = vst [vmem:[#allocation86_spill] sm:$0xff] %v7221_v24  ;;  %v7229_v53 = vpop.f32.mrb[62].mxu1  ;;  %v7231_v45 = vpop.f32.mrb[63].mxu0  ;;  %v2428_v25 = vmul.f32 %v2206_v54, %v7130_v39  ;;  %v2336_v0 = vmul.f32 %v9319_v57, %v9318_v58  ;;  %v2212_v23 = vadd.f32 1.0, %v4312_v2  ;;  %v7243_v4 = vadd.f32 %v6972_v52, %v6068_v29 }
 0x185   :  { %9316 = vst [vmem:[#allocation26_spill] sm:$0xff] %v7229_v53  ;;  %9317 = vst [vmem:[#allocation32_spill] sm:$0xff] %v7231_v45  ;;  %v7239_v24 = vpop.f32.mrb[63].mxu1  ;;  %v4316_v16 = vpop.eup %4315  ;;  %v1783_v44 = vmul.f32 0.70710677, %v767_v10  ;;  %2628 = vmatmul.mubr.f32.gmra.mrb[150].mxu0 %v2329_v63  ;;  %v2427_v18 = vmul.f32 %v2205_v40, %v7123_v26  ;;  %v7246_v47 = vadd.f32 1.0, %v4310_v32  ;;  %4329 = verf.f32 %v1779_v62 }
 0x186   :  { %9320 = vst [vmem:[#allocation29_spill] sm:$0xff] %v7239_v24  ;;  %v2211_v45 = vadd.f32 1.0, %v4314_v37  ;;  %v7250_v39 = vadd.f32 %v6984_v36, %v6063_v55  ;;  %3010 = vmatprep.mubr.f32.mxu1 %v2428_v25  ;;  %2633 = vmatprep.mubr.f32.mxu0 %v2336_v0  ;;  %v4318_v2 = vpop.eup %4317  ;;  %4331 = verf.f32 %v1778_v28  ;;  %v1785_v52 = vmul.f32 0.70710677, %v7225_v59  ;;  %v9323_v26 = vld [vmem:[#allocation28_spill] sm:$0xff]  ;;  %v9324_v40 = vld [vmem:[#allocation7_spill] sm:$0xff] }
 0x187   :  { %9321 = vst [vmem:[#allocation2_spill] sm:$0xff] %v7246_v47  ;;  %v7252_v54 = vpop.f32.mrb[64].mxu0  ;;  %v7257_v63 = vadd.f32 %v6994_v6, %v6061_v27  ;;  %3011 = vmatmul.mubr.f32.gmra.mrb[108].mxu1 %v2427_v18  ;;  %v2335_v32 = vmul.f32 %v9324_v40, %v9323_v26  ;;  %v7261_v62 = vadd.f32 1.0, %v4316_v16  ;;  %v7264_v36 = vmul.f32 0.5, %v7163_v51  ;;  %v399_v28 = vld [vmem:[%s9133_s3 + $0x508] sm:$0xff]  ;;  %v401_v51 = vld [vmem:[%s9133_s3 + $0x518] sm:$0xff] }
 0x188   :  { %9322 = vst [vmem:[#allocation87_spill] sm:$0xff] %v7252_v54  ;;  %v1784_v0 = vmul.f32 0.70710677, %v769_v15  ;;  %4333 = verf.f32 %v1786_v30  ;;  %v7269_v25 = vpop.f32.mrb[64].mxu1  ;;  %v1789_v6 = vmul.f32 0.70710677, %v7243_v4  ;;  %v2434_v58 = vmul.f32 %v2212_v23, %v7177_v17 }
 0x189   :  { %9325 = vst [vmem:[#allocation28_spill] sm:$0xff] %v7261_v62  ;;  %9326 = vst [vmem:[#allocation7_spill] sm:$0xff] %v7269_v25  ;;  %v4320_v37 = vpop.eup %4319  ;;  %4335 = verf.f32 %v1783_v44  ;;  %2634 = vmatmul.mubr.f32.gmra.mrb[152].mxu0 %v2335_v32  ;;  %v7276_v57 = vpop.f32.mrb[65].mxu0  ;;  %v9329_v16 = vld [vmem:[#allocation6_spill] sm:$0xff]  ;;  %v1791_v40 = vmul.f32 0.70710677, %v7250_v39  ;;  %v2433_v17 = vmul.f32 %v2211_v45, %v7149_v7 }
 0x18a   :  { %9327 = vst [vmem:[#allocation88_spill] sm:$0xff] %v7276_v57  ;;  %v7278_v30 = vpop.f32.mrb[65].mxu1  ;;  %v4322_v26 = vpop.eup %4321  ;;  %v9330_v44 = vld [vmem:[#allocation50_spill] sm:$0xff]  ;;  %v9331_v32 = vld [vmem:[#allocation31_spill] sm:$0xff]  ;;  %v7291_v57 = vadd.f32 1.0, %v4318_v2  ;;  %4337 = verf.f32 %v1785_v52  ;;  %3016 = vmatprep.mubr.f32.mxu1 %v2434_v58  ;;  %v2218_v13 = vadd.f32 1.0, %v4320_v37  ;;  %v3911_v2 = vpack.c.bf16 %v401_v51, %v399_v28 }
 0x18b   :  { %9328 = vst [vmem:[#allocation89_spill] sm:$0xff] %v7278_v30  ;;  %v7284_v47 = vadd.f32 %v9330_v44, %v6085_v5  ;;  %v9332_v62 = vld [vmem:[#allocation11_spill] sm:$0xff]  ;;  %v7289_v54 = vpop.f32.mrb[66].mxu0  ;;  %v4324_v25 = vpop.eup %4323  ;;  %v7293_v30 = vmul.f32 0.5, %v767_v10  ;;  %v1792_v18 = vmul.f32 0.70710677, %v7257_v63  ;;  %4339 = verf.f32 %v1784_v0  ;;  %3017 = vmatmul.mubr.f32.gmra.mrb[110].mxu1 %v2433_v17 }
 0x18c   :  { %v2342_v23 = vmul.f32 %v9332_v62, %v9331_v32  ;;  %9333 = vst [vmem:[#allocation50_spill] sm:$0xff] %v7289_v54  ;;  %9334 = vst [vmem:[#allocation31_spill] sm:$0xff] %v7291_v57  ;;  %v7296_v24 = vpop.f32.mrb[66].mxu1  ;;  %v7298_v44 = vpop.f32.mrb[67].mxu0  ;;  %v9337_v7 = vld [vmem:[#allocation52_spill] sm:$0xff]  ;;  %v7307_v62 = vmul.f32 0.5, %v7225_v59  ;;  %4341 = verf.f32 %v1789_v6  ;;  %v7313_v37 = vadd.f32 %v7016_v43, %v6061_v27  ;;  %3912 = vmatprep.subr.bf16.mxu1 %v3911_v2 }
 0x18d   :  { %9335 = vst [vmem:[#allocation11_spill] sm:$0xff] %v7293_v30  ;;  %9336 = vst [vmem:[#allocation90_spill] sm:$0xff] %v7298_v44  ;;  %v4326_v53 = vpop.eup %4325  ;;  %v7302_v45 = vadd.f32 %v9337_v7, %v6068_v29  ;;  %v7304_v10 = vpop.f32.mrb[67].mxu1  ;;  %v7309_v58 = vmul.f32 0.5, %v769_v15  ;;  %v2217_v0 = vadd.f32 1.0, %v4322_v26  ;;  %4343 = verf.f32 %v1791_v40  ;;  %v398_v59 = vld [vmem:[%s9133_s3 + $0x500] sm:$0xff] }
 0x18e   :  { %2639 = vmatprep.mubr.f32.mxu0 %v2342_v23  ;;  %v4328_v52 = vpop.eup %4327  ;;  %v1790_v32 = vmul.f32 0.70710677, %v7284_v47  ;;  %v7318_v28 = vadd.f32 %v7009_v60, %v6063_v55  ;;  %v400_v15 = vld [vmem:[%s9133_s3 + $0x510] sm:$0xff]  ;;  %v7326_v6 = vadd.f32 1.0, %v4324_v25  ;;  %v2224_v43 = vadd.f32 1.0, %v4326_v53  ;;  %v9342_v7 = vld [vmem:[#allocation30_spill] sm:$0xff] }
 0x18f   :  { %9338 = vst [vmem:[#allocation52_spill] sm:$0xff] %v7309_v58  ;;  %v7329_v51 = vmul.f32 0.5, %v7207_v22  ;;  %4345 = verf.f32 %v1792_v18  ;;  %v7331_v26 = vpop.f32.mrb[68].mxu0  ;;  %v4330_v40 = vpop.eup %4329  ;;  %v7336_v23 = vmul.f32 0.5, %v7243_v4  ;;  %v1795_v17 = vmul.f32 0.70710677, %v7302_v45 }
 0x190   :  { %9339 = vst [vmem:[#allocation91_spill] sm:$0xff] %v7326_v6  ;;  %9340 = vst [vmem:[#allocation92_spill] sm:$0xff] %v7331_v26  ;;  %v7333_v60 = vpop.f32.mrb[68].mxu1  ;;  %v9343_v2 = vld [vmem:[#allocation8_spill] sm:$0xff]  ;;  %v2440_v25 = vmul.f32 %v2218_v13, %v7199_v14  ;;  %v7342_v53 = vpop.f32.mrb[69].mxu0  ;;  %v7346_v58 = vadd.f32 1.0, %v4328_v52  ;;  %v3913_v6 = vpack.c.bf16 %v400_v15, %v398_v59  ;;  %4347 = verf.f32 %v1790_v32 }
 0x191   :  { %9341 = vst [vmem:[#allocation93_spill] sm:$0xff] %v7336_v23  ;;  %v2341_v30 = vmul.f32 %v9343_v2, %v9342_v7  ;;  %v7344_v22 = vpop.f32.mrb[69].mxu1  ;;  %v4332_v18 = vpop.eup %4331  ;;  %v1798_v57 = vmul.f32 0.70710677, %v7313_v37  ;;  %v9345_v26 = vld [vmem:[#allocation34_spill] sm:$0xff]  ;;  %v9346_v4 = vld [vmem:[#allocation12_spill] sm:$0xff]  ;;  %v2439_v13 = vmul.f32 %v2217_v0, %v7181_v41  ;;  %v785_v15 = vadd.f32 %v7037_v34, %v6068_v29 }
 0x192   :  { %9344 = vst [vmem:[#allocation30_spill] sm:$0xff] %v7346_v58  ;;  %v2348_v23 = vmul.f32 %v9346_v4, %v9345_v26  ;;  %v4334_v44 = vpop.eup %4333  ;;  %v1797_v54 = vmul.f32 0.70710677, %v7318_v28  ;;  %v9347_v7 = vld [vmem:[#allocation54_spill] sm:$0xff]  ;;  %3022 = vmatprep.mubr.f32.mxu1 %v2440_v25  ;;  %v2223_v58 = vadd.f32 1.0, %v4330_v40  ;;  %v7358_v59 = vmul.f32 0.5, %v7250_v39  ;;  %3914 = vmatpush1.bf16.msra.mxu1 %v3913_v6 }
 0x193   :  { %v781_v14 = vadd.f32 %v9347_v7, %v6085_v5  ;;  %2640 = vmatmul.mubr.f32.gmra.mrb[154].mxu0 %v2341_v30  ;;  %v7355_v2 = vpop.f32.mrb[70].mxu0  ;;  %v4336_v52 = vpop.eup %4335  ;;  %v2446_v32 = vmul.f32 %v2224_v43, %v7264_v36  ;;  %v7368_v41 = vmul.f32 0.5, %v7284_v47  ;;  %v7371_v0 = vmul.f32 0.5, %v7257_v63  ;;  %3023 = vmatmul.mubr.f32.gmra.mrb[112].mxu1 %v2439_v13  ;;  %v9351_v39 = vld [vmem:[#allocation33_spill] sm:$0xff] }
 0x194   :  { %9348 = vst [vmem:[#allocation8_spill] sm:$0xff] %v7355_v2  ;;  %2645 = vmatprep.mubr.f32.mxu0 %v2348_v23  ;;  %v7363_v26 = vpop.f32.mrb[70].mxu1  ;;  %v7365_v30 = vpop.f32.mrb[71].mxu0  ;;  %4349 = verf.f32 %v1795_v17  ;;  %v9352_v40 = vld [vmem:[#allocation13_spill] sm:$0xff]  ;;  %v7377_v23 = vadd.f32 1.0, %v4332_v18  ;;  %v2230_v36 = vadd.f32 1.0, %v4334_v44  ;;  %v1072_v17 = vadd.f32 %v7039_v12, %v6063_v55 }
 0x195   :  { %9349 = vst [vmem:[#allocation34_spill] sm:$0xff] %v7365_v30  ;;  %9350 = vst [vmem:[#allocation12_spill] sm:$0xff] %v7368_v41  ;;  %v2347_v25 = vmul.f32 %v9352_v40, %v9351_v39  ;;  %v7375_v34 = vpop.f32.mrb[71].mxu1  ;;  %v4338_v6 = vpop.eup %4337  ;;  %4351 = verf.f32 %v1798_v57  ;;  %3028 = vmatprep.mubr.f32.mxu1 %v2446_v32  ;;  %v7381_v4 = vmul.f32 0.5, %v7302_v45  ;;  %v1796_v63 = vmul.f32 0.70710677, %v781_v14 }
 0x196   :  { %9353 = vst [vmem:[#allocation54_spill] sm:$0xff] %v7377_v23  ;;  %v4340_v47 = vpop.eup %4339  ;;  %4353 = verf.f32 %v1797_v54  ;;  %v1801_v18 = vmul.f32 0.70710677, %v785_v15  ;;  %v9356_v44 = vld [vmem:[#allocation59_spill] sm:$0xff]  ;;  %v2445_v43 = vmul.f32 %v2223_v58, %v7217_v31  ;;  %v7399_v12 = vmul.f32 0.5, %v7318_v28  ;;  %v9363_v58 = vld [vmem:[#allocation9_spill] sm:$0xff] }
 0x197   :  { %9354 = vst [vmem:[#allocation33_spill] sm:$0xff] %v7381_v4  ;;  %2646 = vmatmul.mubr.f32.gmra.mrb[156].mxu0 %v2347_v25  ;;  %v7385_v7 = vpop.f32.mrb[72].mxu0  ;;  %v4342_v13 = vpop.eup %4341  ;;  %v1074_v57 = vadd.f32 %v9356_v44, %v6061_v27  ;;  %v9357_v32 = vld [vmem:[#allocation3_spill] sm:$0xff]  ;;  %v7396_v4 = vadd.f32 1.0, %v4336_v52  ;;  %v7401_v25 = vmul.f32 0.5, %v781_v14  ;;  %v7408_v31 = vmul.f32 0.5, %v7313_v37 }
 0x198   :  { %9355 = vst [vmem:[#allocation13_spill] sm:$0xff] %v7385_v7  ;;  %v9358_v39 = vld [vmem:[#allocation15_spill] sm:$0xff]  ;;  %v7392_v45 = vpop.f32.mrb[72].mxu1  ;;  %v7394_v54 = vpop.f32.mrb[73].mxu0  ;;  %v9362_v7 = vld [vmem:[#allocation58_spill] sm:$0xff]  ;;  %3029 = vmatmul.mubr.f32.gmra.mrb[114].mxu1 %v2445_v43  ;;  %v2452_v28 = vmul.f32 %v2230_v36, %v7329_v51  ;;  %v7415_v14 = vadd.f32 1.0, %v4342_v13  ;;  %4355 = verf.f32 %v1796_v63 }
 0x199   :  { %v2354_v40 = vmul.f32 %v9358_v39, %v9357_v32  ;;  %9359 = vst [vmem:[#allocation59_spill] sm:$0xff] %v7394_v54  ;;  %v4344_v30 = vpop.eup %4343  ;;  %9360 = vst [vmem:[#allocation3_spill] sm:$0xff] %v7396_v4  ;;  %v787_v44 = vadd.f32 %v9362_v7, %v6085_v5  ;;  %v7405_v41 = vpop.f32.mrb[73].mxu1  ;;  %v2229_v39 = vadd.f32 1.0, %v4338_v6  ;;  %v9364_v52 = vld [vmem:[#allocation14_spill] sm:$0xff]  ;;  %v7413_v4 = vadd.f32 1.0, %v4340_v47 }
 0x19a   :  { %9361 = vst [vmem:[#allocation15_spill] sm:$0xff] %v7401_v25  ;;  %v4346_v32 = vpop.eup %4345  ;;  %v2353_v54 = vmul.f32 %v9364_v52, %v9363_v58  ;;  %9366 = vst [vmem:[#allocation9_spill] sm:$0xff] %v7415_v14  ;;  %v791_v7 = vadd.f32 %v7061_v38, %v6068_v29  ;;  %v403_v37 = vld [vmem:[%s9133_s3 + $0x528] sm:$0xff]  ;;  %v405_v6 = vld [vmem:[%s9133_s3 + $0x538] sm:$0xff]  ;;  %4357 = verf.f32 %v1801_v18  ;;  %v7429_v51 = vmul.f32 0.5, %v1072_v17  ;;  %3034 = vmatprep.mubr.f32.mxu1 %v2452_v28 }
 0x19b   :  { %2651 = vmatprep.mubr.f32.mxu0 %v2354_v40  ;;  %9365 = vst [vmem:[#allocation58_spill] sm:$0xff] %v7413_v4  ;;  %v7425_v43 = vpop.f32.mrb[74].mxu0  ;;  %v7427_v40 = vmul.f32 0.5, %v785_v15  ;;  %v1804_v36 = vmul.f32 0.70710677, %v1074_v57  ;;  %v402_v38 = vld [vmem:[%s9133_s3 + $0x520] sm:$0xff]  ;;  %v4348_v63 = vpop.eup %4347  ;;  %v2451_v2 = vmul.f32 %v2229_v39, %v7307_v62 }
 0x19c   :  { %9367 = vst [vmem:[#allocation14_spill] sm:$0xff] %v7425_v43  ;;  %2652 = vmatmul.mubr.f32.gmra.mrb[158].mxu0 %v2353_v54  ;;  %v404_v47 = vld [vmem:[%s9133_s3 + $0x530] sm:$0xff]  ;;  %v2235_v13 = vadd.f32 1.0, %v4344_v30  ;;  %v2236_v58 = vadd.f32 1.0, %v4346_v32  ;;  %v1803_v52 = vmul.f32 0.70710677, %v1072_v17  ;;  %v1080_v54 = vadd.f32 %v7073_v33, %v6061_v27 }
 0x19d   :  { %9368 = vst [vmem:[#allocation94_spill] sm:$0xff] %v7427_v40  ;;  %v7437_v15 = vmul.f32 0.5, %v787_v44  ;;  %v7439_v18 = vpop.f32.mrb[75].mxu0  ;;  %v1802_v40 = vmul.f32 0.70710677, %v787_v44  ;;  %v9371_v28 = vld [vmem:[#allocation4_spill] sm:$0xff]  ;;  %v1078_v30 = vadd.f32 %v7063_v8, %v6063_v55  ;;  %v3915_v32 = vpack.c.bf16 %v405_v6, %v403_v37  ;;  %3035 = vmatmul.mubr.f32.gmra.mrb[116].mxu1 %v2451_v2 }
 0x19e   :  { %9370 = vst [vmem:[#allocation96_spill] sm:$0xff] %v7439_v18  ;;  %v9372_v25 = vld [vmem:[#allocation19_spill] sm:$0xff]  ;;  %v4350_v4 = vpop.eup %4349  ;;  %v1807_v23 = vmul.f32 0.70710677, %v791_v7  ;;  %v3917_v17 = vpack.c.bf16 %v404_v47, %v402_v38  ;;  %v7450_v18 = vadd.f32 1.0, %v4348_v63  ;;  %v7452_v44 = vmul.f32 0.5, %v1074_v57 }
 0x19f   :  { %9369 = vst [vmem:[#allocation95_spill] sm:$0xff] %v7437_v15  ;;  %v2360_v14 = vmul.f32 %v9372_v25, %v9371_v28  ;;  %v7448_v43 = vpop.f32.mrb[76].mxu0  ;;  %v4352_v15 = vpop.eup %4351  ;;  %4359 = verf.f32 %v1804_v36  ;;  %v793_v33 = vadd.f32 %v7071_v61, %v6085_v5  ;;  %v797_v8 = vadd.f32 %v7083_v48, %v6068_v29  ;;  %3916 = vmatprep.subr.bf16.mxu1 %v3915_v32  ;;  %v9373_v39 = vld [vmem:[#allocation10_spill] sm:$0xff]  ;;  %v9374_v37 = vld [vmem:[#allocation20_spill] sm:$0xff] }
 0x1a0   :  { %v7456_v62 = vpop.f32.mrb[77].mxu0  ;;  %v4354_v25 = vpop.eup %4353  ;;  %4361 = verf.f32 %v1803_v52  ;;  %v2359_v6 = vmul.f32 %v9374_v37, %v9373_v39  ;;  %v2458_v57 = vmul.f32 %v2236_v58, %v7371_v0  ;;  %v7463_v38 = vadd.f32 1.0, %v4350_v4  ;;  %3918 = vmatpush1.bf16.msra.mxu1 %v3917_v17  ;;  %v9378_v58 = vld [vmem:[#allocation23_spill] sm:$0xff]  ;;  %v9379_v28 = vld [vmem:[#allocation66_spill] sm:$0xff] }
 0x1a1   :  { %2657 = vmatprep.mubr.f32.mxu0 %v2360_v14  ;;  %4363 = verf.f32 %v1802_v40  ;;  %v1810_v36 = vmul.f32 0.70710677, %v1080_v54  ;;  %v1084_v61 = vadd.f32 %v7087_v11, %v6063_v55  ;;  %v2242_v2 = vadd.f32 1.0, %v4352_v15  ;;  %v9377_v40 = vld [vmem:[#allocation16_spill] sm:$0xff] }
 0x1a2   :  { %9375 = vst [vmem:[#allocation4_spill] sm:$0xff] %v7463_v38  ;;  %v7467_v14 = vmul.f32 0.5, %v791_v7  ;;  %4365 = verf.f32 %v1807_v23  ;;  %v1809_v47 = vmul.f32 0.70710677, %v1078_v30  ;;  %2658 = vmatmul.mubr.f32.gmra.mrb[160].mxu0 %v2359_v6  ;;  %3040 = vmatprep.mubr.f32.mxu1 %v2458_v57  ;;  %v7471_v63 = vmul.f32 0.5, %v1078_v30  ;;  %v4356_v7 = vpop.eup %4355  ;;  %v9382_v57 = vld [vmem:[#allocation21_spill] sm:$0xff] }
 0x1a3   :  { %v7469_v48 = vpop.f32.mrb[78].mxu0  ;;  %v1808_v0 = vmul.f32 0.70710677, %v793_v33  ;;  %v7475_v4 = vadd.f32 %v7100_v46, %v6061_v27  ;;  %v2366_v11 = vmul.f32 %v9378_v58, %v9377_v40  ;;  %v2241_v15 = vadd.f32 1.0, %v4354_v25  ;;  %v9381_v25 = vld [vmem:[#allocation5_spill] sm:$0xff] }
 0x1a4   :  { %9376 = vst [vmem:[#allocation19_spill] sm:$0xff] %v7467_v14  ;;  %v7479_v52 = vpop.f32.mrb[79].mxu0  ;;  %v1813_v23 = vmul.f32 0.70710677, %v797_v8  ;;  %v799_v32 = vadd.f32 %v9379_v28, %v6085_v5  ;;  %v2457_v17 = vmul.f32 %v2235_v13, %v7358_v59  ;;  %v4358_v30 = vpop.eup %4357  ;;  %v7484_v39 = vmul.f32 0.5, %v793_v33  ;;  %v407_v13 = vld [vmem:[%s9133_s3 + $0x548] sm:$0xff] }
 0x1a5   :  { %4367 = verf.f32 %v1810_v36  ;;  %v1815_v37 = vmul.f32 0.70710677, %v1084_v61  ;;  %v803_v46 = vadd.f32 %v7112_v35, %v6068_v29  ;;  %2663 = vmatprep.mubr.f32.mxu0 %v2366_v11  ;;  %v7490_v6 = vadd.f32 %v7126_v19, %v6061_v27 }
 0x1a6   :  { %9380 = vst [vmem:[#allocation10_spill] sm:$0xff] %v7484_v39  ;;  %4369 = verf.f32 %v1809_v47  ;;  %3041 = vmatmul.mubr.f32.gmra.mrb[118].mxu1 %v2457_v17  ;;  %v2365_v40 = vmul.f32 %v9382_v57, %v9381_v25  ;;  %v2464_v59 = vmul.f32 %v2242_v2, %v7408_v31  ;;  %v7500_v36 = vadd.f32 1.0, %v4356_v7  ;;  %v409_v47 = vld [vmem:[%s9133_s3 + $0x558] sm:$0xff]  ;;  %v9386_v17 = vld [vmem:[#allocation71_spill] sm:$0xff]  ;;  %v9388_v25 = vld [vmem:[#allocation38_spill] sm:$0xff] }
 0x1a7   :  { %v7498_v33 = vpop.f32.mrb[80].mxu0  ;;  %4371 = verf.f32 %v1808_v0  ;;  %v7502_v35 = vmul.f32 0.5, %v1080_v54  ;;  %v1816_v19 = vmul.f32 0.70710677, %v7475_v4  ;;  %v7510_v31 = vadd.f32 1.0, %v4358_v30  ;;  %v406_v54 = vld [vmem:[%s9133_s3 + $0x540] sm:$0xff] }
 0x1a8   :  { %9383 = vst [vmem:[#allocation20_spill] sm:$0xff] %v7500_v36  ;;  %v7508_v58 = vpop.f32.mrb[81].mxu0  ;;  %v7512_v2 = vmul.f32 0.5, %v797_v8  ;;  %4373 = verf.f32 %v1813_v23  ;;  %v1814_v11 = vmul.f32 0.70710677, %v799_v32  ;;  %2664 = vmatmul.mubr.f32.gmra.mrb[162].mxu0 %v2365_v40  ;;  %3046 = vmatprep.mubr.f32.mxu1 %v2464_v59  ;;  %v408_v0 = vld [vmem:[%s9133_s3 + $0x550] sm:$0xff]  ;;  %v1090_v30 = vadd.f32 %v9386_v17, %v6063_v55 }
 0x1a9   :  { %9384 = vst [vmem:[#allocation16_spill] sm:$0xff] %v7510_v31  ;;  %v4360_v7 = vpop.eup %4359  ;;  %4375 = verf.f32 %v1815_v37  ;;  %v1819_v28 = vmul.f32 0.70710677, %v803_v46  ;;  %v9387_v8 = vld [vmem:[#allocation17_spill] sm:$0xff]  ;;  %v9389_v40 = vld [vmem:[#allocation72_spill] sm:$0xff]  ;;  %v2463_v14 = vmul.f32 %v2241_v15, %v7399_v12  ;;  %v3919_v39 = vpack.c.bf16 %v409_v47, %v407_v13  ;;  %v9390_v15 = vld [vmem:[#allocation18_spill] sm:$0xff] }
 0x1aa   :  { %9385 = vst [vmem:[#allocation23_spill] sm:$0xff] %v7512_v2  ;;  %v2372_v23 = vmul.f32 %v9388_v25, %v9387_v8  ;;  %v4362_v57 = vpop.eup %4361  ;;  %v805_v59 = vadd.f32 %v9389_v40, %v6085_v5  ;;  %v1822_v2 = vmul.f32 0.70710677, %v7490_v6  ;;  %v7530_v37 = vmul.f32 0.5, %v1084_v61  ;;  %v9391_v61 = vld [vmem:[#allocation37_spill] sm:$0xff] }
 0x1ab   :  { %v7528_v31 = vpop.f32.mrb[82].mxu0  ;;  %v4364_v38 = vpop.eup %4363  ;;  %4377 = verf.f32 %v1816_v19  ;;  %v809_v17 = vadd.f32 %v7136_v1, %v6068_v29  ;;  %v3921_v8 = vpack.c.bf16 %v408_v0, %v406_v54  ;;  %v2248_v40 = vadd.f32 1.0, %v4360_v7  ;;  %3047 = vmatmul.mubr.f32.gmra.mrb[120].mxu1 %v2463_v14  ;;  %3920 = vmatprep.subr.bf16.mxu1 %v3919_v39 }
 0x1ac   :  { %2669 = vmatprep.mubr.f32.mxu0 %v2372_v23  ;;  %v7534_v25 = vpop.f32.mrb[83].mxu0  ;;  %v4366_v36 = vpop.eup %4365  ;;  %4379 = verf.f32 %v1814_v11  ;;  %v7538_v12 = vadd.f32 %v7153_v49, %v6061_v27  ;;  %v2371_v13 = vmul.f32 %v9391_v61, %v9390_v15  ;;  %v2247_v19 = vadd.f32 1.0, %v4362_v57  ;;  %v9396_v57 = vld [vmem:[#allocation24_spill] sm:$0xff] }
 0x1ad   :  { %v7542_v47 = vmul.f32 0.5, %v799_v32  ;;  %4381 = verf.f32 %v1819_v28  ;;  %v1821_v1 = vmul.f32 0.70710677, %v1090_v30  ;;  %3922 = vmatpush1.bf16.msra.mxu1 %v3921_v8  ;;  %v7544_v54 = vadd.f32 1.0, %v4364_v38  ;;  %v9397_v8 = vld [vmem:[#allocation42_spill] sm:$0xff] }
 0x1ae   :  { %v7547_v0 = vmul.f32 0.5, %v7475_v4  ;;  %v1820_v11 = vmul.f32 0.70710677, %v805_v59  ;;  %4383 = verf.f32 %v1822_v2  ;;  %2670 = vmatmul.mubr.f32.gmra.mrb[164].mxu0 %v2371_v13  ;;  %v7549_v14 = vadd.f32 1.0, %v4366_v36 }
 0x1af   :  { %9392 = vst [vmem:[#allocation66_spill] sm:$0xff] %v7542_v47  ;;  %9393 = vst [vmem:[#allocation5_spill] sm:$0xff] %v7544_v54  ;;  %v4368_v49 = vpop.eup %4367  ;;  %v7551_v39 = vmul.f32 0.5, %v803_v46  ;;  %v1825_v7 = vmul.f32 0.70710677, %v809_v17  ;;  %v1096_v32 = vadd.f32 %v7143_v20, %v6063_v55  ;;  %v7555_v28 = vpop.f32.mrb[84].mxu0  ;;  %v811_v38 = vadd.f32 %v7145_v9, %v6085_v5 }
 0x1b0   :  { %9394 = vst [vmem:[#allocation21_spill] sm:$0xff] %v7549_v14  ;;  %v4370_v23 = vpop.eup %4369  ;;  %v1828_v4 = vmul.f32 0.70710677, %v7538_v12  ;;  %v2470_v2 = vmul.f32 %v2248_v40, %v7452_v44  ;;  %v2378_v36 = vmul.f32 %v9397_v8, %v9396_v57  ;;  %v7563_v15 = vpop.f32.mrb[85].mxu0  ;;  %v7565_v61 = vmul.f32 0.5, %v1090_v30  ;;  %v9399_v44 = vld [vmem:[#allocation22_spill] sm:$0xff] }
 0x1b1   :  { %9395 = vst [vmem:[#allocation71_spill] sm:$0xff] %v7551_v39  ;;  %v4372_v46 = vpop.eup %4371  ;;  %4385 = verf.f32 %v1821_v1  ;;  %v7567_v20 = vmul.f32 0.5, %v805_v59  ;;  %v2469_v13 = vmul.f32 %v2247_v19, %v7429_v51  ;;  %v2254_v47 = vadd.f32 1.0, %v4368_v49  ;;  %v9400_v40 = vld [vmem:[#allocation39_spill] sm:$0xff] }
 0x1b2   :  { %v4374_v39 = vpop.eup %4373  ;;  %4387 = verf.f32 %v1820_v11  ;;  %v815_v9 = vadd.f32 %v7166_v21, %v6068_v29  ;;  %3052 = vmatprep.mubr.f32.mxu1 %v2470_v2  ;;  %2675 = vmatprep.mubr.f32.mxu0 %v2378_v36  ;;  %v2377_v57 = vmul.f32 %v9400_v40, %v9399_v44  ;;  %v2253_v14 = vadd.f32 1.0, %v4370_v23  ;;  %v411_v36 = vld [vmem:[%s9133_s3 + $0x568] sm:$0xff] }
 0x1b3   :  { %9398 = vst [vmem:[#allocation17_spill] sm:$0xff] %v7567_v20  ;;  %v7574_v8 = vpop.f32.mrb[86].mxu0  ;;  %v4376_v30 = vpop.eup %4375  ;;  %4389 = verf.f32 %v1825_v7  ;;  %v1827_v59 = vmul.f32 0.70710677, %v1096_v32  ;;  %v7578_v51 = vadd.f32 %v7187_v3, %v6061_v27  ;;  %3053 = vmatmul.mubr.f32.gmra.mrb[122].mxu1 %v2469_v13  ;;  %v7582_v1 = vadd.f32 1.0, %v4372_v46  ;;  %v9405_v13 = vld [vmem:[#allocation36_spill] sm:$0xff] }
 0x1b4   :  { %v7580_v19 = vpop.f32.mrb[87].mxu0  ;;  %v7585_v21 = vmul.f32 0.5, %v7490_v6  ;;  %v1826_v11 = vmul.f32 0.70710677, %v811_v38  ;;  %4391 = verf.f32 %v1828_v4  ;;  %2676 = vmatmul.mubr.f32.gmra.mrb[166].mxu0 %v2377_v57  ;;  %v7587_v2 = vadd.f32 1.0, %v4374_v39  ;;  %v413_v6 = vld [vmem:[%s9133_s3 + $0x578] sm:$0xff] }
 0x1b5   :  { %9401 = vst [vmem:[#allocation38_spill] sm:$0xff] %v7582_v1  ;;  %v4378_v49 = vpop.eup %4377  ;;  %v7589_v7 = vmul.f32 0.5, %v809_v17  ;;  %v7591_v23 = vmul.f32 0.5, %v1096_v32  ;;  %v7593_v3 = vmul.f32 0.5, %v811_v38  ;;  %v1831_v4 = vmul.f32 0.70710677, %v815_v9 }
 0x1b6   :  { %9402 = vst [vmem:[#allocation72_spill] sm:$0xff] %v7587_v2  ;;  %v4380_v46 = vpop.eup %4379  ;;  %v1102_v39 = vadd.f32 %v7172_v42, %v6063_v55  ;;  %v2476_v17 = vmul.f32 %v2254_v47, %v7502_v35  ;;  %v9406_v32 = vld [vmem:[#allocation47_spill] sm:$0xff]  ;;  %4393 = verf.f32 %v1827_v59  ;;  %v817_v57 = vadd.f32 %v7185_v56, %v6085_v5 }
 0x1b7   :  { %9403 = vst [vmem:[#allocation18_spill] sm:$0xff] %v7589_v7  ;;  %9404 = vst [vmem:[#allocation37_spill] sm:$0xff] %v7593_v3  ;;  %v2384_v44 = vmul.f32 %v9406_v32, %v9405_v13  ;;  %v7606_v38 = vpop.f32.mrb[88].mxu0  ;;  %v4382_v40 = vpop.eup %4381  ;;  %v1834_v7 = vmul.f32 0.70710677, %v7578_v51  ;;  %v2475_v3 = vmul.f32 %v2253_v14, %v7471_v63  ;;  %v2260_v42 = vadd.f32 1.0, %v4378_v49 }
 0x1b8   :  { %9407 = vst [vmem:[#allocation24_spill] sm:$0xff] %v7606_v38  ;;  %v7612_v20 = vpop.f32.mrb[89].mxu0  ;;  %v4384_v2 = vpop.eup %4383  ;;  %4395 = verf.f32 %v1826_v11  ;;  %v821_v35 = vadd.f32 %v7195_v50, %v6068_v29  ;;  %3058 = vmatprep.mubr.f32.mxu1 %v2476_v17  ;;  %v3923_v47 = vpack.c.bf16 %v413_v6, %v411_v36  ;;  %v2259_v13 = vadd.f32 1.0, %v4376_v30  ;;  %v9410_v32 = vld [vmem:[#allocation82_spill] sm:$0xff]  ;;  %v412_v50 = vld [vmem:[%s9133_s3 + $0x570] sm:$0xff]  ;;  %v9414_v17 = vld [vmem:[#allocation35_spill] sm:$0xff] }
 0x1b9   :  { %9408 = vst [vmem:[#allocation42_spill] sm:$0xff] %v7612_v20  ;;  %2681 = vmatprep.mubr.f32.mxu0 %v2384_v44  ;;  %v7616_v59 = vadd.f32 1.0, %v4380_v46  ;;  %v7619_v56 = vmul.f32 0.5, %v7538_v12  ;;  %v7623_v63 = vadd.f32 %v9410_v32, %v6061_v27  ;;  %3059 = vmatmul.mubr.f32.gmra.mrb[124].mxu1 %v2475_v3  ;;  %v410_v14 = vld [vmem:[%s9133_s3 + $0x560] sm:$0xff]  ;;  %v7631_v11 = vadd.f32 1.0, %v4382_v40  ;;  %v9412_v12 = vld [vmem:[#allocation43_spill] sm:$0xff] }
 0x1ba   :  { %4397 = verf.f32 %v1831_v4  ;;  %v1833_v30 = vmul.f32 0.70710677, %v1102_v39  ;;  %v1108_v49 = vadd.f32 %v9412_v12, %v6063_v55  ;;  %3924 = vmatprep.subr.bf16.mxu1 %v3923_v47  ;;  %v2266_v3 = vadd.f32 1.0, %v4384_v2  ;;  %v9415_v44 = vld [vmem:[#allocation45_spill] sm:$0xff] }
 0x1bb   :  { %9409 = vst [vmem:[#allocation22_spill] sm:$0xff] %v7616_v59  ;;  %9411 = vst [vmem:[#allocation39_spill] sm:$0xff] %v7631_v11  ;;  %v7635_v36 = vpop.f32.mrb[90].mxu0  ;;  %v4386_v6 = vpop.eup %4385  ;;  %v1832_v46 = vmul.f32 0.70710677, %v817_v57  ;;  %4399 = verf.f32 %v1834_v7  ;;  %v2383_v32 = vmul.f32 %v9415_v44, %v9414_v17  ;;  %v7641_v40 = vmul.f32 0.5, %v815_v9 }
 0x1bc   :  { %9413 = vst [vmem:[#allocation36_spill] sm:$0xff] %v7635_v36  ;;  %v7639_v59 = vpop.f32.mrb[91].mxu0  ;;  %v4388_v1 = vpop.eup %4387  ;;  %v1837_v4 = vmul.f32 0.70710677, %v821_v35  ;;  %v2482_v11 = vmul.f32 %v2260_v42, %v7547_v0  ;;  %v3925_v54 = vpack.c.bf16 %v412_v50, %v410_v14  ;;  %v7644_v47 = vmul.f32 0.5, %v1102_v39  ;;  %v9418_v2 = vld [vmem:[#allocation41_spill] sm:$0xff] }
 0x1bd   :  { %9416 = vst [vmem:[#allocation47_spill] sm:$0xff] %v7639_v59  ;;  %9417 = vst [vmem:[#allocation82_spill] sm:$0xff] %v7641_v40  ;;  %v4390_v12 = vpop.eup %4389  ;;  %v1840_v36 = vmul.f32 0.70710677, %v7623_v63  ;;  %2682 = vmatmul.mubr.f32.gmra.mrb[168].mxu0 %v2383_v32  ;;  %v9419_v7 = vld [vmem:[#allocation53_spill] sm:$0xff]  ;;  %v2481_v17 = vmul.f32 %v2259_v13, %v7530_v37  ;;  %v2265_v59 = vadd.f32 1.0, %v4386_v6  ;;  %4401 = verf.f32 %v1833_v30 }
 0x1be   :  { %v2390_v20 = vmul.f32 %v9419_v7, %v9418_v2  ;;  %v4392_v44 = vpop.eup %4391  ;;  %v1839_v9 = vmul.f32 0.70710677, %v1108_v49  ;;  %v9420_v40 = vld [vmem:[#allocation81_spill] sm:$0xff]  ;;  %3064 = vmatprep.mubr.f32.mxu1 %v2482_v11  ;;  %3926 = vmatpush1.bf16.msra.mxu1 %v3925_v54  ;;  %4403 = verf.f32 %v1832_v46  ;;  %v9421_v39 = vld [vmem:[#allocation86_spill] sm:$0xff]  ;;  %v9422_v14 = vld [vmem:[#allocation40_spill] sm:$0xff]  ;;  %v2488_v13 = vmul.f32 %v2266_v3, %v7585_v21 }
 0x1bf   :  { %v823_v38 = vadd.f32 %v9420_v40, %v6085_v5  ;;  %v7652_v0 = vpop.f32.mrb[92].mxu0  ;;  %v827_v42 = vadd.f32 %v9421_v39, %v6068_v29  ;;  %3065 = vmatmul.mubr.f32.gmra.mrb[126].mxu1 %v2481_v17  ;;  %v9423_v50 = vld [vmem:[#allocation49_spill] sm:$0xff]  ;;  %v7661_v6 = vadd.f32 1.0, %v4388_v1  ;;  %v7663_v32 = vmul.f32 0.5, %v817_v57  ;;  %v9426_v54 = vld [vmem:[#allocation26_spill] sm:$0xff] }
 0x1c0   :  { %2687 = vmatprep.mubr.f32.mxu0 %v2390_v20  ;;  %v2389_v37 = vmul.f32 %v9423_v50, %v9422_v14  ;;  %v7659_v30 = vpop.f32.mrb[93].mxu0  ;;  %4405 = verf.f32 %v1837_v4  ;;  %v1114_v11 = vadd.f32 %v9426_v54, %v6063_v55  ;;  %v4394_v46 = vpop.eup %4393  ;;  %v7667_v40 = vadd.f32 1.0, %v4390_v12  ;;  %3070 = vmatprep.mubr.f32.mxu1 %v2488_v13  ;;  %v9429_v57 = vld [vmem:[#allocation29_spill] sm:$0xff]  ;;  %v9430_v12 = vld [vmem:[#allocation32_spill] sm:$0xff]  ;;  %v9431_v39 = vld [vmem:[#allocation46_spill] sm:$0xff] }
 0x1c1   :  { %9424 = vst [vmem:[#allocation43_spill] sm:$0xff] %v7661_v6  ;;  %9425 = vst [vmem:[#allocation35_spill] sm:$0xff] %v7663_v32  ;;  %v2272_v20 = vadd.f32 1.0, %v4392_v44  ;;  %v7670_v2 = vmul.f32 0.5, %v7578_v51  ;;  %4407 = verf.f32 %v1840_v36  ;;  %v7672_v3 = vmul.f32 0.5, %v821_v35  ;;  %v9432_v51 = vld [vmem:[#allocation60_spill] sm:$0xff] }
 0x1c2   :  { %9427 = vst [vmem:[#allocation45_spill] sm:$0xff] %v7667_v40  ;;  %2688 = vmatmul.mubr.f32.gmra.mrb[170].mxu0 %v2389_v37  ;;  %v4396_v21 = vpop.eup %4395  ;;  %4409 = verf.f32 %v1839_v9  ;;  %v1838_v1 = vmul.f32 0.70710677, %v823_v38  ;;  %v1116_v4 = vadd.f32 %v9429_v57, %v6061_v27  ;;  %v1843_v17 = vmul.f32 0.70710677, %v827_v42  ;;  %v9435_v32 = vld [vmem:[#allocation89_spill] sm:$0xff] }
 0x1c3   :  { %9428 = vst [vmem:[#allocation41_spill] sm:$0xff] %v7672_v3  ;;  %v7676_v7 = vpop.f32.mrb[94].mxu0  ;;  %v829_v44 = vadd.f32 %v9430_v12, %v6085_v5  ;;  %v2396_v14 = vmul.f32 %v9432_v51, %v9431_v39  ;;  %v2487_v36 = vmul.f32 %v2265_v59, %v7565_v61  ;;  %v2271_v37 = vadd.f32 1.0, %v4394_v46  ;;  %v9436_v39 = vld [vmem:[#allocation44_spill] sm:$0xff]  ;;  %v9437_v61 = vld [vmem:[#allocation57_spill] sm:$0xff]  ;;  %v9445_v40 = vld [vmem:[#allocation51_spill] sm:$0xff] }
 0x1c4   :  { %v7683_v50 = vpop.f32.mrb[95].mxu0  ;;  %v4398_v35 = vpop.eup %4397  ;;  %v7685_v9 = vmul.f32 0.5, %v1108_v49  ;;  %v7687_v13 = vmul.f32 0.5, %v823_v38  ;;  %v1845_v54 = vmul.f32 0.70710677, %v1114_v11  ;;  %v7689_v3 = vadd.f32 1.0, %v4396_v21 }
 0x1c5   :  { %v4400_v57 = vpop.eup %4399  ;;  %v7693_v12 = vadd.f32 %v9435_v32, %v6061_v27  ;;  %2693 = vmatprep.mubr.f32.mxu0 %v2396_v14  ;;  %3071 = vmatmul.mubr.f32.gmra.mrb[128].mxu1 %v2487_v36  ;;  %v2395_v59 = vmul.f32 %v9437_v61, %v9436_v39  ;;  %v2494_v51 = vmul.f32 %v2272_v20, %v7619_v56  ;;  %v415_v38 = vld [vmem:[%s9133_s3 + $0x588] sm:$0xff]  ;;  %4411 = verf.f32 %v1838_v1  ;;  %v417_v32 = vld [vmem:[%s9133_s3 + $0x598] sm:$0xff] }
 0x1c6   :  { %9433 = vst [vmem:[#allocation53_spill] sm:$0xff] %v7687_v13  ;;  %9434 = vst [vmem:[#allocation81_spill] sm:$0xff] %v7689_v3  ;;  %v7702_v49 = vmul.f32 0.5, %v7623_v63  ;;  %v7704_v46 = vmul.f32 0.5, %v827_v42  ;;  %v1846_v21 = vmul.f32 0.70710677, %v1116_v4  ;;  %4413 = verf.f32 %v1843_v17 }
 0x1c7   :  { %v7709_v14 = vpop.f32.mrb[96].mxu0  ;;  %v7711_v36 = vadd.f32 1.0, %v4398_v35  ;;  %v7713_v56 = vmul.f32 0.5, %v1114_v11  ;;  %v1844_v20 = vmul.f32 0.70710677, %v829_v44  ;;  %2694 = vmatmul.mubr.f32.gmra.mrb[172].mxu0 %v2395_v59  ;;  %3076 = vmatprep.mubr.f32.mxu1 %v2494_v51  ;;  %v414_v63 = vld [vmem:[%s9133_s3 + $0x580] sm:$0xff]  ;;  %v4402_v1 = vpop.eup %4401  ;;  %4415 = verf.f32 %v1845_v54 }
 0x1c8   :  { %9438 = vst [vmem:[#allocation86_spill] sm:$0xff] %v7704_v46  ;;  %9439 = vst [vmem:[#allocation40_spill] sm:$0xff] %v7709_v14  ;;  %v416_v42 = vld [vmem:[%s9133_s3 + $0x590] sm:$0xff]  ;;  %v2278_v39 = vadd.f32 1.0, %v4400_v57  ;;  %v7721_v61 = vmul.f32 0.5, %v829_v44  ;;  %v9442_v17 = vld [vmem:[#allocation7_spill] sm:$0xff]  ;;  %v4404_v59 = vpop.eup %4403  ;;  %4417 = verf.f32 %v1846_v21  ;;  %v7734_v44 = vadd.f32 %v7304_v10, %v6061_v27 }
 0x1c9   :  { %9440 = vst [vmem:[#allocation49_spill] sm:$0xff] %v7711_v36  ;;  %v1120_v11 = vadd.f32 %v9442_v17, %v6063_v55  ;;  %v7725_v35 = vpop.f32.mrb[97].mxu0  ;;  %v9444_v51 = vld [vmem:[#allocation87_spill] sm:$0xff]  ;;  %v1852_v13 = vmul.f32 0.70710677, %v7693_v12  ;;  %v3927_v36 = vpack.c.bf16 %v417_v32, %v415_v38  ;;  %v2493_v54 = vmul.f32 %v2271_v37, %v7591_v23  ;;  %v9448_v38 = vld [vmem:[#allocation88_spill] sm:$0xff] }
 0x1ca   :  { %9441 = vst [vmem:[#allocation26_spill] sm:$0xff] %v7721_v61  ;;  %9443 = vst [vmem:[#allocation29_spill] sm:$0xff] %v7725_v35  ;;  %v833_v46 = vadd.f32 %v9444_v51, %v6068_v29  ;;  %v9446_v3 = vld [vmem:[#allocation63_spill] sm:$0xff]  ;;  %v4406_v14 = vpop.eup %4405  ;;  %v3929_v57 = vpack.c.bf16 %v416_v42, %v414_v63  ;;  %v2277_v35 = vadd.f32 1.0, %v4402_v1  ;;  %4419 = verf.f32 %v1844_v20  ;;  %v9449_v37 = vld [vmem:[#allocation48_spill] sm:$0xff] }
 0x1cb   :  { %v2402_v6 = vmul.f32 %v9446_v3, %v9445_v40  ;;  %v7737_v17 = vpop.f32.mrb[98].mxu0  ;;  %v4408_v61 = vpop.eup %4407  ;;  %v7739_v51 = vmul.f32 0.5, %v1116_v4  ;;  %v835_v32 = vadd.f32 %v9448_v38, %v6085_v5  ;;  %3928 = vmatprep.subr.bf16.mxu1 %v3927_v36  ;;  %v1851_v10 = vmul.f32 0.70710677, %v1120_v11  ;;  %3077 = vmatmul.mubr.f32.gmra.mrb[130].mxu1 %v2493_v54  ;;  %v9450_v21 = vld [vmem:[#allocation61_spill] sm:$0xff] }
 0x1cc   :  { %9447 = vst [vmem:[#allocation32_spill] sm:$0xff] %v7737_v17  ;;  %v7743_v40 = vpop.f32.mrb[99].mxu0  ;;  %v4410_v3 = vpop.eup %4409  ;;  %v7747_v23 = vadd.f32 %v7296_v24, %v6063_v55  ;;  %v2401_v63 = vmul.f32 %v9450_v21, %v9449_v37  ;;  %v2500_v4 = vmul.f32 %v2278_v39, %v7670_v2  ;;  %v7752_v20 = vadd.f32 1.0, %v4404_v59  ;;  %3930 = vmatpush1.bf16.msra.mxu1 %v3929_v57  ;;  %v9456_v57 = vld [vmem:[#allocation69_spill] sm:$0xff] }
 0x1cd   :  { %2699 = vmatprep.mubr.f32.mxu0 %v2402_v6  ;;  %v1849_v42 = vmul.f32 0.70710677, %v833_v46  ;;  %4421 = verf.f32 %v1852_v13  ;;  %v7756_v6 = vadd.f32 %v7344_v22, %v6061_v27  ;;  %v7758_v36 = vadd.f32 1.0, %v4406_v14  ;;  %v9455_v22 = vld [vmem:[#allocation56_spill] sm:$0xff] }
 0x1ce   :  { %9451 = vst [vmem:[#allocation46_spill] sm:$0xff] %v7752_v20  ;;  %v2284_v1 = vadd.f32 1.0, %v4408_v61  ;;  %v1858_v24 = vmul.f32 0.70710677, %v7734_v44  ;;  %v7763_v54 = vadd.f32 %v7333_v60, %v6063_v55  ;;  %2700 = vmatmul.mubr.f32.gmra.mrb[174].mxu0 %v2401_v63  ;;  %3082 = vmatprep.mubr.f32.mxu1 %v2500_v4  ;;  %v7767_v39 = vmul.f32 0.5, %v833_v46  ;;  %v9458_v46 = vld [vmem:[#allocation50_spill] sm:$0xff] }
 0x1cf   :  { %9452 = vst [vmem:[#allocation60_spill] sm:$0xff] %v7758_v36  ;;  %v7765_v2 = vpop.f32.mrb[100].mxu0  ;;  %v7769_v13 = vmul.f32 0.5, %v1120_v11  ;;  %v1850_v59 = vmul.f32 0.70710677, %v835_v32  ;;  %v2408_v14 = vmul.f32 %v9456_v57, %v9455_v22  ;;  %v4412_v61 = vpop.eup %4411  ;;  %v2283_v37 = vadd.f32 1.0, %v4410_v3 }
 0x1d0   :  { %9453 = vst [vmem:[#allocation89_spill] sm:$0xff] %v7765_v2  ;;  %9454 = vst [vmem:[#allocation44_spill] sm:$0xff] %v7767_v39  ;;  %v7773_v38 = vpop.f32.mrb[101].mxu0  ;;  %4423 = verf.f32 %v1851_v10  ;;  %v1857_v60 = vmul.f32 0.70710677, %v7747_v23  ;;  %v2499_v21 = vmul.f32 %v2277_v35, %v7644_v47  ;;  %v4414_v63 = vpop.eup %4413  ;;  %v839_v4 = vadd.f32 %v9458_v46, %v6068_v29  ;;  %v9459_v10 = vld [vmem:[#allocation55_spill] sm:$0xff] }
 0x1d1   :  { %9457 = vst [vmem:[#allocation57_spill] sm:$0xff] %v7773_v38  ;;  %4425 = verf.f32 %v1849_v42  ;;  %v1864_v11 = vmul.f32 0.70710677, %v7756_v6  ;;  %2705 = vmatprep.mubr.f32.mxu0 %v2408_v14  ;;  %v7782_v22 = vadd.f32 %v7375_v34, %v6061_v27  ;;  %v4416_v57 = vpop.eup %4415  ;;  %v1863_v3 = vmul.f32 0.70710677, %v7763_v54  ;;  %v9460_v39 = vld [vmem:[#allocation68_spill] sm:$0xff] }
 0x1d2   :  { %4427 = verf.f32 %v1858_v24  ;;  %3083 = vmatmul.mubr.f32.gmra.mrb[132].mxu1 %v2499_v21  ;;  %v2407_v47 = vmul.f32 %v9460_v39, %v9459_v10  ;;  %v2506_v35 = vmul.f32 %v2284_v1, %v7702_v49  ;;  %v7790_v46 = vadd.f32 1.0, %v4412_v61  ;;  %v9464_v34 = vld [vmem:[#allocation90_spill] sm:$0xff]  ;;  %v419_v24 = vld [vmem:[%s9133_s3 + $0x5a8] sm:$0xff]  ;;  %v421_v39 = vld [vmem:[%s9133_s3 + $0x5b8] sm:$0xff]  ;;  %v4418_v49 = vpop.eup %4417 }
 0x1d3   :  { %v7788_v42 = vpop.f32.mrb[102].mxu0  ;;  %v7792_v36 = vmul.f32 0.5, %v835_v32  ;;  %4429 = verf.f32 %v1850_v59  ;;  %v841_v14 = vadd.f32 %v9464_v34, %v6085_v5  ;;  %v7804_v1 = vadd.f32 1.0, %v4414_v63  ;;  %v418_v61 = vld [vmem:[%s9133_s3 + $0x5a0] sm:$0xff]  ;;  %v420_v10 = vld [vmem:[%s9133_s3 + $0x5b0] sm:$0xff] }
 0x1d4   :  { %9461 = vst [vmem:[#allocation7_spill] sm:$0xff] %v7788_v42  ;;  %9462 = vst [vmem:[#allocation87_spill] sm:$0xff] %v7790_v46  ;;  %v7802_v21 = vpop.f32.mrb[103].mxu0  ;;  %v7807_v32 = vmul.f32 0.5, %v7693_v12  ;;  %4431 = verf.f32 %v1857_v60  ;;  %v7811_v59 = vadd.f32 %v7363_v26, %v6063_v55  ;;  %2706 = vmatmul.mubr.f32.gmra.mrb[176].mxu0 %v2407_v47  ;;  %3088 = vmatprep.mubr.f32.mxu1 %v2506_v35  ;;  %v4420_v63 = vpop.eup %4419  ;;  %v7819_v34 = vmul.f32 0.5, %v839_v4  ;;  %v9468_v60 = vld [vmem:[#allocation64_spill] sm:$0xff] }
 0x1d5   :  { %9463 = vst [vmem:[#allocation51_spill] sm:$0xff] %v7792_v36  ;;  %9465 = vst [vmem:[#allocation63_spill] sm:$0xff] %v7802_v21  ;;  %4433 = verf.f32 %v1864_v11  ;;  %v1870_v12 = vmul.f32 0.70710677, %v7782_v22  ;;  %v9469_v36 = vld [vmem:[#allocation75_spill] sm:$0xff]  ;;  %v2505_v47 = vmul.f32 %v2283_v37, %v7685_v9  ;;  %v3931_v35 = vpack.c.bf16 %v421_v39, %v419_v24  ;;  %v9470_v20 = vld [vmem:[#allocation92_spill] sm:$0xff] }
 0x1d6   :  { %9466 = vst [vmem:[#allocation88_spill] sm:$0xff] %v7804_v1  ;;  %9467 = vst [vmem:[#allocation48_spill] sm:$0xff] %v7819_v34  ;;  %v2414_v26 = vmul.f32 %v9469_v36, %v9468_v60  ;;  %v1855_v1 = vmul.f32 0.70710677, %v839_v4  ;;  %4435 = verf.f32 %v1863_v3  ;;  %v2290_v21 = vadd.f32 1.0, %v4418_v49  ;;  %v9471_v37 = vld [vmem:[#allocation62_spill] sm:$0xff] }
 0x1d7   :  { %v7825_v46 = vpop.f32.mrb[104].mxu0  ;;  %v4422_v42 = vpop.eup %4421  ;;  %v1856_v2 = vmul.f32 0.70710677, %v841_v14  ;;  %v845_v38 = vadd.f32 %v9470_v20, %v6068_v29  ;;  %v3933_v11 = vpack.c.bf16 %v420_v10, %v418_v61  ;;  %v1869_v17 = vmul.f32 0.70710677, %v7811_v59  ;;  %3089 = vmatmul.mubr.f32.gmra.mrb[134].mxu1 %v2505_v47  ;;  %3932 = vmatprep.subr.bf16.mxu1 %v3931_v35  ;;  %v9472_v4 = vld [vmem:[#allocation73_spill] sm:$0xff] }
 0x1d8   :  { %2711 = vmatprep.mubr.f32.mxu0 %v2414_v26  ;;  %v7829_v34 = vpop.f32.mrb[105].mxu0  ;;  %v7834_v9 = vadd.f32 %v7392_v45, %v6063_v55  ;;  %v7838_v36 = vadd.f32 %v7405_v41, %v6061_v27  ;;  %v2413_v3 = vmul.f32 %v9472_v4, %v9471_v37  ;;  %v2289_v20 = vadd.f32 1.0, %v4416_v57  ;;  %v4626_v47 = vld [vmem:[%s9134_s2] sm:$0x3f] }
 0x1d9   :  { %v7843_v24 = vmul.f32 0.5, %v7747_v23  ;;  %v7845_v39 = vmul.f32 0.5, %v841_v14  ;;  %4437 = verf.f32 %v1870_v12  ;;  %3934 = vmatpush1.bf16.msra.mxu1 %v3933_v11  ;;  %v7847_v61 = vadd.f32 1.0, %v4420_v63  ;;  %v9476_v63 = vld [vmem:[#allocation78_spill] sm:$0xff]  ;;  %v423_v11 = vld [vmem:[%s9133_s3 + $0x5c8] sm:$0xff] }
 0x1da   :  { %v4424_v49 = vpop.eup %4423  ;;  %v2296_v55 = vadd.f32 1.0, %v4422_v42  ;;  %4439 = verf.f32 %v1855_v1  ;;  %v7850_v45 = vmul.f32 0.5, %v7734_v44  ;;  %2712 = vmatmul.mubr.f32.gmra.mrb[178].mxu0 %v2413_v3  ;;  %v7852_v41 = vmul.f32 0.5, %v845_v38  ;;  %v9475_v1 = vld [vmem:[#allocation67_spill] sm:$0xff]  ;;  %v9479_v3 = vld [vmem:[#allocation65_spill] sm:$0xff] }
 0x1db   :  { %9473 = vst [vmem:[#allocation61_spill] sm:$0xff] %v7845_v39  ;;  %v4426_v27 = vpop.eup %4425  ;;  %4441 = verf.f32 %v1856_v2  ;;  %v7856_v23 = vadd.f32 %v7342_v53, %v6085_v5  ;;  %v1876_v57 = vmul.f32 0.70710677, %v7838_v36  ;;  %v7859_v14 = vpop.f32.mrb[106].mxu0  ;;  %v1875_v42 = vmul.f32 0.70710677, %v7834_v9 }
 0x1dc   :  { %9474 = vst [vmem:[#allocation56_spill] sm:$0xff] %v7852_v41  ;;  %v4428_v10 = vpop.eup %4427  ;;  %4443 = verf.f32 %v1869_v17  ;;  %v2512_v44 = vmul.f32 %v2290_v21, %v7739_v51  ;;  %v2420_v12 = vmul.f32 %v9476_v63, %v9475_v1  ;;  %v7865_v2 = vpop.f32.mrb[107].mxu0  ;;  %v2295_v26 = vadd.f32 1.0, %v4424_v49  ;;  %v9482_v41 = vld [vmem:[#allocation96_spill] sm:$0xff] }
 0x1dd   :  { %v7867_v60 = vpop.eup %4429  ;;  %v2511_v53 = vmul.f32 %v2289_v20, %v7713_v56  ;;  %v9477_v17 = vsub.s32 4, %v9329_v16  ;;  %v9478_v51 = vsub.s32 5, %v9329_v16  ;;  %v425_v56 = vld [vmem:[%s9133_s3 + $0x5d8] sm:$0xff]  ;;  %v1861_v4 = vmul.f32 0.70710677, %v845_v38 }
 0x1de   :  { %v4432_v37 = vpop.eup %4431  ;;  %4445 = verf.f32 %v1876_v57  ;;  %3094 = vmatprep.mubr.f32.mxu1 %v2512_v44  ;;  %2717 = vmatprep.mubr.f32.mxu0 %v2420_v12  ;;  %v9480_v20 = vld [vmem:[#allocation77_spill] sm:$0xff]  ;;  %v2518_v1 = vmul.f32 %v2296_v55, %v7807_v32  ;;  %v9483_v57 = vld [vmem:[#allocation74_spill] sm:$0xff]  ;;  %v9484_v44 = vld [vmem:[#allocation83_spill] sm:$0xff]  ;;  %v3935_v55 = vpack.c.bf16 %v425_v56, %v423_v11  ;;  %v1641_v11 = vmul.f32 0.5, %v7763_v54 }
 0x1df   :  { %v7875_v35 = vrot.slane %v4626_v47, %v9477_v17  ;;  %v7879_v21 = vrot.slane %v4626_v47, %v9478_v51  ;;  %v2419_v49 = vmul.f32 %v9480_v20, %v9479_v3  ;;  %v7890_v63 = vpop.f32.mrb[108].mxu0  ;;  %v4434_v47 = vpop.eup %4433  ;;  %v2302_v17 = vadd.f32 1.0, %v4428_v10  ;;  %3095 = vmatmul.mubr.f32.gmra.mrb[136].mxu1 %v2511_v53  ;;  %v9481_v51 = vld [vmem:[#allocation14_spill] sm:$0xff] }
 0x1e0   :  { %v2426_v12 = vmul.f32 %v9484_v44, %v9483_v57  ;;  %v7902_v39 = vpop.f32.mrb[109].mxu0  ;;  %v4436_v3 = vpop.eup %4435  ;;  %4447 = verf.f32 %v1875_v42  ;;  %3100 = vmatprep.mubr.f32.mxu1 %v2518_v1  ;;  %v2301_v53 = vadd.f32 1.0, %v4432_v37  ;;  %v422_v42 = vld [vmem:[%s9133_s3 + $0x5c0] sm:$0xff]  ;;  %3936 = vmatprep.subr.bf16.mxu1 %v3935_v55  ;;  %v9487_v1 = vld [vmem:[#allocation79_spill] sm:$0xff] }
 0x1e1   :  { %v7894_v16 = vadd.f32 %v9481_v51, %v7875_v35  ;;  %v7898_v38 = vadd.f32 %v9482_v41, %v7879_v21  ;;  %2718 = vmatmul.mubr.f32.gmra.mrb[180].mxu0 %v2419_v49  ;;  %v7906_v32 = vadd.f32 %v7448_v43, %v7875_v35  ;;  %v7910_v10 = vadd.f32 %v7456_v62, %v7879_v21  ;;  %v424_v43 = vld [vmem:[%s9133_s3 + $0x5d0] sm:$0xff] }
 0x1e2   :  { %v7912_v41 = vadd.f32 1.0, %v4426_v27  ;;  %2723 = vmatprep.mubr.f32.mxu0 %v2426_v12  ;;  %v2517_v51 = vmul.f32 %v2295_v26, %v7769_v13  ;;  %v1642_v62 = vmul.f32 0.5, %v7756_v6  ;;  %v2308_v27 = vadd.f32 1.0, %v4434_v47  ;;  %v9486_v26 = vld [vmem:[#allocation70_spill] sm:$0xff] }
 0x1e3   :  { %v1661_v20 = vmul.f32 0.70710677, %v7894_v16  ;;  %v1662_v56 = vmul.f32 0.70710677, %v7898_v38  ;;  %v4438_v37 = vpop.eup %4437  ;;  %v2307_v49 = vadd.f32 1.0, %v4436_v3  ;;  %v2425_v57 = vmul.f32 %v9487_v1, %v9486_v26  ;;  %v7928_v44 = vpop.f32.mrb[110].mxu0 }
 0x1e4   :  { %9485 = vst [vmem:[#allocation69_spill] sm:$0xff] %v7912_v41  ;;  %3101 = vmatmul.mubr.f32.gmra.mrb[138].mxu1 %v2517_v51  ;;  %v1668_v13 = vmul.f32 0.70710677, %v7910_v10  ;;  %v7930_v12 = vpop.eup %4439  ;;  %v1667_v6 = vmul.f32 0.70710677, %v7906_v32  ;;  %v2524_v54 = vmul.f32 %v2302_v17, %v7850_v45  ;;  %v3937_v47 = vpack.c.bf16 %v424_v43, %v422_v42  ;;  %v7934_v55 = vpop.f32.mrb[111].mxu0 }
 0x1e5   :  { %4449 = verf.f32 %v1661_v20  ;;  %v7936_v3 = vpop.eup %4441  ;;  %2724 = vmatmul.mubr.f32.gmra.mrb[182].mxu0 %v2425_v57  ;;  %v9488_v20 = vld [vmem:[#allocation76_spill] sm:$0xff]  ;;  %v2523_v26 = vmul.f32 %v2301_v53, %v7843_v24  ;;  %v7943_v1 = vadd.f32 %v7469_v48, %v7875_v35  ;;  %v7950_v17 = vmul.f32 0.5, %v7856_v23  ;;  %v9493_v53 = vld [vmem:[#allocation2_spill] sm:$0xff] }
 0x1e6   :  { %4451 = verf.f32 %v1662_v56  ;;  %v9489_v51 = vld [vmem:[#allocation28_spill] sm:$0xff]  ;;  %v7947_v56 = vadd.f32 %v7479_v52, %v7879_v21  ;;  %v4444_v45 = vpop.eup %4443  ;;  %v2314_v42 = vadd.f32 1.0, %v4438_v37  ;;  %3106 = vmatprep.mubr.f32.mxu1 %v2524_v54  ;;  %3938 = vmatpush1.bf16.msra.mxu1 %v3937_v47  ;;  %v2530_v43 = vmul.f32 %v2308_v27, %v1642_v62  ;;  %v9492_v52 = vld [vmem:[#allocation25_spill] sm:$0xff]  ;;  %v427_v37 = vld [vmem:[%s9133_s3 + $0x5e8] sm:$0xff] }
 0x1e7   :  { %v2432_v41 = vmul.f32 %v9489_v51, %v9488_v20  ;;  %9490 = vst [vmem:[#allocation50_spill] sm:$0xff] %v7950_v17  ;;  %4453 = verf.f32 %v1668_v13  ;;  %v7952_v57 = vpop.f32.mrb[112].mxu0  ;;  %v7955_v24 = vmul.f32 0.70710677, %v7856_v23  ;;  %v1648_v48 = vmul.f32 0.5, %v7782_v22  ;;  %v429_v62 = vld [vmem:[%s9133_s3 + $0x5f8] sm:$0xff] }
 0x1e8   :  { %9491 = vst [vmem:[#allocation55_spill] sm:$0xff] %v7952_v57  ;;  %4455 = verf.f32 %v1861_v4  ;;  %3107 = vmatmul.mubr.f32.gmra.mrb[140].mxu1 %v2523_v26  ;;  %v2431_v20 = vmul.f32 %v9493_v53, %v9492_v52  ;;  %v7966_v27 = vpop.f32.mrb[113].mxu0  ;;  %v4446_v4 = vpop.eup %4445  ;;  %v1673_v23 = vmul.f32 0.70710677, %v7943_v1  ;;  %v1674_v22 = vmul.f32 0.70710677, %v7947_v56 }
 0x1e9   :  { %2729 = vmatprep.mubr.f32.mxu0 %v2432_v41  ;;  %9494 = vst [vmem:[#allocation68_spill] sm:$0xff] %v7966_v27  ;;  %4457 = verf.f32 %v1667_v6  ;;  %3112 = vmatprep.mubr.f32.mxu1 %v2530_v43  ;;  %v9495_v41 = vld [vmem:[#allocation27_spill] sm:$0xff]  ;;  %v2313_v47 = vadd.f32 1.0, %v4444_v45  ;;  %v2529_v51 = vmul.f32 %v2307_v49, %v1641_v11  ;;  %v7974_v26 = vadd.f32 %v7498_v33, %v7875_v35  ;;  %v426_v6 = vld [vmem:[%s9133_s3 + $0x5e0] sm:$0xff]  ;;  %v428_v43 = vld [vmem:[%s9133_s3 + $0x5f0] sm:$0xff] }
 0x1ea   :  { %v9496_v13 = vld [vmem:[#allocation91_spill] sm:$0xff]  ;;  %2730 = vmatmul.mubr.f32.gmra.mrb[184].mxu0 %v2431_v20  ;;  %v7978_v52 = vadd.f32 %v7508_v58, %v7879_v21  ;;  %v4448_v53 = vpop.eup %4447  ;;  %v2320_v45 = vadd.f32 1.0, %v4446_v4  ;;  %4459 = verf.f32 %v1674_v22  ;;  %v2536_v11 = vmul.f32 %v2314_v42, %v1648_v48  ;;  %v9499_v4 = vld [vmem:[#allocation85_spill] sm:$0xff]  ;;  %v9500_v42 = vld [vmem:[#allocation54_spill] sm:$0xff] }
 0x1eb   :  { %v2438_v54 = vmul.f32 %v9496_v13, %v9495_v41  ;;  %v3939_v49 = vpack.c.bf16 %v429_v62, %v427_v37  ;;  %v7986_v33 = vpop.f32.mrb[114].mxu0  ;;  %v1647_v20 = vmul.f32 0.5, %v7811_v59  ;;  %v1654_v58 = vmul.f32 0.5, %v7838_v36  ;;  %v9497_v13 = vld [vmem:[#allocation80_spill] sm:$0xff]  ;;  %v9498_v57 = vld [vmem:[#allocation31_spill] sm:$0xff] }
 0x1ec   :  { %3113 = vmatmul.mubr.f32.gmra.mrb[142].mxu1 %v2529_v51  ;;  %v1680_v41 = vmul.f32 0.70710677, %v7978_v52  ;;  %v2437_v17 = vmul.f32 %v9498_v57, %v9497_v13  ;;  %4461 = verf.f32 %v1673_v23  ;;  %v1679_v27 = vmul.f32 0.70710677, %v7974_v26  ;;  %v7996_v62 = vpop.f32.mrb[115].mxu0 }
 0x1ed   :  { %2735 = vmatprep.mubr.f32.mxu0 %v2438_v54  ;;  %3118 = vmatprep.mubr.f32.mxu1 %v2536_v11  ;;  %v2444_v48 = vmul.f32 %v9500_v42, %v9499_v4  ;;  %v3941_v37 = vpack.c.bf16 %v428_v43, %v426_v6  ;;  %v2319_v22 = vadd.f32 1.0, %v4448_v53  ;;  %v2535_v36 = vmul.f32 %v2313_v47, %v1647_v20  ;;  %v9502_v11 = vld [vmem:[#allocation30_spill] sm:$0xff] }
 0x1ee   :  { %3940 = vmatprep.subr.bf16.mxu1 %v3939_v49  ;;  %2736 = vmatmul.mubr.f32.gmra.mrb[186].mxu0 %v2437_v17  ;;  %v8000_v54 = vadd.f32 %v7528_v31, %v7875_v35  ;;  %v8004_v57 = vadd.f32 %v7534_v25, %v7879_v21  ;;  %v8007_v51 = vadd.f32 1.0, %v7867_v60  ;;  %v1653_v6 = vmul.f32 0.5, %v7834_v9  ;;  %v9501_v25 = vld [vmem:[#allocation84_spill] sm:$0xff] }
 0x1ef   :  { %v4450_v59 = vpop.eup %4449  ;;  %4463 = verf.f32 %v1680_v41  ;;  %2741 = vmatprep.mubr.f32.mxu0 %v2444_v48  ;;  %3942 = vmatpush1.bf16.msra.mxu1 %v3941_v37  ;;  %v2542_v43 = vmul.f32 %v2320_v45, %v1654_v58  ;;  %v8010_v17 = vpop.f32.mrb[116].mxu0  ;;  %v1440_v47 = vmul.f32 0.5, %v7898_v38  ;;  %v2443_v49 = vmul.f32 %v9502_v11, %v9501_v25  ;;  %v9503_v45 = vld [vmem:[#allocation52_spill] sm:$0xff]  ;;  %v9504_v58 = vld [vmem:[#allocation58_spill] sm:$0xff] }
 0x1f0   :  { %v4452_v23 = vpop.eup %4451  ;;  %3119 = vmatmul.mubr.f32.gmra.mrb[144].mxu1 %v2535_v36  ;;  %v1685_v53 = vmul.f32 0.70710677, %v8000_v54  ;;  %v8016_v20 = vpop.f32.mrb[117].mxu0  ;;  %v2105_v13 = vadd.f32 1.0, %v4450_v59  ;;  %4465 = verf.f32 %v1679_v27  ;;  %v1686_v9 = vmul.f32 0.70710677, %v8004_v57 }
 0x1f1   :  { %v2106_v31 = vadd.f32 1.0, %v4452_v23  ;;  %v4454_v60 = vpop.eup %4453  ;;  %3124 = vmatprep.mubr.f32.mxu1 %v2542_v43  ;;  %v2450_v41 = vmul.f32 %v9504_v58, %v9503_v45  ;;  %v2541_v42 = vmul.f32 %v2319_v22, %v1653_v6  ;;  %v8025_v48 = vadd.f32 %v7555_v28, %v7875_v35  ;;  %v9505_v59 = vld [vmem:[#allocation8_spill] sm:$0xff]  ;;  %v9507_v6 = vld [vmem:[#allocation3_spill] sm:$0xff] }
 0x1f2   :  { %v8021_v4 = vpop.eup %4455  ;;  %v2112_v38 = vadd.f32 1.0, %v4454_v60  ;;  %2742 = vmatmul.mubr.f32.gmra.mrb[188].mxu0 %v2443_v49  ;;  %v8029_v37 = vadd.f32 %v7563_v15, %v7879_v21  ;;  %v8033_v36 = vadd.f32 %v9505_v59, %v6068_v29  ;;  %v1439_v23 = vmul.f32 0.5, %v7894_v16  ;;  %v9506_v15 = vld [vmem:[#allocation11_spill] sm:$0xff]  ;;  %v9508_v45 = vld [vmem:[#allocation12_spill] sm:$0xff] }
 0x1f3   :  { %v4458_v27 = vpop.eup %4457  ;;  %4467 = verf.f32 %v1686_v9  ;;  %2747 = vmatprep.mubr.f32.mxu0 %v2450_v41  ;;  %v2328_v43 = vmul.f32 %v2106_v31, %v1440_v47  ;;  %v8036_v25 = vpop.f32.mrb[118].mxu0  ;;  %v1446_v22 = vmul.f32 0.5, %v7910_v10  ;;  %v2449_v11 = vmul.f32 %v9507_v6, %v9506_v15 }
 0x1f4   :  { %4469 = verf.f32 %v1685_v53  ;;  %3125 = vmatmul.mubr.f32.gmra.mrb[146].mxu1 %v2541_v42  ;;  %v1692_v28 = vmul.f32 0.70710677, %v8029_v37  ;;  %v4460_v49 = vpop.eup %4459  ;;  %v1691_v60 = vmul.f32 0.70710677, %v8025_v48  ;;  %v2456_v16 = vmul.f32 %v7450_v18, %v9508_v45  ;;  %v8053_v31 = vpop.f32.mrb[119].mxu0 }
 0x1f5   :  { %3195 = vmatprep.mubr.f32.mxu1 %v2328_v43  ;;  %v8047_v47 = vadd.f32 %v7574_v8, %v7875_v35  ;;  %v8051_v10 = vadd.f32 %v7580_v19, %v7879_v21  ;;  %v2327_v53 = vmul.f32 %v2105_v13, %v1439_v23  ;;  %v2111_v9 = vadd.f32 1.0, %v4458_v27  ;;  %v9509_v8 = vld [vmem:[#allocation93_spill] sm:$0xff]  ;;  %v9512_v27 = vld [vmem:[#allocation24_spill] sm:$0xff] }
 0x1f6   :  { %v2118_v58 = vadd.f32 1.0, %v4460_v49  ;;  %2748 = vmatmul.mubr.f32.gmra.mrb[190].mxu0 %v2449_v11  ;;  %v2334_v41 = vmul.f32 %v2112_v38, %v1446_v22  ;;  %v4462_v42 = vpop.eup %4461  ;;  %v1445_v59 = vmul.f32 0.5, %v7906_v32  ;;  %v1452_v18 = vmul.f32 0.5, %v7947_v56  ;;  %v9510_v43 = vld [vmem:[#allocation9_spill] sm:$0xff]  ;;  %v9513_v32 = vld [vmem:[#allocation42_spill] sm:$0xff]  ;;  %v9514_v11 = vld [vmem:[#allocation15_spill] sm:$0xff] }
 0x1f7   :  { %4471 = verf.f32 %v1692_v28  ;;  %2753 = vmatprep.mubr.f32.mxu0 %v2456_v16  ;;  %v2455_v15 = vmul.f32 %v9510_v43, %v9509_v8  ;;  %v8059_v6 = vpop.f32.mrb[120].mxu0  ;;  %v1697_v19 = vmul.f32 0.70710677, %v8047_v47  ;;  %v1698_v13 = vmul.f32 0.70710677, %v8051_v10  ;;  %v9515_v49 = vld [vmem:[#allocation20_spill] sm:$0xff] }
 0x1f8   :  { %9511 = vst [vmem:[#allocation90_spill] sm:$0xff] %v8059_v6  ;;  %3196 = vmatmul.mubr.f32.vlgmr.msra.gmra.mrb[74].mxu1 %v2327_v53  ;;  %v8065_v38 = vadd.f32 %v9512_v27, %v7875_v35  ;;  %v8069_v23 = vadd.f32 %v9513_v32, %v7879_v21  ;;  %v8071_v56 = vpop.f32.mrb[121].mxu0  ;;  %v1867_v28 = vmul.f32 0.70710677, %v8033_v36  ;;  %4473 = verf.f32 %v1691_v60 }
 0x1f9   :  { %v4464_v22 = vpop.eup %4463  ;;  %3201 = vmatprep.mubr.f32.mxu1 %v2334_v41  ;;  %v2462_v45 = vmul.f32 %v9515_v49, %v9514_v11  ;;  %v2340_v16 = vmul.f32 %v2118_v58, %v1452_v18  ;;  %v2117_v53 = vadd.f32 1.0, %v4462_v42  ;;  %4475 = verf.f32 %v1698_v13  ;;  %v9517_v42 = vld [vmem:[#allocation33_spill] sm:$0xff]  ;;  %v9518_v18 = vld [vmem:[#allocation4_spill] sm:$0xff] }
 0x1fa   :  { %v2124_v8 = vadd.f32 1.0, %v4464_v22  ;;  %2754 = vmatmul.mubr.f32.gmra.mrb[192].mxu0 %v2455_v15  ;;  %v2333_v43 = vmul.f32 %v2111_v9, %v1445_v59  ;;  %v4466_v27 = vpop.eup %4465  ;;  %4477 = verf.f32 %v7955_v24  ;;  %v1451_v32 = vmul.f32 0.5, %v7943_v1  ;;  %v9519_v9 = vld [vmem:[#allocation47_spill] sm:$0xff]  ;;  %v9522_v13 = vld [vmem:[#allocation5_spill] sm:$0xff] }
 0x1fb   :  { %v1458_v6 = vmul.f32 0.5, %v7978_v52  ;;  %2759 = vmatprep.mubr.f32.mxu0 %v2462_v45  ;;  %v1704_v60 = vmul.f32 0.70710677, %v8069_v23  ;;  %v8080_v41 = vpop.f32.mrb[122].mxu0  ;;  %4479 = verf.f32 %v1697_v19  ;;  %v1703_v58 = vmul.f32 0.70710677, %v8065_v38 }
 0x1fc   :  { %9516 = vst [vmem:[#allocation64_spill] sm:$0xff] %v8080_v41  ;;  %3202 = vmatmul.mubr.f32.gmra.mrb[76].mxu1 %v2333_v43  ;;  %v2461_v15 = vmul.f32 %v9518_v18, %v9517_v42  ;;  %v8087_v59 = vadd.f32 %v9519_v9, %v7879_v21  ;;  %v8089_v24 = vpop.f32.mrb[123].mxu0  ;;  %v9521_v52 = vld [vmem:[#allocation95_spill] sm:$0xff]  ;;  %v9523_v19 = vld [vmem:[#allocation36_spill] sm:$0xff]  ;;  %v2123_v43 = vadd.f32 1.0, %v4466_v27  ;;  %v2339_v18 = vmul.f32 %v2117_v53, %v1451_v32 }
 0x1fd   :  { %9520 = vst [vmem:[#allocation75_spill] sm:$0xff] %v8089_v24  ;;  %v4468_v1 = vpop.eup %4467  ;;  %4481 = verf.f32 %v1704_v60  ;;  %3207 = vmatprep.mubr.f32.mxu1 %v2340_v16  ;;  %v2468_v22 = vmul.f32 %v9522_v13, %v9521_v52  ;;  %v8095_v11 = vadd.f32 %v9523_v19, %v7875_v35  ;;  %v2346_v49 = vmul.f32 %v2124_v8, %v1458_v6  ;;  %v9527_v27 = vld [vmem:[#allocation16_spill] sm:$0xff]  ;;  %v9530_v13 = vld [vmem:[#allocation38_spill] sm:$0xff] }
 0x1fe   :  { %v4470_v45 = vpop.eup %4469  ;;  %4483 = verf.f32 %v1867_v28  ;;  %v2130_v42 = vadd.f32 1.0, %v4468_v1  ;;  %2760 = vmatmul.mubr.f32.gmra.mrb[194].mxu0 %v2461_v15  ;;  %v1464_v9 = vmul.f32 0.5, %v8004_v57  ;;  %v1710_v60 = vmul.f32 0.70710677, %v8087_v59  ;;  %v9525_v28 = vld [vmem:[#allocation34_spill] sm:$0xff] }
 0x1ff   :  { %2765 = vmatprep.mubr.f32.mxu0 %v2468_v22  ;;  %v8101_v16 = vadd.f32 %v7652_v0, %v7875_v35  ;;  %v8105_v52 = vadd.f32 %v7659_v30, %v7879_v21  ;;  %v8107_v6 = vpop.f32.mrb[124].mxu0  ;;  %v8111_v8 = vadd.f32 %v9525_v28, %v6085_v5  ;;  %v1457_v53 = vmul.f32 0.5, %v7974_v26  ;;  %v9526_v57 = vld [vmem:[#allocation94_spill] sm:$0xff] }
 0x200   :  { %9524 = vst [vmem:[#allocation92_spill] sm:$0xff] %v8107_v6  ;;  %4485 = verf.f32 %v1703_v58  ;;  %3208 = vmatmul.mubr.f32.gmra.mrb[78].mxu1 %v2339_v18  ;;  %v2467_v32 = vmul.f32 %v9527_v27, %v9526_v57  ;;  %v8116_v15 = vpop.f32.mrb[125].mxu0  ;;  %v1709_v1 = vmul.f32 0.70710677, %v8095_v11  ;;  %v9529_v30 = vld [vmem:[#allocation10_spill] sm:$0xff]  ;;  %v2352_v19 = vmul.f32 %v2130_v42, %v1464_v9 }
 0x201   :  { %9528 = vst [vmem:[#allocation62_spill] sm:$0xff] %v8116_v15  ;;  %v4472_v0 = vpop.eup %4471  ;;  %4487 = verf.f32 %v1710_v60  ;;  %3213 = vmatprep.mubr.f32.mxu1 %v2346_v49  ;;  %v2474_v22 = vmul.f32 %v9530_v13, %v9529_v30  ;;  %v2129_v28 = vadd.f32 1.0, %v4470_v45  ;;  %v2345_v26 = vmul.f32 %v2123_v43, %v1457_v53  ;;  %v9533_v53 = vld [vmem:[#allocation21_spill] sm:$0xff]  ;;  %v9536_v13 = vld [vmem:[#allocation22_spill] sm:$0xff] }
 0x202   :  { %v2136_v6 = vadd.f32 1.0, %v4472_v0  ;;  %2766 = vmatmul.mubr.f32.gmra.mrb[196].mxu0 %v2467_v32  ;;  %v1716_v58 = vmul.f32 0.70710677, %v8105_v52  ;;  %v4474_v18 = vpop.eup %4473  ;;  %v1470_v57 = vmul.f32 0.5, %v8029_v37  ;;  %v1715_v27 = vmul.f32 0.70710677, %v8101_v16 }
 0x203   :  { %2771 = vmatprep.mubr.f32.mxu0 %v2474_v22  ;;  %v8126_v60 = vadd.f32 %v7676_v7, %v7875_v35  ;;  %v8130_v49 = vadd.f32 %v7683_v50, %v7879_v21  ;;  %v8132_v45 = vpop.f32.mrb[126].mxu0  ;;  %v4476_v42 = vpop.eup %4475  ;;  %v8135_v43 = vmul.f32 0.5, %v8033_v36  ;;  %v1463_v9 = vmul.f32 0.5, %v8000_v54  ;;  %v9532_v37 = vld [vmem:[#allocation19_spill] sm:$0xff]  ;;  %v9535_v50 = vld [vmem:[#allocation66_spill] sm:$0xff] }
 0x204   :  { %9531 = vst [vmem:[#allocation73_spill] sm:$0xff] %v8132_v45  ;;  %3214 = vmatmul.mubr.f32.gmra.mrb[80].mxu1 %v2345_v26  ;;  %4489 = verf.f32 %v1716_v58  ;;  %v2473_v32 = vmul.f32 %v9533_v53, %v9532_v37  ;;  %v8140_v0 = vpop.f32.mrb[127].mxu0  ;;  %v8142_v7 = vpop.eup %4477  ;;  %v2142_v30 = vadd.f32 1.0, %v4476_v42  ;;  %v2480_v22 = vmul.f32 %v9536_v13, %v9535_v50  ;;  %v9537_v58 = vld [vmem:[#allocation29_spill] sm:$0xff] }
 0x205   :  { %9534 = vst [vmem:[#allocation67_spill] sm:$0xff] %v8140_v0  ;;  %4491 = verf.f32 %v1709_v1  ;;  %3219 = vmatprep.mubr.f32.mxu1 %v2352_v19  ;;  %v2358_v45 = vmul.f32 %v2136_v6, %v1470_v57  ;;  %v4480_v36 = vpop.eup %4479  ;;  %v2135_v41 = vadd.f32 1.0, %v4474_v18  ;;  %v2351_v54 = vmul.f32 %v2129_v28, %v1463_v9  ;;  %v9538_v19 = vld [vmem:[#allocation40_spill] sm:$0xff]  ;;  %v9542_v13 = vld [vmem:[#allocation17_spill] sm:$0xff] }
 0x206   :  { %2772 = vmatmul.mubr.f32.gmra.mrb[198].mxu0 %v2473_v32  ;;  %v1722_v26 = vmul.f32 0.70710677, %v8130_v49  ;;  %v8149_v37 = vadd.f32 %v9537_v58, %v7879_v21  ;;  %v1476_v0 = vmul.f32 0.5, %v8051_v10  ;;  %4493 = verf.f32 %v1715_v27  ;;  %v9540_v10 = vld [vmem:[#allocation23_spill] sm:$0xff]  ;;  %v9541_v27 = vld [vmem:[#allocation72_spill] sm:$0xff] }
 0x207   :  { %v4482_v53 = vpop.eup %4481  ;;  %2777 = vmatprep.mubr.f32.mxu0 %v2480_v22  ;;  %v1721_v1 = vmul.f32 0.70710677, %v8126_v60  ;;  %v8155_v6 = vadd.f32 %v9538_v19, %v7875_v35  ;;  %v8157_v18 = vpop.f32.mrb[128].mxu0  ;;  %v8162_v57 = vadd.f32 1.0, %v7930_v12  ;;  %v1469_v42 = vmul.f32 0.5, %v8025_v48  ;;  %v9543_v22 = vld [vmem:[#allocation43_spill] sm:$0xff] }
 0x208   :  { %9539 = vst [vmem:[#allocation78_spill] sm:$0xff] %v8157_v18  ;;  %v8159_v28 = vpop.eup %4483  ;;  %3220 = vmatmul.mubr.f32.gmra.mrb[82].mxu1 %v2351_v54  ;;  %4495 = verf.f32 %v1722_v26  ;;  %v2479_v9 = vmul.f32 %v9541_v27, %v9540_v10  ;;  %v8167_v32 = vpop.f32.mrb[129].mxu0  ;;  %v2148_v50 = vadd.f32 1.0, %v4482_v53  ;;  %v2486_v58 = vmul.f32 %v9543_v22, %v9542_v13  ;;  %v9544_v10 = vld [vmem:[#allocation32_spill] sm:$0xff]  ;;  %v9548_v27 = vld [vmem:[#allocation37_spill] sm:$0xff] }
 0x209   :  { %3225 = vmatprep.mubr.f32.mxu1 %v2358_v45  ;;  %v1728_v19 = vmul.f32 0.70710677, %v8149_v37  ;;  %v2364_v18 = vmul.f32 %v2142_v30, %v1476_v0  ;;  %v1868_v12 = vmul.f32 0.70710677, %v8111_v8  ;;  %v2141_v24 = vadd.f32 1.0, %v4480_v36 }
 0x20a   :  { %v4486_v15 = vpop.eup %4485  ;;  %2778 = vmatmul.mubr.f32.gmra.mrb[200].mxu0 %v2479_v9  ;;  %v2357_v48 = vmul.f32 %v2135_v41, %v1469_v42  ;;  %v8175_v54 = vadd.f32 %v7743_v40, %v7879_v21  ;;  %v1482_v53 = vmul.f32 0.5, %v8069_v23  ;;  %4497 = verf.f32 %v1721_v1  ;;  %v9546_v41 = vld [vmem:[#allocation71_spill] sm:$0xff]  ;;  %v9549_v9 = vld [vmem:[#allocation81_spill] sm:$0xff] }
 0x20b   :  { %v4488_v26 = vpop.eup %4487  ;;  %2783 = vmatprep.mubr.f32.mxu0 %v2486_v58  ;;  %v1727_v45 = vmul.f32 0.70710677, %v8155_v6  ;;  %v8181_v0 = vadd.f32 %v9544_v10, %v7875_v35  ;;  %v8183_v30 = vpop.f32.mrb[130].mxu0  ;;  %v1475_v36 = vmul.f32 0.5, %v8047_v47  ;;  %4499 = verf.f32 %v1728_v19  ;;  %v9547_v40 = vld [vmem:[#allocation39_spill] sm:$0xff]  ;;  %v9550_v10 = vld [vmem:[#allocation57_spill] sm:$0xff] }
 0x20c   :  { %9545 = vst [vmem:[#allocation65_spill] sm:$0xff] %v8183_v30  ;;  %3226 = vmatmul.mubr.f32.gmra.mrb[84].mxu1 %v2357_v48  ;;  %v2485_v42 = vmul.f32 %v9547_v40, %v9546_v41  ;;  %v2492_v23 = vmul.f32 %v9549_v9, %v9548_v27  ;;  %v8190_v1 = vpop.f32.mrb[131].mxu0  ;;  %v2154_v13 = vadd.f32 1.0, %v4488_v26  ;;  %v1734_v22 = vmul.f32 0.70710677, %v8175_v54  ;;  %v9551_v19 = vld [vmem:[#allocation59_spill] sm:$0xff] }
 0x20d   :  { %3231 = vmatprep.mubr.f32.mxu1 %v2364_v18  ;;  %v2370_v58 = vmul.f32 %v2148_v50, %v1482_v53  ;;  %v8195_v30 = vadd.f32 %v9550_v10, %v7879_v21  ;;  %4501 = verf.f32 %v1868_v12  ;;  %v8199_v48 = vadd.f32 %v9551_v19, %v6085_v5  ;;  %v9553_v12 = vld [vmem:[#allocation18_spill] sm:$0xff]  ;;  %v9554_v9 = vld [vmem:[#allocation45_spill] sm:$0xff]  ;;  %v9555_v10 = vld [vmem:[#allocation35_spill] sm:$0xff] }
 0x20e   :  { %v4490_v47 = vpop.eup %4489  ;;  %v2147_v41 = vadd.f32 1.0, %v4486_v15  ;;  %2784 = vmatmul.mubr.f32.gmra.mrb[202].mxu0 %v2485_v42  ;;  %v2363_v40 = vmul.f32 %v2141_v24, %v1475_v36  ;;  %v1481_v26 = vmul.f32 0.5, %v8065_v38  ;;  %v1488_v18 = vmul.f32 0.5, %v8087_v59  ;;  %v9556_v15 = vld [vmem:[#allocation46_spill] sm:$0xff] }
 0x20f   :  { %v4492_v27 = vpop.eup %4491  ;;  %4503 = verf.f32 %v1727_v45  ;;  %2789 = vmatprep.mubr.f32.mxu0 %v2492_v23  ;;  %v1733_v50 = vmul.f32 0.70710677, %v8181_v0  ;;  %v8204_v53 = vpop.f32.mrb[132].mxu0  ;;  %v2491_v5 = vmul.f32 %v9554_v9, %v9553_v12  ;;  %v2498_v42 = vmul.f32 %v9556_v15, %v9555_v10  ;;  %v9558_v45 = vld [vmem:[#allocation89_spill] sm:$0xff] }
 0x210   :  { %9552 = vst [vmem:[#allocation77_spill] sm:$0xff] %v8204_v53  ;;  %3232 = vmatmul.mubr.f32.gmra.mrb[86].mxu1 %v2363_v40  ;;  %4505 = verf.f32 %v1734_v22  ;;  %v1740_v24 = vmul.f32 0.70710677, %v8195_v30  ;;  %v8211_v36 = vpop.f32.mrb[133].mxu0  ;;  %v4494_v38 = vpop.eup %4493  ;;  %v2160_v59 = vadd.f32 1.0, %v4490_v47  ;;  %v8215_v23 = vadd.f32 %v9558_v45, %v7875_v35  ;;  %v9559_v22 = vld [vmem:[#allocation63_spill] sm:$0xff] }
 0x211   :  { %9557 = vst [vmem:[#allocation14_spill] sm:$0xff] %v8211_v36  ;;  %3237 = vmatprep.mubr.f32.mxu1 %v2370_v58  ;;  %v2376_v19 = vmul.f32 %v2154_v13, %v1488_v18  ;;  %v8219_v40 = vadd.f32 %v9559_v22, %v7879_v21  ;;  %v9560_v9 = vld [vmem:[#allocation13_spill] sm:$0xff]  ;;  %v1874_v15 = vmul.f32 0.70710677, %v8199_v48  ;;  %v2153_v53 = vadd.f32 1.0, %v4492_v27  ;;  %v9561_v13 = vld [vmem:[#allocation7_spill] sm:$0xff] }
 0x212   :  { %v4496_v12 = vpop.eup %4495  ;;  %v8223_v10 = vadd.f32 %v9560_v9, %v6068_v29  ;;  %2790 = vmatmul.mubr.f32.gmra.mrb[204].mxu0 %v2491_v5  ;;  %v2369_v47 = vmul.f32 %v2147_v41, %v1481_v26  ;;  %v1487_v58 = vmul.f32 0.5, %v8095_v11  ;;  %v1494_v45 = vmul.f32 0.5, %v8105_v52  ;;  %v9563_v29 = vld [vmem:[#allocation82_spill] sm:$0xff]  ;;  %v9564_v9 = vld [vmem:[#allocation49_spill] sm:$0xff] }
 0x213   :  { %4507 = verf.f32 %v1733_v50  ;;  %2795 = vmatprep.mubr.f32.mxu0 %v2498_v42  ;;  %v8230_v18 = vadd.f32 %v9561_v13, %v7875_v35  ;;  %v8232_v22 = vpop.f32.mrb[134].mxu0  ;;  %v2497_v36 = vmul.f32 %v9564_v9, %v9563_v29  ;;  %v1746_v27 = vmul.f32 0.70710677, %v8219_v40  ;;  %v9566_v5 = vld [vmem:[#allocation53_spill] sm:$0xff]  ;;  %v9567_v42 = vld [vmem:[#allocation87_spill] sm:$0xff] }
 0x214   :  { %9562 = vst [vmem:[#allocation96_spill] sm:$0xff] %v8232_v22  ;;  %3238 = vmatmul.mubr.f32.gmra.mrb[88].mxu1 %v2369_v47  ;;  %4509 = verf.f32 %v1740_v24  ;;  %v8239_v11 = vadd.f32 %v7829_v34, %v7879_v21  ;;  %v8241_v52 = vpop.f32.mrb[135].mxu0  ;;  %v4498_v41 = vpop.eup %4497  ;;  %v2166_v26 = vadd.f32 1.0, %v4496_v12  ;;  %v1739_v50 = vmul.f32 0.70710677, %v8215_v23 }
 0x215   :  { %9565 = vst [vmem:[#allocation74_spill] sm:$0xff] %v8241_v52  ;;  %3243 = vmatprep.mubr.f32.mxu1 %v2376_v19  ;;  %v2504_v47 = vmul.f32 %v9567_v42, %v9566_v5  ;;  %v2382_v24 = vmul.f32 %v2160_v59, %v1494_v45  ;;  %v4500_v13 = vpop.eup %4499  ;;  %v1873_v29 = vmul.f32 0.70710677, %v8223_v10  ;;  %4511 = verf.f32 %v1874_v15  ;;  %v9569_v15 = vld [vmem:[#allocation41_spill] sm:$0xff] }
 0x216   :  { %v2159_v9 = vadd.f32 1.0, %v4494_v38  ;;  %2796 = vmatmul.mubr.f32.gmra.mrb[206].mxu0 %v2497_v36  ;;  %v2375_v22 = vmul.f32 %v2153_v53, %v1487_v58  ;;  %v1493_v34 = vmul.f32 0.5, %v8101_v16  ;;  %v1500_v52 = vmul.f32 0.5, %v8130_v49  ;;  %v9570_v38 = vld [vmem:[#allocation60_spill] sm:$0xff] }
 0x217   :  { %2801 = vmatprep.mubr.f32.mxu0 %v2504_v47  ;;  %v1745_v12 = vmul.f32 0.70710677, %v8230_v18  ;;  %v8252_v19 = vadd.f32 %v7825_v46, %v7875_v35  ;;  %v8254_v5 = vpop.f32.mrb[136].mxu0  ;;  %v4502_v59 = vpop.eup %4501  ;;  %4513 = verf.f32 %v1746_v27  ;;  %v2503_v36 = vmul.f32 %v9570_v38, %v9569_v15  ;;  %v9571_v46 = vld [vmem:[#allocation26_spill] sm:$0xff] }
 0x218   :  { %9568 = vst [vmem:[#allocation83_spill] sm:$0xff] %v8254_v5  ;;  %3244 = vmatmul.mubr.f32.gmra.mrb[90].mxu1 %v2375_v22  ;;  %v1752_v53 = vmul.f32 0.70710677, %v8239_v11  ;;  %v8261_v16 = vadd.f32 %v7865_v2, %v7879_v21  ;;  %v8263_v49 = vpop.f32.mrb[137].mxu0  ;;  %v2172_v45 = vadd.f32 1.0, %v4500_v13  ;;  %4515 = verf.f32 %v1739_v50 }
 0x219   :  { %v4504_v58 = vpop.eup %4503  ;;  %3249 = vmatprep.mubr.f32.mxu1 %v2382_v24  ;;  %v2510_v42 = vmul.f32 %v7847_v61, %v9571_v46  ;;  %v2388_v22 = vmul.f32 %v2166_v26, %v1500_v52  ;;  %v2300_v47 = vadd.f32 1.0, %v7936_v3  ;;  %4517 = verf.f32 %v1873_v29  ;;  %v9572_v61 = vld [vmem:[#allocation86_spill] sm:$0xff]  ;;  %v9573_v52 = vld [vmem:[#allocation88_spill] sm:$0xff]  ;;  %v9574_v29 = vld [vmem:[#allocation51_spill] sm:$0xff] }
 0x21a   :  { %v4506_v27 = vpop.eup %4505  ;;  %v2165_v15 = vadd.f32 1.0, %v4498_v41  ;;  %2802 = vmatmul.mubr.f32.gmra.mrb[208].mxu0 %v2503_v36  ;;  %v2381_v38 = vmul.f32 %v2159_v9, %v1493_v34  ;;  %v1499_v2 = vmul.f32 0.5, %v8126_v60  ;;  %v1506_v5 = vmul.f32 0.5, %v8149_v37 }
 0x21b   :  { %4519 = verf.f32 %v1745_v12  ;;  %2807 = vmatprep.mubr.f32.mxu0 %v2510_v42  ;;  %v1751_v50 = vmul.f32 0.70710677, %v8252_v19  ;;  %v8271_v24 = vpop.f32.mrb[138].mxu0  ;;  %v2509_v26 = vmul.f32 %v9573_v52, %v9572_v61  ;;  %v1758_v3 = vmul.f32 0.70710677, %v8261_v16 }
 0x21c   :  { %3250 = vmatmul.mubr.f32.gmra.mrb[92].mxu1 %v2381_v38  ;;  %4521 = verf.f32 %v1752_v53  ;;  %v8278_v41 = vadd.f32 %v7902_v39, %v7879_v21  ;;  %v8280_v60 = vpop.f32.mrb[139].mxu0  ;;  %v2178_v13 = vadd.f32 1.0, %v4506_v27  ;;  %v2516_v9 = vmul.f32 %v8007_v51, %v9574_v29  ;;  %v9577_v38 = vld [vmem:[#allocation61_spill] sm:$0xff] }
 0x21d   :  { %v4508_v37 = vpop.eup %4507  ;;  %3255 = vmatprep.mubr.f32.mxu1 %v2388_v22  ;;  %v8286_v34 = vadd.f32 %v7859_v14, %v7875_v35  ;;  %v2394_v12 = vmul.f32 %v2172_v45, %v1506_v5  ;;  %v2306_v53 = vadd.f32 1.0, %v8142_v7  ;;  %v8290_v46 = vmul.f32 0.5, %v8111_v8  ;;  %v9575_v8 = vld [vmem:[#allocation44_spill] sm:$0xff]  ;;  %v9576_v7 = vld [vmem:[#allocation69_spill] sm:$0xff] }
 0x21e   :  { %v4510_v36 = vpop.eup %4509  ;;  %v2171_v39 = vadd.f32 1.0, %v4504_v58  ;;  %2808 = vmatmul.mubr.f32.gmra.mrb[210].mxu0 %v2509_v26  ;;  %v2387_v42 = vmul.f32 %v2165_v15, %v1499_v2  ;;  %v1505_v27 = vmul.f32 0.5, %v8155_v6  ;;  %v1512_v22 = vmul.f32 0.5, %v8175_v54 }
 0x21f   :  { %4523 = verf.f32 %v1751_v50  ;;  %2813 = vmatprep.mubr.f32.mxu0 %v2516_v9  ;;  %v8296_v14 = vadd.f32 %v7890_v63, %v7875_v35  ;;  %v8298_v51 = vpop.f32.mrb[140].mxu0  ;;  %v4512_v5 = vpop.eup %4511  ;;  %v2515_v58 = vmul.f32 %v9576_v7, %v9575_v8  ;;  %v1764_v45 = vmul.f32 0.70710677, %v8278_v41 }
 0x220   :  { %3256 = vmatmul.mubr.f32.gmra.mrb[94].mxu1 %v2387_v42  ;;  %4525 = verf.f32 %v1758_v3  ;;  %v8305_v6 = vadd.f32 %v7934_v55, %v7879_v21  ;;  %v8307_v54 = vpop.f32.mrb[141].mxu0  ;;  %v2184_v15 = vadd.f32 1.0, %v4510_v36  ;;  %v1757_v63 = vmul.f32 0.70710677, %v8286_v34 }
 0x221   :  { %3261 = vmatprep.mubr.f32.mxu1 %v2394_v12  ;;  %v2522_v2 = vmul.f32 %v2300_v47, %v9577_v38  ;;  %v2400_v50 = vmul.f32 %v2178_v13, %v1512_v22  ;;  %v4514_v61 = vpop.eup %4513  ;;  %v2305_v52 = vadd.f32 1.0, %v8021_v4  ;;  %v2312_v26 = vadd.f32 1.0, %v4502_v59  ;;  %v9578_v4 = vld [vmem:[#allocation48_spill] sm:$0xff] }
 0x222   :  { %v2177_v3 = vadd.f32 1.0, %v4508_v37  ;;  %2814 = vmatmul.mubr.f32.gmra.mrb[212].mxu0 %v2515_v58  ;;  %v2393_v29 = vmul.f32 %v2171_v39, %v1505_v27  ;;  %v4516_v9 = vpop.eup %4515  ;;  %v1511_v55 = vmul.f32 0.5, %v8181_v0  ;;  %v1518_v42 = vmul.f32 0.5, %v8195_v30  ;;  %v9579_v0 = vld [vmem:[#allocation68_spill] sm:$0xff] }
 0x223   :  { %2819 = vmatprep.mubr.f32.mxu0 %v2522_v2  ;;  %v1763_v36 = vmul.f32 0.70710677, %v8296_v14  ;;  %v8317_v12 = vadd.f32 %v7928_v44, %v7875_v35  ;;  %v8319_v47 = vpop.f32.mrb[142].mxu0  ;;  %v4518_v13 = vpop.eup %4517  ;;  %4527 = verf.f32 %v1764_v45  ;;  %v2521_v59 = vmul.f32 %v8162_v57, %v9578_v4  ;;  %v9580_v44 = vld [vmem:[#allocation50_spill] sm:$0xff] }
 0x224   :  { %3262 = vmatmul.mubr.f32.gmra.mrb[96].mxu1 %v2393_v29  ;;  %v1770_v37 = vmul.f32 0.70710677, %v8305_v6  ;;  %v8326_v30 = vadd.f32 %v9579_v0, %v7879_v21  ;;  %v8328_v39 = vpop.f32.mrb[143].mxu0  ;;  %v2190_v22 = vadd.f32 1.0, %v4514_v61  ;;  %4529 = verf.f32 %v1757_v63 }
 0x225   :  { %v4520_v27 = vpop.eup %4519  ;;  %3267 = vmatprep.mubr.f32.mxu1 %v2400_v50  ;;  %v2528_v8 = vmul.f32 %v2306_v53, %v9580_v44  ;;  %v2406_v7 = vmul.f32 %v2184_v15, %v1518_v42  ;;  %v2311_v45 = vadd.f32 1.0, %v8159_v28  ;;  %v2318_v38 = vadd.f32 1.0, %v4512_v5  ;;  %v9581_v53 = vld [vmem:[#allocation56_spill] sm:$0xff] }
 0x226   :  { %v4522_v58 = vpop.eup %4521  ;;  %v2183_v57 = vadd.f32 1.0, %v4516_v9  ;;  %2820 = vmatmul.mubr.f32.gmra.mrb[214].mxu0 %v2521_v59  ;;  %v2399_v2 = vmul.f32 %v2177_v3, %v1511_v55  ;;  %v1517_v29 = vmul.f32 0.5, %v8215_v23  ;;  %v1524_v4 = vmul.f32 0.5, %v8219_v40  ;;  %v9582_v9 = vld [vmem:[#allocation55_spill] sm:$0xff] }
 0x227   :  { %4531 = verf.f32 %v1763_v36  ;;  %2825 = vmatprep.mubr.f32.mxu0 %v2528_v8  ;;  %v1769_v61 = vmul.f32 0.70710677, %v8317_v12  ;;  %v8335_v63 = vpop.f32.mrb[144].mxu0  ;;  %v2527_v15 = vmul.f32 %v2305_v52, %v9581_v53  ;;  %v1776_v28 = vmul.f32 0.70710677, %v8326_v30 }
 0x228   :  { %3268 = vmatmul.mubr.f32.gmra.mrb[98].mxu1 %v2399_v2  ;;  %4533 = verf.f32 %v1770_v37  ;;  %v8341_v5 = vadd.f32 %v7996_v62, %v7879_v21  ;;  %v8343_v50 = vpop.f32.mrb[145].mxu0  ;;  %v2196_v40 = vadd.f32 1.0, %v4522_v58  ;;  %v2534_v3 = vmul.f32 %v2312_v26, %v8290_v46 }
 0x229   :  { %v4524_v23 = vpop.eup %4523  ;;  %3273 = vmatprep.mubr.f32.mxu1 %v2406_v7  ;;  %v8348_v55 = vadd.f32 %v9582_v9, %v7875_v35  ;;  %v2412_v42 = vmul.f32 %v2190_v22, %v1524_v4  ;;  %v2317_v52 = vadd.f32 1.0, %v4518_v13  ;;  %v1652_v59 = vmul.f32 0.5, %v8199_v48 }
 0x22a   :  { %v4526_v36 = vpop.eup %4525  ;;  %v2189_v37 = vadd.f32 1.0, %v4520_v27  ;;  %2826 = vmatmul.mubr.f32.gmra.mrb[216].mxu0 %v2527_v15  ;;  %v2405_v62 = vmul.f32 %v2183_v57, %v1517_v29  ;;  %v1523_v0 = vmul.f32 0.5, %v8230_v18  ;;  %v1530_v44 = vmul.f32 0.5, %v8239_v11 }
 0x22b   :  { %4535 = verf.f32 %v1769_v61  ;;  %2831 = vmatprep.mubr.f32.mxu0 %v2534_v3  ;;  %v8355_v46 = vadd.f32 %v7986_v33, %v7875_v35  ;;  %v8357_v26 = vpop.f32.mrb[146].mxu0  ;;  %v2533_v13 = vmul.f32 %v2311_v45, %v8135_v43  ;;  %v1782_v48 = vmul.f32 0.70710677, %v8341_v5 }
 0x22c   :  { %3274 = vmatmul.mubr.f32.gmra.mrb[100].mxu1 %v2405_v62  ;;  %4537 = verf.f32 %v1776_v28  ;;  %v8363_v27 = vadd.f32 %v8016_v20, %v7879_v21  ;;  %v2202_v18 = vadd.f32 1.0, %v4526_v36  ;;  %v1775_v11 = vmul.f32 0.70710677, %v8348_v55  ;;  %v8366_v33 = vpop.f32.mrb[147].mxu0 }
 0x22d   :  { %3279 = vmatprep.mubr.f32.mxu1 %v2412_v42  ;;  %v2540_v22 = vmul.f32 %v2318_v38, %v1652_v59  ;;  %v2418_v8 = vmul.f32 %v2196_v40, %v1530_v44  ;;  %v4528_v7 = vpop.eup %4527  ;;  %v1651_v58 = vmul.f32 0.5, %v8223_v10  ;;  %v2195_v57 = vadd.f32 1.0, %v4524_v23 }
 0x22e   :  { %2832 = vmatmul.mubr.f32.gmra.mrb[218].mxu0 %v2533_v13  ;;  %v2411_v43 = vmul.f32 %v2189_v37, %v1523_v0  ;;  %v4530_v45 = vpop.eup %4529  ;;  %v1529_v2 = vmul.f32 0.5, %v8252_v19  ;;  %v1536_v20 = vmul.f32 0.5, %v8261_v16  ;;  %v1781_v29 = vmul.f32 0.70710677, %v8355_v46  ;;  %v9583_v0 = vld [vmem:[#allocation90_spill] sm:$0xff] }
 0x22f   :  { %2837 = vmatprep.mubr.f32.mxu0 %v2540_v22  ;;  %4539 = verf.f32 %v1782_v48  ;;  %v2539_v38 = vmul.f32 %v2317_v52, %v1651_v58  ;;  %v1788_v4 = vmul.f32 0.70710677, %v8363_v27  ;;  %v8375_v61 = vadd.f32 %v8053_v31, %v7879_v21  ;;  %v9584_v48 = vld [vmem:[#allocation75_spill] sm:$0xff] }
 0x230   :  { %3280 = vmatmul.mubr.f32.gmra.mrb[102].mxu1 %v2411_v43  ;;  %v2208_v53 = vadd.f32 1.0, %v4528_v7  ;;  %4541 = verf.f32 %v1775_v11  ;;  %v8379_v19 = vadd.f32 %v8010_v17, %v7875_v35  ;;  %v2424_v16 = vmul.f32 %v2202_v18, %v1536_v20 }
 0x231   :  { %v4532_v10 = vpop.eup %4531  ;;  %3285 = vmatprep.mubr.f32.mxu1 %v2418_v8  ;;  %v2201_v28 = vadd.f32 1.0, %v4530_v45  ;;  %v2417_v23 = vmul.f32 %v2195_v57, %v1529_v2  ;;  %v1542_v40 = vmul.f32 0.5, %v8278_v41  ;;  %4543 = verf.f32 %v1781_v29  ;;  %v9585_v2 = vld [vmem:[#allocation62_spill] sm:$0xff] }
 0x232   :  { %v4534_v15 = vpop.eup %4533  ;;  %2838 = vmatmul.mubr.f32.gmra.mrb[220].mxu0 %v2539_v38  ;;  %v1535_v3 = vmul.f32 0.5, %v8286_v34  ;;  %4545 = verf.f32 %v1788_v4  ;;  %v1794_v31 = vmul.f32 0.70710677, %v8375_v61  ;;  %v8386_v9 = vadd.f32 %v8071_v56, %v7879_v21  ;;  %v9586_v4 = vld [vmem:[#allocation64_spill] sm:$0xff] }
 0x233   :  { %v2214_v42 = vadd.f32 1.0, %v4534_v15  ;;  %v1787_v36 = vmul.f32 0.70710677, %v8379_v19  ;;  %v8391_v52 = vadd.f32 %v8036_v25, %v7875_v35  ;;  %v2430_v41 = vmul.f32 %v2208_v53, %v1542_v40  ;;  %v9587_v40 = vld [vmem:[#allocation67_spill] sm:$0xff] }
 0x234   :  { %3286 = vmatmul.mubr.f32.gmra.mrb[104].mxu1 %v2417_v23  ;;  %v2207_v34 = vadd.f32 1.0, %v4532_v10  ;;  %v2423_v37 = vmul.f32 %v2201_v28, %v1535_v3  ;;  %v1548_v62 = vmul.f32 0.5, %v8305_v6  ;;  %v8396_v44 = vadd.f32 %v9583_v0, %v7875_v35 }
 0x235   :  { %v4536_v17 = vpop.eup %4535  ;;  %3291 = vmatprep.mubr.f32.mxu1 %v2424_v16  ;;  %v1541_v56 = vmul.f32 0.5, %v8296_v14  ;;  %4547 = verf.f32 %v1794_v31  ;;  %v1800_v13 = vmul.f32 0.70710677, %v8386_v9  ;;  %v8402_v25 = vadd.f32 %v9584_v48, %v7879_v21 }
 0x236   :  { %v4538_v59 = vpop.eup %4537  ;;  %4549 = verf.f32 %v1787_v36  ;;  %v1793_v11 = vmul.f32 0.70710677, %v8391_v52  ;;  %v2436_v6 = vmul.f32 %v2214_v42, %v1548_v62  ;;  %v2213_v8 = vadd.f32 1.0, %v4536_v17  ;;  %v9588_v42 = vld [vmem:[#allocation92_spill] sm:$0xff]  ;;  %v9589_v62 = vld [vmem:[#allocation73_spill] sm:$0xff] }
 0x237   :  { %v2220_v18 = vadd.f32 1.0, %v4538_v59  ;;  %v2429_v7 = vmul.f32 %v2207_v34, %v1541_v56  ;;  %v1554_v14 = vmul.f32 0.5, %v8326_v30  ;;  %v1799_v57 = vmul.f32 0.70710677, %v8396_v44 }
 0x238   :  { %3292 = vmatmul.mubr.f32.gmra.mrb[106].mxu1 %v2423_v37  ;;  %v1547_v43 = vmul.f32 0.5, %v8317_v12  ;;  %4551 = verf.f32 %v1800_v13  ;;  %v1806_v45 = vmul.f32 0.70710677, %v8402_v25  ;;  %v8411_v20 = vadd.f32 %v9585_v2, %v7879_v21  ;;  %v9590_v2 = vld [vmem:[#allocation78_spill] sm:$0xff] }
 0x239   :  { %3297 = vmatprep.mubr.f32.mxu1 %v2430_v41  ;;  %v4540_v22 = vpop.eup %4539  ;;  %4553 = verf.f32 %v1793_v11  ;;  %v8415_v10 = vadd.f32 %v9586_v4, %v7875_v35  ;;  %v2442_v30 = vmul.f32 %v2220_v18, %v1554_v14  ;;  %v1560_v15 = vmul.f32 0.5, %v8341_v5 }
 0x23a   :  { %v4542_v58 = vpop.eup %4541  ;;  %v2226_v38 = vadd.f32 1.0, %v4540_v22  ;;  %v2435_v12 = vmul.f32 %v2213_v8, %v1547_v43  ;;  %4555 = verf.f32 %v1799_v57  ;;  %v1553_v28 = vmul.f32 0.5, %v8348_v55 }
 0x23b   :  { %v4544_v29 = vpop.eup %4543  ;;  %v2219_v16 = vadd.f32 1.0, %v4542_v58  ;;  %4557 = verf.f32 %v1806_v45  ;;  %v1812_v23 = vmul.f32 0.70710677, %v8411_v20  ;;  %v8422_v3 = vadd.f32 %v9587_v40, %v7879_v21 }
 0x23c   :  { %3298 = vmatmul.mubr.f32.gmra.mrb[108].mxu1 %v2429_v7  ;;  %v4546_v53 = vpop.eup %4545  ;;  %v1805_v17 = vmul.f32 0.70710677, %v8415_v10  ;;  %v8427_v36 = vadd.f32 %v9588_v42, %v7875_v35  ;;  %v2448_v5 = vmul.f32 %v2226_v38, %v1560_v15  ;;  %v2225_v59 = vadd.f32 1.0, %v4544_v29 }
 0x23d   :  { %3303 = vmatprep.mubr.f32.mxu1 %v2436_v6  ;;  %v2232_v31 = vadd.f32 1.0, %v4546_v53  ;;  %v2441_v55 = vmul.f32 %v2219_v16, %v1553_v28  ;;  %v1566_v37 = vmul.f32 0.5, %v8363_v27  ;;  %v8432_v0 = vadd.f32 %v9589_v62, %v7875_v35  ;;  %v9591_v16 = vld [vmem:[#allocation14_spill] sm:$0xff] }
 0x23e   :  { %v1559_v56 = vmul.f32 0.5, %v8355_v46  ;;  %4559 = verf.f32 %v1812_v23  ;;  %v1818_v13 = vmul.f32 0.70710677, %v8422_v3  ;;  %v8438_v48 = vadd.f32 %v8167_v32, %v7879_v21  ;;  %v9592_v23 = vld [vmem:[#allocation65_spill] sm:$0xff] }
 0x23f   :  { %v4548_v41 = vpop.eup %4547  ;;  %4561 = verf.f32 %v1805_v17  ;;  %v1811_v11 = vmul.f32 0.70710677, %v8427_v36  ;;  %v2454_v27 = vmul.f32 %v2232_v31, %v1566_v37  ;;  %v1572_v46 = vmul.f32 0.5, %v8375_v61 }
 0x240   :  { %3304 = vmatmul.mubr.f32.gmra.mrb[110].mxu1 %v2435_v12  ;;  %v4550_v34 = vpop.eup %4549  ;;  %v2238_v18 = vadd.f32 1.0, %v4548_v41  ;;  %v2447_v8 = vmul.f32 %v2225_v59, %v1559_v56  ;;  %v1817_v58 = vmul.f32 0.70710677, %v8432_v0  ;;  %v1565_v14 = vmul.f32 0.5, %v8379_v19  ;;  %v9593_v59 = vld [vmem:[#allocation77_spill] sm:$0xff]  ;;  %v9594_v56 = vld [vmem:[#allocation74_spill] sm:$0xff] }
 0x241   :  { %3309 = vmatprep.mubr.f32.mxu1 %v2442_v30  ;;  %v2231_v22 = vadd.f32 1.0, %v4550_v34  ;;  %4563 = verf.f32 %v1818_v13  ;;  %v1824_v32 = vmul.f32 0.70710677, %v8438_v48  ;;  %v8447_v57 = vadd.f32 %v8190_v1, %v7879_v21 }
 0x242   :  { %v4552_v6 = vpop.eup %4551  ;;  %4565 = verf.f32 %v1811_v11  ;;  %v8451_v29 = vadd.f32 %v9590_v2, %v7875_v35  ;;  %v2460_v61 = vmul.f32 %v2238_v18, %v1572_v46  ;;  %v1578_v30 = vmul.f32 0.5, %v8386_v9 }
 0x243   :  { %v4554_v7 = vpop.eup %4553  ;;  %v2244_v45 = vadd.f32 1.0, %v4552_v6  ;;  %v2453_v19 = vmul.f32 %v2231_v22, %v1565_v14  ;;  %4567 = verf.f32 %v1817_v58  ;;  %v1571_v53 = vmul.f32 0.5, %v8391_v52 }
 0x244   :  { %3310 = vmatmul.mubr.f32.gmra.mrb[112].mxu1 %v2441_v55  ;;  %v4556_v43 = vpop.eup %4555  ;;  %v2237_v4 = vadd.f32 1.0, %v4554_v7  ;;  %4569 = verf.f32 %v1824_v32  ;;  %v1830_v1 = vmul.f32 0.70710677, %v8447_v57  ;;  %v8458_v12 = vadd.f32 %v9591_v16, %v7879_v21  ;;  %v9596_v16 = vld [vmem:[#allocation83_spill] sm:$0xff] }
 0x245   :  { %3315 = vmatprep.mubr.f32.mxu1 %v2448_v5  ;;  %v4558_v38 = vpop.eup %4557  ;;  %v1823_v28 = vmul.f32 0.70710677, %v8451_v29  ;;  %v8463_v40 = vadd.f32 %v9592_v23, %v7875_v35  ;;  %v2466_v9 = vmul.f32 %v2244_v45, %v1578_v30  ;;  %v2243_v17 = vadd.f32 1.0, %v4556_v43  ;;  %v9595_v45 = vld [vmem:[#allocation96_spill] sm:$0xff] }
 0x246   :  { %v2250_v15 = vadd.f32 1.0, %v4558_v38  ;;  %v2459_v52 = vmul.f32 %v2237_v4, %v1571_v53  ;;  %v1584_v41 = vmul.f32 0.5, %v8402_v25  ;;  %v8470_v55 = vadd.f32 %v9593_v59, %v7875_v35 }
 0x247   :  { %v1577_v37 = vmul.f32 0.5, %v8396_v44  ;;  %4571 = verf.f32 %v1830_v1  ;;  %v1836_v62 = vmul.f32 0.70710677, %v8458_v12  ;;  %v8478_v13 = vadd.f32 %v9594_v56, %v7879_v21 }
 0x248   :  { %3316 = vmatmul.mubr.f32.gmra.mrb[114].mxu1 %v2447_v8  ;;  %v4560_v31 = vpop.eup %4559  ;;  %4573 = verf.f32 %v1823_v28  ;;  %v1829_v25 = vmul.f32 0.70710677, %v8463_v40  ;;  %v2472_v11 = vmul.f32 %v2250_v15, %v1584_v41  ;;  %v1590_v44 = vmul.f32 0.5, %v8411_v20 }
 0x249   :  { %3321 = vmatprep.mubr.f32.mxu1 %v2454_v27  ;;  %v4562_v5 = vpop.eup %4561  ;;  %v2256_v18 = vadd.f32 1.0, %v4560_v31  ;;  %v2465_v22 = vmul.f32 %v2243_v17, %v1577_v37  ;;  %v1835_v7 = vmul.f32 0.70710677, %v8470_v55  ;;  %v1583_v46 = vmul.f32 0.5, %v8415_v10 }
 0x24a   :  { %v2249_v6 = vadd.f32 1.0, %v4562_v5  ;;  %4575 = verf.f32 %v1836_v62  ;;  %v1842_v58 = vmul.f32 0.70710677, %v8478_v13  ;;  %v8487_v14 = vadd.f32 %v8263_v49, %v7879_v21 }
 0x24b   :  { %v4564_v27 = vpop.eup %4563  ;;  %4577 = verf.f32 %v1829_v25  ;;  %v8491_v2 = vadd.f32 %v9595_v45, %v7875_v35  ;;  %v2478_v20 = vmul.f32 %v2256_v18, %v1590_v44  ;;  %v1596_v4 = vmul.f32 0.5, %v8422_v3 }
 0x24c   :  { %3322 = vmatmul.mubr.f32.gmra.mrb[116].mxu1 %v2453_v19  ;;  %v4566_v8 = vpop.eup %4565  ;;  %v2262_v43 = vadd.f32 1.0, %v4564_v27  ;;  %v2471_v10 = vmul.f32 %v2249_v6, %v1583_v46  ;;  %4579 = verf.f32 %v1835_v7  ;;  %v1589_v19 = vmul.f32 0.5, %v8427_v36 }
 0x24d   :  { %3327 = vmatprep.mubr.f32.mxu1 %v2460_v61  ;;  %v4568_v32 = vpop.eup %4567  ;;  %v2255_v38 = vadd.f32 1.0, %v4566_v8  ;;  %4581 = verf.f32 %v1842_v58  ;;  %v1848_v49 = vmul.f32 0.70710677, %v8487_v14  ;;  %v8498_v30 = vadd.f32 %v8280_v60, %v7879_v21 }
 0x24e   :  { %v8465_v42 = vpop.f32.mrb[148].mxu0  ;;  %v4570_v61 = vpop.eup %4569  ;;  %v1841_v1 = vmul.f32 0.70710677, %v8491_v2  ;;  %v8503_v15 = vadd.f32 %v9596_v16, %v7875_v35  ;;  %v2484_v3 = vmul.f32 %v2262_v43, %v1596_v4  ;;  %v2261_v23 = vadd.f32 1.0, %v4568_v32 }
 0x24f   :  { %v8472_v34 = vpop.f32.mrb[149].mxu0  ;;  %v2268_v53 = vadd.f32 1.0, %v4570_v61  ;;  %v1602_v60 = vmul.f32 0.5, %v8438_v48  ;;  %v1595_v5 = vmul.f32 0.5, %v8432_v0  ;;  %4583 = verf.f32 %v1848_v49 }
 0x250   :  { %3328 = vmatmul.mubr.f32.gmra.mrb[118].mxu1 %v2459_v52  ;;  %v8512_v52 = vadd.f32 %v8271_v24, %v7875_v35  ;;  %v1854_v41 = vmul.f32 0.70710677, %v8498_v30  ;;  %v8518_v59 = vadd.f32 %v8307_v54, %v7879_v21  ;;  %4585 = verf.f32 %v1841_v1 }
 0x251   :  { %3333 = vmatprep.mubr.f32.mxu1 %v2466_v9  ;;  %v4572_v36 = vpop.eup %4571  ;;  %v2477_v9 = vmul.f32 %v2255_v38, %v1589_v19  ;;  %v1847_v62 = vmul.f32 0.70710677, %v8503_v15  ;;  %v2490_v48 = vmul.f32 %v2268_v53, %v1602_v60  ;;  %v2483_v25 = vmul.f32 %v2261_v23, %v1595_v5 }
 0x252   :  { %v4574_v17 = vpop.eup %4573  ;;  %v2274_v37 = vadd.f32 1.0, %v4572_v36  ;;  %v1608_v27 = vmul.f32 0.5, %v8447_v57  ;;  %v1853_v6 = vmul.f32 0.70710677, %v8512_v52  ;;  %v1601_v54 = vmul.f32 0.5, %v8451_v29 }
 0x253   :  { %v2267_v18 = vadd.f32 1.0, %v4574_v17  ;;  %4587 = verf.f32 %v1854_v41  ;;  %v8531_v8 = vadd.f32 %v8328_v39, %v7879_v21  ;;  %v8535_v46 = vadd.f32 %v8298_v51, %v7875_v35 }
 0x254   :  { %3334 = vmatmul.mubr.f32.gmra.mrb[120].mxu1 %v2465_v22  ;;  %v4576_v24 = vpop.eup %4575  ;;  %v1860_v22 = vmul.f32 0.70710677, %v8518_v59  ;;  %4589 = verf.f32 %v1847_v62  ;;  %v2496_v57 = vmul.f32 %v2274_v37, %v1608_v27  ;;  %v1614_v43 = vmul.f32 0.5, %v8458_v12 }
 0x255   :  { %3339 = vmatprep.mubr.f32.mxu1 %v2472_v11  ;;  %v4578_v11 = vpop.eup %4577  ;;  %v2280_v7 = vadd.f32 1.0, %v4576_v24  ;;  %v2489_v29 = vmul.f32 %v2267_v18, %v1601_v54  ;;  %4591 = verf.f32 %v1853_v6  ;;  %v1607_v45 = vmul.f32 0.5, %v8463_v40 }
 0x256   :  { %v4580_v44 = vpop.eup %4579  ;;  %v2273_v32 = vadd.f32 1.0, %v4578_v11  ;;  %4593 = verf.f32 %v1860_v22  ;;  %v1866_v39 = vmul.f32 0.70710677, %v8531_v8  ;;  %v1859_v51 = vmul.f32 0.70710677, %v8535_v46 }
 0x257   :  { %v4582_v58 = vpop.eup %4581  ;;  %v8547_v38 = vadd.f32 %v8319_v47, %v7875_v35  ;;  %v2502_v12 = vmul.f32 %v2280_v7, %v1614_v43  ;;  %v2279_v4 = vadd.f32 1.0, %v4580_v44  ;;  %v1613_v53 = vmul.f32 0.5, %v8470_v55 }
 0x258   :  { %3340 = vmatmul.mubr.f32.gmra.mrb[122].mxu1 %v2471_v10  ;;  %v8505_v28 = vpop.f32.mrb[150].mxu0  ;;  %v2286_v61 = vadd.f32 1.0, %v4582_v58  ;;  %v2495_v40 = vmul.f32 %v2273_v32, %v1607_v45  ;;  %4595 = verf.f32 %v1866_v39  ;;  %v8557_v16 = vadd.f32 %v8335_v63, %v7875_v35 }
 0x259   :  { %3345 = vmatprep.mubr.f32.mxu1 %v2478_v20  ;;  %v8507_v31 = vpop.f32.mrb[151].mxu0  ;;  %v8542_v20 = vadd.f32 %v8343_v50, %v7879_v21  ;;  %v4584_v10 = vpop.eup %4583  ;;  %v1620_v50 = vmul.f32 0.5, %v8478_v13  ;;  %4597 = verf.f32 %v1859_v51  ;;  %v1865_v55 = vmul.f32 0.70710677, %v8547_v38 }
 0x25a   :  { %v4586_v49 = vpop.eup %4585  ;;  %v2292_v36 = vadd.f32 1.0, %v4584_v10  ;;  %v2501_v17 = vmul.f32 %v2279_v4, %v1613_v53  ;;  %v1626_v63 = vmul.f32 0.5, %v8487_v14  ;;  %v1619_v37 = vmul.f32 0.5, %v8491_v2 }
 0x25b   :  { %v1872_v47 = vmul.f32 0.70710677, %v8542_v20  ;;  %v2508_v13 = vmul.f32 %v2286_v61, %v1620_v50  ;;  %v1431_v24 = vadd.f32 %v8357_v26, %v7875_v35  ;;  %v1632_v27 = vmul.f32 0.5, %v8498_v30 }
 0x25c   :  { %3346 = vmatmul.mubr.f32.gmra.mrb[124].mxu1 %v2477_v9  ;;  %v8521_v56 = vpop.f32.mrb[152].mxu0  ;;  %v2285_v9 = vadd.f32 1.0, %v4586_v49  ;;  %v2514_v18 = vmul.f32 %v2292_v36, %v1626_v63  ;;  %v1625_v6 = vmul.f32 0.5, %v8503_v15  ;;  %v1638_v32 = vmul.f32 0.5, %v8518_v59 }
 0x25d   :  { %3351 = vmatprep.mubr.f32.mxu1 %v2484_v3  ;;  %v8523_v0 = vpop.f32.mrb[153].mxu0  ;;  %v8562_v3 = vadd.f32 %v8366_v33, %v7879_v21  ;;  %v4588_v23 = vpop.eup %4587  ;;  %v1871_v21 = vmul.f32 0.70710677, %v8557_v16  ;;  %4599 = verf.f32 %v1872_v47  ;;  %v1877_v44 = vmul.f32 0.70710677, %v1431_v24 }
 0x25e   :  { %v4590_v5 = vpop.eup %4589  ;;  %4601 = verf.f32 %v1865_v55  ;;  %v2507_v11 = vmul.f32 %v2285_v9, %v1619_v37  ;;  %v1631_v30 = vmul.f32 0.5, %v8512_v52  ;;  %v1637_v4 = vmul.f32 0.5, %v8535_v46 }
 0x25f   :  { %v1878_v33 = vmul.f32 0.70710677, %v8562_v3  ;;  %v4592_v62 = vpop.eup %4591  ;;  %v2291_v14 = vadd.f32 1.0, %v4590_v5  ;;  %v1650_v47 = vmul.f32 0.5, %v8542_v20  ;;  %v1643_v36 = vmul.f32 0.5, %v8547_v38 }
 0x260   :  { %3352 = vmatmul.mubr.f32.gmra.mrb[126].mxu1 %v2483_v25  ;;  %v4594_v25 = vpop.eup %4593  ;;  %v2297_v26 = vadd.f32 1.0, %v4592_v62  ;;  %v1656_v5 = vmul.f32 0.5, %v8562_v3  ;;  %v1649_v63 = vmul.f32 0.5, %v8557_v16  ;;  %v1655_v62 = vmul.f32 0.5, %v1431_v24 }
 0x261   :  { %3357 = vmatprep.mubr.f32.mxu1 %v2490_v48  ;;  %v2298_v48 = vadd.f32 1.0, %v4588_v23  ;;  %4603 = verf.f32 %v1878_v33  ;;  %v2304_v22 = vadd.f32 1.0, %v4594_v25 }
 0x262   :  { %4605 = verf.f32 %v1871_v21  ;;  %v4596_v35 = vpop.eup %4595  ;;  %v2519_v39 = vmul.f32 %v2297_v26, %v1631_v30 }
 0x263   :  { %v2520_v7 = vmul.f32 %v2298_v48, %v1632_v27  ;;  %v4598_v58 = vpop.eup %4597  ;;  %4607 = verf.f32 %v1877_v44  ;;  %v2526_v15 = vmul.f32 %v2304_v22, %v1638_v32 }
 0x264   :  { %3358 = vmatmul.mubr.f32.gmra.mrb[128].mxu1 %v2489_v29  ;;  %v2310_v29 = vadd.f32 1.0, %v4596_v35  ;;  %v2303_v45 = vadd.f32 1.0, %v4598_v58 }
 0x265   :  { %3363 = vmatprep.mubr.f32.mxu1 %v2496_v57  ;;  %v2513_v57 = vmul.f32 %v2291_v14, %v1625_v6 }
 0x266   :  { %v8549_v19 = vpop.f32.mrb[154].mxu0  ;;  %v2525_v53 = vmul.f32 %v2303_v45, %v1637_v4 }
 0x267   :  { %v8553_v1 = vpop.f32.mrb[155].mxu0  ;;  %v4600_v43 = vpop.eup %4599 }
 0x268   :  { %3364 = vmatmul.mubr.f32.gmra.mrb[130].mxu1 %v2495_v40  ;;  %v4602_v51 = vpop.eup %4601  ;;  %v2316_v59 = vadd.f32 1.0, %v4600_v43 }
 0x269   :  { %3369 = vmatprep.mubr.f32.mxu1 %v2502_v12  ;;  %v1644_v12 = vmul.f32 0.5, %v8531_v8  ;;  %v2309_v49 = vadd.f32 1.0, %v4602_v51 }
 0x26a   :  { %v8565_v60 = vpop.f32.mrb[156].mxu0 }
 0x26b   :  { %v8568_v41 = vpop.f32.mrb[157].mxu0  ;;  %v2532_v52 = vmul.f32 %v2310_v29, %v1644_v12  ;;  %v4604_v40 = vpop.eup %4603  ;;  %v2531_v9 = vmul.f32 %v2309_v49, %v1643_v36  ;;  %v9597_v12 = vld [vmem:[#allocation6_spill] sm:$0xff] }
 0x26c   :  { %3370 = vmatmul.mubr.f32.gmra.mrb[132].mxu1 %v2501_v17  ;;  %v4606_v50 = vpop.eup %4605  ;;  %v2322_v8 = vadd.f32 1.0, %v4604_v40  ;;  %v9598_v4 = vsub.s32 0, %v9597_v12  ;;  %v9599_v40 = vsub.s32 1, %v9597_v12 }
 0x26d   :  { %3375 = vmatprep.mubr.f32.mxu1 %v2508_v13  ;;  %v2538_v13 = vmul.f32 %v2316_v59, %v1650_v47  ;;  %v2315_v46 = vadd.f32 1.0, %v4606_v50  ;;  %v4608_v17 = vpop.eup %4607 }
 0x26e   :  { %v2544_v20 = vmul.f32 %v2322_v8, %v1656_v5  ;;  %v2321_v37 = vadd.f32 1.0, %v4608_v17 }
 0x26f   :  { %v8576_v2 = vpop.f32.mrb[158].mxu0  ;;  %v2537_v38 = vmul.f32 %v2315_v46, %v1649_v63 }
 0x270   :  { %3376 = vmatmul.mubr.f32.gmra.mrb[134].mxu1 %v2507_v11  ;;  %v8579_v54 = vpop.f32.mrb[159].mxu0  ;;  %v2543_v48 = vmul.f32 %v2321_v37, %v1655_v62 }
 0x271   :  { %3381 = vmatprep.mubr.f32.mxu1 %v2514_v18 }
 0x274   :  { %3382 = vmatmul.mubr.f32.gmra.mrb[136].mxu1 %v2513_v57 }
 0x275   :  { %3387 = vmatprep.mubr.f32.mxu1 %v2520_v7  ;;  %v8583_v61 = vpop.f32.mrb[160].mxu0 }
 0x276   :  { %v8586_v10 = vpop.f32.mrb[161].mxu0 }
 0x278   :  { %3388 = vmatmul.mubr.f32.gmra.mrb[138].mxu1 %v2519_v39  ;;  %v2545_v39 = vld [vmem:[%s9135_s4] sm:$0x3] }
 0x279   :  { %3393 = vmatprep.mubr.f32.mxu1 %v2526_v15  ;;  %v8652_v59 = vrot.slane %v2545_v39, %v9598_v4  ;;  %v8658_v49 = vrot.slane %v2545_v39, %v9599_v40 }
 0x27b   :  { %v8591_v55 = vpop.f32.mrb[162].mxu0  ;;  %v2624_v50 = vadd.f32 %v8465_v42, %v8652_v59  ;;  %v2626_v36 = vadd.f32 %v8472_v34, %v8658_v49  ;;  %v2630_v5 = vadd.f32 %v8505_v28, %v8652_v59  ;;  %v2632_v42 = vadd.f32 %v8507_v31, %v8658_v49 }
 0x27c   :  { %3394 = vmatmul.mubr.f32.gmra.mrb[140].mxu1 %v2525_v53  ;;  %v8593_v23 = vpop.f32.mrb[163].mxu0  ;;  %v2636_v28 = vadd.f32 %v8521_v56, %v8652_v59  ;;  %v2638_v31 = vadd.f32 %v8523_v0, %v8658_v49  ;;  %v2642_v56 = vadd.f32 %v8549_v19, %v8652_v59  ;;  %v2644_v0 = vadd.f32 %v8553_v1, %v8658_v49 }
 0x27d   :  { %3399 = vmatprep.mubr.f32.mxu1 %v2532_v52  ;;  %v2648_v19 = vadd.f32 %v8565_v60, %v8652_v59  ;;  %v2650_v1 = vadd.f32 %v8568_v41, %v8658_v49  ;;  %v2654_v60 = vadd.f32 %v8576_v2, %v8652_v59  ;;  %v2656_v41 = vadd.f32 %v8579_v54, %v8658_v49 }
 0x27e   :  { %v2660_v2 = vadd.f32 %v8583_v61, %v8652_v59  ;;  %v2662_v54 = vadd.f32 %v8586_v10, %v8658_v49  ;;  %v2666_v61 = vadd.f32 %v8591_v55, %v8652_v59  ;;  %v2668_v10 = vadd.f32 %v8593_v23, %v8658_v49 }
 0x280   :  { %3400 = vmatmul.mubr.f32.gmra.mrb[142].mxu1 %v2531_v9 }
 0x281   :  { %3405 = vmatprep.mubr.f32.mxu1 %v2538_v13  ;;  %v8597_v21 = vpop.f32.mrb[164].mxu0 }
 0x282   :  { %v8599_v33 = vpop.f32.mrb[165].mxu0  ;;  %v2672_v55 = vadd.f32 %v8597_v21, %v8652_v59 }
 0x283   :  { %v2674_v23 = vadd.f32 %v8599_v33, %v8658_v49 }
 0x284   :  { %3406 = vmatmul.mubr.f32.gmra.mrb[144].mxu1 %v2537_v38 }
 0x285   :  { %3411 = vmatprep.mubr.f32.mxu1 %v2544_v20 }
 0x287   :  { %v8601_v18 = vpop.f32.mrb[166].mxu0 }
 0x288   :  { %3412 = vmatmul.mubr.f32.gmra.mrb[146].mxu1 %v2543_v48  ;;  %v8603_v25 = vpop.f32.mrb[167].mxu0  ;;  %v2678_v21 = vadd.f32 %v8601_v18, %v8652_v59 }
 0x289   :  { %v2680_v33 = vadd.f32 %v8603_v25, %v8658_v49 }
 0x290   :  { %v8605_v3 = vpop.f32.mrb[168].mxu0 }
 0x291   :  { %v8607_v16 = vpop.f32.mrb[169].mxu0  ;;  %v2684_v18 = vadd.f32 %v8605_v3, %v8652_v59 }
 0x292   :  { %v2686_v25 = vadd.f32 %v8607_v16, %v8658_v49 }
 0x295   :  { %v8609_v14 = vpop.f32.mrb[170].mxu0 }
 0x296   :  { %v8611_v11 = vpop.f32.mrb[171].mxu0  ;;  %v2690_v3 = vadd.f32 %v8609_v14, %v8652_v59 }
 0x297   :  { %v2692_v16 = vadd.f32 %v8611_v11, %v8658_v49 }
 0x29a   :  { %v8613_v27 = vpop.f32.mrb[172].mxu0 }
 0x29b   :  { %v8615_v6 = vpop.f32.mrb[173].mxu0  ;;  %v2696_v14 = vadd.f32 %v8613_v27, %v8652_v59 }
 0x29c   :  { %v2698_v11 = vadd.f32 %v8615_v6, %v8658_v49 }
 0x2a1   :  { %v8617_v24 = vpop.f32.mrb[174].mxu0 }
 0x2a2   :  { %v8619_v22 = vpop.f32.mrb[175].mxu0  ;;  %v2702_v27 = vadd.f32 %v8617_v24, %v8652_v59 }
 0x2a3   :  { %v2704_v6 = vadd.f32 %v8619_v22, %v8658_v49 }
 0x2a7   :  { %v8621_v44 = vpop.f32.mrb[176].mxu0 }
 0x2a8   :  { %v8623_v7 = vpop.f32.mrb[177].mxu0  ;;  %v2708_v24 = vadd.f32 %v8621_v44, %v8652_v59 }
 0x2a9   :  { %v2710_v22 = vadd.f32 %v8623_v7, %v8658_v49 }
 0x2ad   :  { %v8625_v35 = vpop.f32.mrb[178].mxu0 }
 0x2ae   :  { %v8627_v26 = vpop.f32.mrb[179].mxu0  ;;  %v2714_v44 = vadd.f32 %v8625_v35, %v8652_v59 }
 0x2af   :  { %v2716_v7 = vadd.f32 %v8627_v26, %v8658_v49 }
 0x2b4   :  { %v8629_v57 = vpop.f32.mrb[180].mxu0 }
 0x2b5   :  { %v8631_v58 = vpop.f32.mrb[181].mxu0  ;;  %v2720_v35 = vadd.f32 %v8629_v57, %v8652_v59 }
 0x2b8   :  { %v8633_v32 = vpop.f32.mrb[182].mxu0 }
 0x2b9   :  { %v8635_v30 = vpop.f32.mrb[183].mxu0 }
 0x2ba   :  { %v2728_v57 = vadd.f32 %v8635_v30, %v8658_v49 }
 0x2bd   :  { %v8637_v29 = vpop.f32.mrb[184].mxu0 }
 0x2be   :  { %v8639_v15 = vpop.f32.mrb[185].mxu0 }
 0x2c1   :  { %v8641_v43 = vpop.f32.mrb[186].mxu0 }
 0x2c2   :  { %v8643_v45 = vpop.f32.mrb[187].mxu0 }
 0x2c5   :  { %v8648_v51 = vpop.f32.mrb[188].mxu0 }
 0x2c6   :  { %v8654_v52 = vpop.f32.mrb[189].mxu0 }
 0x2c9   :  { %v8660_v53 = vpop.f32.mrb[190].mxu0 }
 0x2ca   :  { %v8664_v47 = vpop.f32.mrb[191].mxu0 }
 0x2cb   :  { %v3197_v8 = vpop.f32.mrb[74].mxu1 }
 0x2cc   :  { %v3944_v13 = vadd.f32 %v3197_v8, %v2624_v50  ;;  %v3199_v46 = vpop.f32.mrb[75].mxu1 }
 0x2cd   :  { %v3946_v9 = vadd.f32 %v3199_v46, %v2626_v36  ;;  %v8668_v17 = vpop.f32.mrb[192].mxu0 }
 0x2ce   :  { %3418 = vst [vmem:[%s9136_s5] sm:$0xff] %v3944_v13  ;;  %v8675_v63 = vpop.f32.mrb[193].mxu0 }
 0x2cf   :  { %3419 = vst.msk [vmem:[%s9136_s5 + $0x8] sm:$0xff] %vm462_vm0, %v3946_v9  ;;  %v3203_v34 = vpop.f32.mrb[76].mxu1 }
 0x2d0   :  { %v3948_v20 = vadd.f32 %v3203_v34, %v2630_v5  ;;  %v3205_v37 = vpop.f32.mrb[77].mxu1 }
 0x2d1   :  { %v3950_v38 = vadd.f32 %v3205_v37, %v2632_v42  ;;  %v8683_v62 = vpop.f32.mrb[194].mxu0 }
 0x2d2   :  { %3420 = vst [vmem:[%s9136_s5 + $0x10] sm:$0xff] %v3948_v20  ;;  %v8690_v48 = vpop.f32.mrb[195].mxu0 }
 0x2d3   :  { %3421 = vst.msk [vmem:[%s9136_s5 + $0x18] sm:$0xff] %vm462_vm0, %v3950_v38  ;;  %v3209_v39 = vpop.f32.mrb[78].mxu1 }
 0x2d4   :  { %v3952_v12 = vadd.f32 %v3209_v39, %v2636_v28  ;;  %v3211_v4 = vpop.f32.mrb[79].mxu1 }
 0x2d5   :  { %v3954_v40 = vadd.f32 %v3211_v4, %v2638_v31  ;;  %v8698_v50 = vpop.f32.mrb[196].mxu0 }
 0x2d6   :  { %3422 = vst [vmem:[%s9136_s5 + $0x20] sm:$0xff] %v3952_v12  ;;  %v8705_v36 = vpop.f32.mrb[197].mxu0 }
 0x2d7   :  { %3423 = vst.msk [vmem:[%s9136_s5 + $0x28] sm:$0xff] %vm462_vm0, %v3954_v40  ;;  %v3215_v8 = vpop.f32.mrb[80].mxu1 }
 0x2d8   :  { %v3956_v13 = vadd.f32 %v3215_v8, %v2642_v56  ;;  %v3217_v46 = vpop.f32.mrb[81].mxu1 }
 0x2d9   :  { %v3958_v9 = vadd.f32 %v3217_v46, %v2644_v0  ;;  %v8713_v5 = vpop.f32.mrb[198].mxu0 }
 0x2da   :  { %3424 = vst [vmem:[%s9136_s5 + $0x30] sm:$0xff] %v3956_v13  ;;  %v8720_v42 = vpop.f32.mrb[199].mxu0 }
 0x2db   :  { %3425 = vst.msk [vmem:[%s9136_s5 + $0x38] sm:$0xff] %vm462_vm0, %v3958_v9  ;;  %v3221_v34 = vpop.f32.mrb[82].mxu1 }
 0x2dc   :  { %v3960_v20 = vadd.f32 %v3221_v34, %v2648_v19  ;;  %v3223_v37 = vpop.f32.mrb[83].mxu1 }
 0x2dd   :  { %v3962_v38 = vadd.f32 %v3223_v37, %v2650_v1  ;;  %v8728_v28 = vpop.f32.mrb[200].mxu0 }
 0x2de   :  { %3426 = vst [vmem:[%s9136_s5 + $0x40] sm:$0xff] %v3960_v20  ;;  %v8735_v31 = vpop.f32.mrb[201].mxu0 }
 0x2df   :  { %3427 = vst.msk [vmem:[%s9136_s5 + $0x48] sm:$0xff] %vm462_vm0, %v3962_v38  ;;  %v3227_v39 = vpop.f32.mrb[84].mxu1 }
 0x2e0   :  { %v3964_v12 = vadd.f32 %v3227_v39, %v2654_v60  ;;  %v3229_v4 = vpop.f32.mrb[85].mxu1 }
 0x2e1   :  { %v3966_v40 = vadd.f32 %v3229_v4, %v2656_v41  ;;  %v8743_v56 = vpop.f32.mrb[202].mxu0 }
 0x2e2   :  { %3428 = vst [vmem:[%s9136_s5 + $0x50] sm:$0xff] %v3964_v12  ;;  %v8750_v0 = vpop.f32.mrb[203].mxu0 }
 0x2e3   :  { %3429 = vst.msk [vmem:[%s9136_s5 + $0x58] sm:$0xff] %vm462_vm0, %v3966_v40  ;;  %v3233_v8 = vpop.f32.mrb[86].mxu1 }
 0x2e4   :  { %v3968_v13 = vadd.f32 %v3233_v8, %v2660_v2  ;;  %v3235_v46 = vpop.f32.mrb[87].mxu1 }
 0x2e5   :  { %v3970_v9 = vadd.f32 %v3235_v46, %v2662_v54  ;;  %v8758_v19 = vpop.f32.mrb[204].mxu0 }
 0x2e6   :  { %3430 = vst [vmem:[%s9136_s5 + $0x60] sm:$0xff] %v3968_v13  ;;  %v8765_v1 = vpop.f32.mrb[205].mxu0 }
 0x2e7   :  { %3431 = vst.msk [vmem:[%s9136_s5 + $0x68] sm:$0xff] %vm462_vm0, %v3970_v9  ;;  %v3239_v34 = vpop.f32.mrb[88].mxu1 }
 0x2e8   :  { %v3972_v20 = vadd.f32 %v3239_v34, %v2666_v61  ;;  %v3241_v37 = vpop.f32.mrb[89].mxu1 }
 0x2e9   :  { %v3974_v38 = vadd.f32 %v3241_v37, %v2668_v10  ;;  %v8773_v60 = vpop.f32.mrb[206].mxu0 }
 0x2ea   :  { %3432 = vst [vmem:[%s9136_s5 + $0x70] sm:$0xff] %v3972_v20  ;;  %v8780_v41 = vpop.f32.mrb[207].mxu0 }
 0x2eb   :  { %3433 = vst.msk [vmem:[%s9136_s5 + $0x78] sm:$0xff] %vm462_vm0, %v3974_v38  ;;  %v3245_v39 = vpop.f32.mrb[90].mxu1 }
 0x2ec   :  { %v3976_v12 = vadd.f32 %v3245_v39, %v2672_v55  ;;  %v3247_v4 = vpop.f32.mrb[91].mxu1 }
 0x2ed   :  { %v3978_v40 = vadd.f32 %v3247_v4, %v2674_v23  ;;  %v8788_v2 = vpop.f32.mrb[208].mxu0 }
 0x2ee   :  { %3434 = vst [vmem:[%s9136_s5 + $0x80] sm:$0xff] %v3976_v12  ;;  %v8795_v54 = vpop.f32.mrb[209].mxu0 }
 0x2ef   :  { %3435 = vst.msk [vmem:[%s9136_s5 + $0x88] sm:$0xff] %vm462_vm0, %v3978_v40  ;;  %v3251_v8 = vpop.f32.mrb[92].mxu1 }
 0x2f0   :  { %v3980_v13 = vadd.f32 %v3251_v8, %v2678_v21  ;;  %v3253_v46 = vpop.f32.mrb[93].mxu1 }
 0x2f1   :  { %v3982_v9 = vadd.f32 %v3253_v46, %v2680_v33  ;;  %v8803_v61 = vpop.f32.mrb[210].mxu0 }
 0x2f2   :  { %3436 = vst [vmem:[%s9136_s5 + $0x90] sm:$0xff] %v3980_v13  ;;  %v8810_v10 = vpop.f32.mrb[211].mxu0 }
 0x2f3   :  { %3437 = vst.msk [vmem:[%s9136_s5 + $0x98] sm:$0xff] %vm462_vm0, %v3982_v9  ;;  %v3257_v34 = vpop.f32.mrb[94].mxu1 }
 0x2f4   :  { %v3984_v20 = vadd.f32 %v3257_v34, %v2684_v18  ;;  %v3259_v37 = vpop.f32.mrb[95].mxu1 }
 0x2f5   :  { %v3986_v38 = vadd.f32 %v3259_v37, %v2686_v25  ;;  %v8818_v55 = vpop.f32.mrb[212].mxu0 }
 0x2f6   :  { %3438 = vst [vmem:[%s9136_s5 + $0xa0] sm:$0xff] %v3984_v20  ;;  %v8825_v23 = vpop.f32.mrb[213].mxu0 }
 0x2f7   :  { %3439 = vst.msk [vmem:[%s9136_s5 + $0xa8] sm:$0xff] %vm462_vm0, %v3986_v38  ;;  %v3263_v39 = vpop.f32.mrb[96].mxu1 }
 0x2f8   :  { %v3988_v12 = vadd.f32 %v3263_v39, %v2690_v3  ;;  %v3265_v4 = vpop.f32.mrb[97].mxu1 }
 0x2f9   :  { %v3990_v40 = vadd.f32 %v3265_v4, %v2692_v16  ;;  %v8833_v21 = vpop.f32.mrb[214].mxu0 }
 0x2fa   :  { %3440 = vst [vmem:[%s9136_s5 + $0xb0] sm:$0xff] %v3988_v12  ;;  %v8840_v33 = vpop.f32.mrb[215].mxu0 }
 0x2fb   :  { %3441 = vst.msk [vmem:[%s9136_s5 + $0xb8] sm:$0xff] %vm462_vm0, %v3990_v40  ;;  %v3269_v8 = vpop.f32.mrb[98].mxu1 }
 0x2fc   :  { %v3992_v13 = vadd.f32 %v3269_v8, %v2696_v14  ;;  %v3271_v46 = vpop.f32.mrb[99].mxu1 }
 0x2fd   :  { %v3994_v9 = vadd.f32 %v3271_v46, %v2698_v11  ;;  %v8848_v18 = vpop.f32.mrb[216].mxu0 }
 0x2fe   :  { %3442 = vst [vmem:[%s9136_s5 + $0xc0] sm:$0xff] %v3992_v13  ;;  %v8855_v25 = vpop.f32.mrb[217].mxu0 }
 0x2ff   :  { %3443 = vst.msk [vmem:[%s9136_s5 + $0xc8] sm:$0xff] %vm462_vm0, %v3994_v9  ;;  %v3275_v34 = vpop.f32.mrb[100].mxu1 }
 0x300   :  { %v3996_v20 = vadd.f32 %v3275_v34, %v2702_v27  ;;  %v3277_v37 = vpop.f32.mrb[101].mxu1  ;;  %v2722_v27 = vadd.f32 %v8631_v58, %v8658_v49 }
 0x301   :  { %v3998_v38 = vadd.f32 %v3277_v37, %v2704_v6  ;;  %v8863_v3 = vpop.f32.mrb[218].mxu0  ;;  %v2726_v37 = vadd.f32 %v8633_v32, %v8652_v59  ;;  %v2734_v32 = vadd.f32 %v8639_v15, %v8658_v49 }
 0x302   :  { %3444 = vst [vmem:[%s9136_s5 + $0xd0] sm:$0xff] %v3996_v20  ;;  %v8870_v16 = vpop.f32.mrb[219].mxu0 }
 0x303   :  { %3445 = vst.msk [vmem:[%s9136_s5 + $0xd8] sm:$0xff] %vm462_vm0, %v3998_v38  ;;  %v3281_v39 = vpop.f32.mrb[102].mxu1 }
 0x304   :  { %v4000_v12 = vadd.f32 %v3281_v39, %v2708_v24  ;;  %v3283_v4 = vpop.f32.mrb[103].mxu1  ;;  %v2732_v39 = vadd.f32 %v8637_v29, %v8652_v59  ;;  %v2740_v29 = vadd.f32 %v8643_v45, %v8658_v49 }
 0x305   :  { %v4002_v40 = vadd.f32 %v3283_v4, %v2710_v22  ;;  %v8878_v14 = vpop.f32.mrb[220].mxu0 }
 0x306   :  { %3446 = vst [vmem:[%s9136_s5 + $0xe0] sm:$0xff] %v4000_v12  ;;  %v8885_v11 = vpop.f32.mrb[221].mxu0 }
 0x307   :  { %3447 = vst.msk [vmem:[%s9136_s5 + $0xe8] sm:$0xff] %vm462_vm0, %v4002_v40  ;;  %v3287_v8 = vpop.f32.mrb[104].mxu1 }
 0x308   :  { %v4004_v13 = vadd.f32 %v3287_v8, %v2714_v44  ;;  %v3289_v46 = vpop.f32.mrb[105].mxu1  ;;  %v2738_v44 = vadd.f32 %v8641_v43, %v8652_v59  ;;  %v2746_v43 = vadd.f32 %v8654_v52, %v8658_v49 }
 0x309   :  { %v4006_v9 = vadd.f32 %v3289_v46, %v2716_v7  ;;  %v2744_v46 = vadd.f32 %v8648_v51, %v8652_v59  ;;  %v2752_v51 = vadd.f32 %v8664_v47, %v8658_v49 }
 0x30a   :  { %3448 = vst [vmem:[%s9136_s5 + $0xf0] sm:$0xff] %v4004_v13 }
 0x30b   :  { %3449 = vst.msk [vmem:[%s9136_s5 + $0xf8] sm:$0xff] %vm462_vm0, %v4006_v9  ;;  %v3293_v26 = vpop.f32.mrb[106].mxu1 }
 0x30c   :  { %v4008_v6 = vadd.f32 %v3293_v26, %v2720_v35  ;;  %v3295_v34 = vpop.f32.mrb[107].mxu1  ;;  %v2750_v26 = vadd.f32 %v8660_v53, %v8652_v59  ;;  %v2758_v53 = vadd.f32 %v8675_v63, %v8658_v49 }
 0x30d   :  { %v4010_v20 = vadd.f32 %v3295_v34, %v2722_v27 }
 0x30e   :  { %3450 = vst [vmem:[%s9136_s5 + $0x100] sm:$0xff] %v4008_v6 }
 0x30f   :  { %3451 = vst.msk [vmem:[%s9136_s5 + $0x108] sm:$0xff] %vm462_vm0, %v4010_v20  ;;  %v3299_v58 = vpop.f32.mrb[108].mxu1 }
 0x310   :  { %v4012_v38 = vadd.f32 %v3299_v58, %v2726_v37  ;;  %v3301_v24 = vpop.f32.mrb[109].mxu1  ;;  %v2756_v37 = vadd.f32 %v8668_v17, %v8652_v59  ;;  %v2764_v17 = vadd.f32 %v8690_v48, %v8658_v49 }
 0x311   :  { %v4014_v22 = vadd.f32 %v3301_v24, %v2728_v57  ;;  %v2762_v24 = vadd.f32 %v8683_v62, %v8652_v59  ;;  %v2770_v62 = vadd.f32 %v8705_v36, %v8658_v49 }
 0x312   :  { %3452 = vst [vmem:[%s9136_s5 + $0x110] sm:$0xff] %v4012_v38 }
 0x313   :  { %3453 = vst.msk [vmem:[%s9136_s5 + $0x118] sm:$0xff] %vm462_vm0, %v4014_v22  ;;  %v3305_v30 = vpop.f32.mrb[110].mxu1 }
 0x314   :  { %v4016_v12 = vadd.f32 %v3305_v30, %v2732_v39  ;;  %v3307_v4 = vpop.f32.mrb[111].mxu1  ;;  %v2768_v30 = vadd.f32 %v8698_v50, %v8652_v59  ;;  %v2776_v50 = vadd.f32 %v8720_v42, %v8658_v49 }
 0x315   :  { %v4018_v40 = vadd.f32 %v3307_v4, %v2734_v32 }
 0x316   :  { %3454 = vst [vmem:[%s9136_s5 + $0x120] sm:$0xff] %v4016_v12 }
 0x317   :  { %3455 = vst.msk [vmem:[%s9136_s5 + $0x128] sm:$0xff] %vm462_vm0, %v4018_v40  ;;  %v3311_v15 = vpop.f32.mrb[112].mxu1 }
 0x318   :  { %v4020_v7 = vadd.f32 %v3311_v15, %v2738_v44  ;;  %v3313_v8 = vpop.f32.mrb[113].mxu1  ;;  %v2774_v44 = vadd.f32 %v8713_v5, %v8652_v59  ;;  %v2782_v5 = vadd.f32 %v8735_v31, %v8658_v49 }
 0x319   :  { %v4022_v13 = vadd.f32 %v3313_v8, %v2740_v29  ;;  %v2780_v8 = vadd.f32 %v8728_v28, %v8652_v59  ;;  %v2788_v28 = vadd.f32 %v8750_v0, %v8658_v49 }
 0x31a   :  { %3456 = vst [vmem:[%s9136_s5 + $0x130] sm:$0xff] %v4020_v7 }
 0x31b   :  { %3457 = vst.msk [vmem:[%s9136_s5 + $0x138] sm:$0xff] %vm462_vm0, %v4022_v13  ;;  %v3317_v45 = vpop.f32.mrb[114].mxu1 }
 0x31c   :  { %v4024_v9 = vadd.f32 %v3317_v45, %v2744_v46  ;;  %v3319_v35 = vpop.f32.mrb[115].mxu1  ;;  %v2786_v45 = vadd.f32 %v8743_v56, %v8652_v59  ;;  %v2794_v56 = vadd.f32 %v8765_v1, %v8658_v49 }
 0x31d   :  { %v4026_v27 = vadd.f32 %v3319_v35, %v2746_v43 }
 0x31e   :  { %3458 = vst [vmem:[%s9136_s5 + $0x140] sm:$0xff] %v4024_v9 }
 0x31f   :  { %3459 = vst.msk [vmem:[%s9136_s5 + $0x148] sm:$0xff] %vm462_vm0, %v4026_v27  ;;  %v3323_v52 = vpop.f32.mrb[116].mxu1 }
 0x320   :  { %v4028_v6 = vadd.f32 %v3323_v52, %v2750_v26  ;;  %v3325_v34 = vpop.f32.mrb[117].mxu1  ;;  %v2792_v26 = vadd.f32 %v8758_v19, %v8652_v59  ;;  %v2800_v19 = vadd.f32 %v8780_v41, %v8658_v49 }
 0x321   :  { %v4030_v20 = vadd.f32 %v3325_v34, %v2752_v51  ;;  %v2798_v34 = vadd.f32 %v8773_v60, %v8652_v59  ;;  %v2806_v60 = vadd.f32 %v8795_v54, %v8658_v49 }
 0x322   :  { %3460 = vst [vmem:[%s9136_s5 + $0x150] sm:$0xff] %v4028_v6 }
 0x323   :  { %3461 = vst.msk [vmem:[%s9136_s5 + $0x158] sm:$0xff] %vm462_vm0, %v4030_v20  ;;  %v3329_v47 = vpop.f32.mrb[118].mxu1 }
 0x324   :  { %v4032_v57 = vadd.f32 %v3329_v47, %v2756_v37  ;;  %v3331_v58 = vpop.f32.mrb[119].mxu1  ;;  %v2804_v47 = vadd.f32 %v8788_v2, %v8652_v59  ;;  %v2812_v2 = vadd.f32 %v8810_v10, %v8658_v49 }
 0x325   :  { %v4034_v38 = vadd.f32 %v3331_v58, %v2758_v53 }
 0x326   :  { %3462 = vst [vmem:[%s9136_s5 + $0x160] sm:$0xff] %v4032_v57 }
 0x327   :  { %3463 = vst.msk [vmem:[%s9136_s5 + $0x168] sm:$0xff] %vm462_vm0, %v4034_v38  ;;  %v3335_v63 = vpop.f32.mrb[120].mxu1 }
 0x328   :  { %v4036_v22 = vadd.f32 %v3335_v63, %v2762_v24  ;;  %v3337_v39 = vpop.f32.mrb[121].mxu1  ;;  %v2810_v24 = vadd.f32 %v8803_v61, %v8652_v59  ;;  %v2818_v61 = vadd.f32 %v8825_v23, %v8658_v49 }
 0x329   :  { %v4038_v32 = vadd.f32 %v3337_v39, %v2764_v17  ;;  %v2816_v39 = vadd.f32 %v8818_v55, %v8652_v59  ;;  %v2824_v55 = vadd.f32 %v8840_v33, %v8658_v49 }
 0x32a   :  { %3464 = vst [vmem:[%s9136_s5 + $0x170] sm:$0xff] %v4036_v22 }
 0x32b   :  { %3465 = vst.msk [vmem:[%s9136_s5 + $0x178] sm:$0xff] %vm462_vm0, %v4038_v32  ;;  %v3341_v48 = vpop.f32.mrb[122].mxu1 }
 0x32c   :  { %v4040_v12 = vadd.f32 %v3341_v48, %v2768_v30  ;;  %v3343_v4 = vpop.f32.mrb[123].mxu1  ;;  %v2822_v48 = vadd.f32 %v8833_v21, %v8652_v59  ;;  %v2830_v21 = vadd.f32 %v8855_v25, %v8658_v49 }
 0x32d   :  { %v4042_v40 = vadd.f32 %v3343_v4, %v2770_v62 }
 0x32e   :  { %3466 = vst [vmem:[%s9136_s5 + $0x180] sm:$0xff] %v4040_v12 }
 0x32f   :  { %3467 = vst.msk [vmem:[%s9136_s5 + $0x188] sm:$0xff] %vm462_vm0, %v4042_v40  ;;  %v3347_v36 = vpop.f32.mrb[124].mxu1 }
 0x330   :  { %v4044_v29 = vadd.f32 %v3347_v36, %v2774_v44  ;;  %v3349_v15 = vpop.f32.mrb[125].mxu1  ;;  %v2828_v44 = vadd.f32 %v8848_v18, %v8652_v59  ;;  %v2836_v18 = vadd.f32 %v8870_v16, %v8658_v49 }
 0x331   :  { %v4046_v7 = vadd.f32 %v3349_v15, %v2776_v50  ;;  %v2834_v15 = vadd.f32 %v8863_v3, %v8652_v59  ;;  %v2842_v3 = vadd.f32 %v8885_v11, %v8658_v49 }
 0x332   :  { %3468 = vst [vmem:[%s9136_s5 + $0x190] sm:$0xff] %v4044_v29 }
 0x333   :  { %3469 = vst.msk [vmem:[%s9136_s5 + $0x198] sm:$0xff] %vm462_vm0, %v4046_v7  ;;  %v3353_v42 = vpop.f32.mrb[126].mxu1 }
 0x334   :  { %v4048_v13 = vadd.f32 %v3353_v42, %v2780_v8  ;;  %v3355_v46 = vpop.f32.mrb[127].mxu1  ;;  %v2840_v42 = vadd.f32 %v8878_v14, %v8652_v59 }
 0x335   :  { %v4050_v43 = vadd.f32 %v3355_v46, %v2782_v5 }
 0x336   :  { %3470 = vst [vmem:[%s9136_s5 + $0x1a0] sm:$0xff] %v4048_v13 }
 0x337   :  { %3471 = vst.msk [vmem:[%s9136_s5 + $0x1a8] sm:$0xff] %vm462_vm0, %v4050_v43  ;;  %v3359_v31 = vpop.f32.mrb[128].mxu1 }
 0x338   :  { %v4052_v9 = vadd.f32 %v3359_v31, %v2786_v45  ;;  %v3361_v35 = vpop.f32.mrb[129].mxu1 }
 0x339   :  { %v4054_v27 = vadd.f32 %v3361_v35, %v2788_v28 }
 0x33a   :  { %3472 = vst [vmem:[%s9136_s5 + $0x1b0] sm:$0xff] %v4052_v9 }
 0x33b   :  { %3473 = vst.msk [vmem:[%s9136_s5 + $0x1b8] sm:$0xff] %vm462_vm0, %v4054_v27  ;;  %v3365_v0 = vpop.f32.mrb[130].mxu1 }
 0x33c   :  { %v4056_v51 = vadd.f32 %v3365_v0, %v2792_v26  ;;  %v3367_v52 = vpop.f32.mrb[131].mxu1 }
 0x33d   :  { %v4058_v6 = vadd.f32 %v3367_v52, %v2794_v56 }
 0x33e   :  { %3474 = vst [vmem:[%s9136_s5 + $0x1c0] sm:$0xff] %v4056_v51 }
 0x33f   :  { %3475 = vst.msk [vmem:[%s9136_s5 + $0x1c8] sm:$0xff] %vm462_vm0, %v4058_v6  ;;  %v3371_v1 = vpop.f32.mrb[132].mxu1 }
 0x340   :  { %v4060_v20 = vadd.f32 %v3371_v1, %v2798_v34  ;;  %v3373_v37 = vpop.f32.mrb[133].mxu1 }
 0x341   :  { %v4062_v53 = vadd.f32 %v3373_v37, %v2800_v19 }
 0x342   :  { %3476 = vst [vmem:[%s9136_s5 + $0x1d0] sm:$0xff] %v4060_v20 }
 0x343   :  { %3477 = vst.msk [vmem:[%s9136_s5 + $0x1d8] sm:$0xff] %vm462_vm0, %v4062_v53  ;;  %v3377_v41 = vpop.f32.mrb[134].mxu1 }
 0x344   :  { %v4064_v57 = vadd.f32 %v3377_v41, %v2804_v47  ;;  %v3379_v58 = vpop.f32.mrb[135].mxu1 }
 0x345   :  { %v4066_v38 = vadd.f32 %v3379_v58, %v2806_v60 }
 0x346   :  { %3478 = vst [vmem:[%s9136_s5 + $0x1e0] sm:$0xff] %v4064_v57 }
 0x347   :  { %3479 = vst.msk [vmem:[%s9136_s5 + $0x1e8] sm:$0xff] %vm462_vm0, %v4066_v38  ;;  %v3383_v54 = vpop.f32.mrb[136].mxu1 }
 0x348   :  { %v4068_v17 = vadd.f32 %v3383_v54, %v2810_v24  ;;  %v3385_v63 = vpop.f32.mrb[137].mxu1 }
 0x349   :  { %v4070_v22 = vadd.f32 %v3385_v63, %v2812_v2 }
 0x34a   :  { %3480 = vst [vmem:[%s9136_s5 + $0x1f0] sm:$0xff] %v4068_v17 }
 0x34b   :  { %3481 = vst.msk [vmem:[%s9136_s5 + $0x1f8] sm:$0xff] %vm462_vm0, %v4070_v22  ;;  %v3389_v10 = vpop.f32.mrb[138].mxu1 }
 0x34c   :  { %v4072_v32 = vadd.f32 %v3389_v10, %v2816_v39  ;;  %v3391_v30 = vpop.f32.mrb[139].mxu1 }
 0x34d   :  { %v4074_v62 = vadd.f32 %v3391_v30, %v2818_v61 }
 0x34e   :  { %3482 = vst [vmem:[%s9136_s5 + $0x200] sm:$0xff] %v4072_v32 }
 0x34f   :  { %3483 = vst.msk [vmem:[%s9136_s5 + $0x208] sm:$0xff] %vm462_vm0, %v4074_v62  ;;  %v3395_v23 = vpop.f32.mrb[140].mxu1 }
 0x350   :  { %v4076_v12 = vadd.f32 %v3395_v23, %v2822_v48  ;;  %v3397_v4 = vpop.f32.mrb[141].mxu1 }
 0x351   :  { %v4078_v40 = vadd.f32 %v3397_v4, %v2824_v55 }
 0x352   :  { %3484 = vst [vmem:[%s9136_s5 + $0x210] sm:$0xff] %v4076_v12 }
 0x353   :  { %3485 = vst.msk [vmem:[%s9136_s5 + $0x218] sm:$0xff] %vm462_vm0, %v4078_v40  ;;  %v3401_v33 = vpop.f32.mrb[142].mxu1 }
 0x354   :  { %v4080_v50 = vadd.f32 %v3401_v33, %v2828_v44  ;;  %v3403_v36 = vpop.f32.mrb[143].mxu1 }
 0x355   :  { %v4082_v29 = vadd.f32 %v3403_v36, %v2830_v21 }
 0x356   :  { %3486 = vst [vmem:[%s9136_s5 + $0x220] sm:$0xff] %v4080_v50 }
 0x357   :  { %3487 = vst.msk [vmem:[%s9136_s5 + $0x228] sm:$0xff] %vm462_vm0, %v4082_v29  ;;  %v3407_v25 = vpop.f32.mrb[144].mxu1 }
 0x358   :  { %v4084_v7 = vadd.f32 %v3407_v25, %v2834_v15  ;;  %v3409_v8 = vpop.f32.mrb[145].mxu1 }
 0x359   :  { %v4086_v5 = vadd.f32 %v3409_v8, %v2836_v18 }
 0x35a   :  { %3488 = vst [vmem:[%s9136_s5 + $0x230] sm:$0xff] %v4084_v7 }
 0x35b   :  { %3489 = vst.msk [vmem:[%s9136_s5 + $0x238] sm:$0xff] %vm462_vm0, %v4086_v5  ;;  %v3413_v16 = vpop.f32.mrb[146].mxu1 }
 0x35c   :  { %v4088_v13 = vadd.f32 %v3413_v16, %v2840_v42  ;;  %v3415_v46 = vpop.f32.mrb[147].mxu1 }
 0x35d   :  { %v4090_v43 = vadd.f32 %v3415_v46, %v2842_v3 }
 0x35e   :  { %3490 = vst [vmem:[%s9136_s5 + $0x240] sm:$0xff] %v4088_v13 }
 0x35f   :  { %3491 = vst.msk [vmem:[%s9136_s5 + $0x248] sm:$0xff] %vm462_vm0, %v4090_v43 }

</bundles_post_ra>
